<compile_context>
chip_gen: v7x
topology: tpu7x:2x2x1
jax: 0.10.0
libtpu: 0.0.40
codegen_flags: <defaults>
</compile_context>

<pallas_src>
import functools

import jax
import jax.numpy as jnp
from jax import lax
from jax.experimental import pallas as pl
from jax.experimental.pallas import tpu as pltpu

LRELU_SLOPE = 0.01
IN_EPS = 1e-5


def _round_up(x, m):
    return (x + m - 1) // m * m


def _decode_conv_unit_kernel(x_ref, coords_ref, w1_ref, b1_ref, w2_ref, b2_ref,
                             o_ref,
                             xflat1_ref, xflat2_ref, col1_ref, col2_ref,
                             *, D, H, W, Cin, Cmid, Cout, pad):
    """Fused (conv3d 3x3x3 pad=1 + bias -> InstanceNorm3d -> LeakyReLU) x 2
    for one batch element.  All data is (rows, DHW) with DHW on the lane axis.

    x_ref      : (1, Cin, DHW)         input tile (channel-major, lane dense)
    coords_ref : (3, DHW) int32        rows = (d, h, w) of each flattened pos
    w1_ref     : (Cmid, K1) bf16       layer-1 weights, cols (tap, cin), K-padded
    b1_ref     : (Cmid, 1)  f32
    w2_ref     : (Cout, K2) bf16       layer-2 weights, cols (tap, cmid), K-padded
    b2_ref     : (Cout, 1)  f32
    o_ref      : (1, Cout, DHW)        output tile (channel-major, lane dense)
    xflat*_ref : (C, pad+DHW+pad) f32  flat activations with lane halos
    col*_ref   : (K*, DHW) bf16        im2col slabs, rows ordered (tap, c)
    """
    DHW = D * H * W
    HW = H * W

    # Boundary masks: one compare per face, reused by all 27 taps of both layers.
    d = coords_ref[0:1, :]
    h = coords_ref[1:2, :]
    w = coords_ref[2:3, :]
    lo = (d >= 1, h >= 1, w >= 1)
    hi = (d <= D - 2, h <= H - 2, w <= W - 2)

    def tap_mask(deltas):
        m = None
        for ax, delta in enumerate(deltas):
            if delta == 0:
                continue
            face = lo[ax] if delta < 0 else hi[ax]
            m = face if m is None else jnp.logical_and(m, face)
        return m

    def build_col(xflat_ref, col_ref, C):
        K = col_ref.shape[0]
        # Zero the K-padding rows every step (scratch starts uninitialized; the
        # matching weight columns are zero, but NaN garbage would still poison
        # the f32 accumulation).
        if K > 27 * C:
            col_ref[27 * C:, :] = jnp.zeros((K - 27 * C, DHW), col_ref.dtype)
        tap = 0
        for dd in (-1, 0, 1):
            for dh in (-1, 0, 1):
                for dw in (-1, 0, 1):
                    off = dd * HW + dh * W + dw
                    # lane-shifted view of the flat activation (512 lanes wide)
                    shifted = xflat_ref[:, pad + off:pad + off + DHW]
                    m = tap_mask((dd, dh, dw))
                    if m is not None:
                        shifted = jnp.where(m, shifted, 0.0)
                    col_ref[tap * C:(tap + 1) * C, :] = shifted.astype(col_ref.dtype)
                    tap += 1

    def instance_norm_lrelu(y):
        # Dropout3d: identity (inference mode).
        # InstanceNorm3d: biased variance over the DHW (lane) axis per channel,
        # eps=1e-5, no affine.  Then LeakyReLU(0.01).  All in f32.
        mean = jnp.mean(y, axis=1, keepdims=True)
        var = jnp.mean(jnp.square(y - mean), axis=1, keepdims=True)
        y = (y - mean) * lax.rsqrt(var + IN_EPS)
        return jnp.where(y > 0, y, LRELU_SLOPE * y)

    # ---------------- layer 1 ----------------
    # zero only the lane halos (the interior is fully overwritten each step)
    xflat1_ref[:, :pad] = jnp.zeros((Cin, pad), jnp.float32)
    xflat1_ref[:, pad + DHW:] = jnp.zeros((Cin, pad), jnp.float32)
    xflat1_ref[:, pad:pad + DHW] = x_ref[0]
    build_col(xflat1_ref, col1_ref, Cin)
    y1 = jnp.dot(w1_ref[...], col1_ref[...],
                 preferred_element_type=jnp.float32)            # (Cmid, DHW)
    y1 = instance_norm_lrelu(y1 + b1_ref[...])

    # ---------------- layer 2 ---------------- (intermediate stays in VMEM)
    xflat2_ref[:, :pad] = jnp.zeros((Cmid, pad), jnp.float32)
    xflat2_ref[:, pad + DHW:] = jnp.zeros((Cmid, pad), jnp.float32)
    xflat2_ref[:, pad:pad + DHW] = y1
    build_col(xflat2_ref, col2_ref, Cmid)
    y2 = jnp.dot(w2_ref[...], col2_ref[...],
                 preferred_element_type=jnp.float32)            # (Cout, DHW)
    y2 = instance_norm_lrelu(y2 + b2_ref[...])

    o_ref[0] = y2.astype(o_ref.dtype)                           # lane-dense store


def decode_conv_unit(x_ncdhw, params):
    """Forward of DecodeConvUnit.  Input/output in PyTorch NCDHW layout."""
    (w1, b1), (w2, b2) = params
    N, Cin, D, H, W = x_ncdhw.shape
    Cmid = w1.shape[-1]
    Cout = w2.shape[-1]
    DHW = D * H * W

    # Lane halo: covers the largest tap shift (H*W + W + 1), rounded to a lane
    # multiple so the interior stays 128-aligned.
    pad = _round_up(H * W + W + 1, 128)
    K1 = _round_up(27 * Cin, 128)
    K2 = _round_up(27 * Cmid, 128)

    # FREE reshape (no transpose): NCDHW -> (N, C, DHW).  DHW stays on the lane
    # axis end to end; the output needs no transpose either.
    x_flat = x_ncdhw.reshape(N, Cin, DHW)

    # (d, h, w) coordinate of every flattened position -> 6 boundary masks.
    dd, hh, ww = jnp.meshgrid(jnp.arange(D, dtype=jnp.int32),
                              jnp.arange(H, dtype=jnp.int32),
                              jnp.arange(W, dtype=jnp.int32), indexing="ij")
    coords = jnp.stack([dd.reshape(-1), hh.reshape(-1), ww.reshape(-1)])  # (3, DHW)

    # Weight layouts matching the im2col row order (tap-major, then channel),
    # zero-padded on K to a lane multiple, pre-cast to bf16 (MXU-native input;
    # accumulation stays f32).
    def prep_w(wk, cin, kpad):
        cout = wk.shape[-1]
        wm = jnp.transpose(wk.reshape(27 * cin, cout))           # (cout, 27*cin)
        wm = jnp.pad(wm, ((0, 0), (0, kpad - 27 * cin)))
        return wm.astype(jnp.bfloat16)

    w1_mat = prep_w(w1, Cin, K1)                                 # (Cmid, K1)
    w2_mat = prep_w(w2, Cmid, K2)                                # (Cout, K2)
    b1_col = b1.reshape(Cmid, 1).astype(jnp.float32)
    b2_col = b2.reshape(Cout, 1).astype(jnp.float32)

    kernel = functools.partial(_decode_conv_unit_kernel,
                               D=D, H=H, W=W, Cin=Cin, Cmid=Cmid, Cout=Cout,
                               pad=pad)

    out = pl.pallas_call(
        kernel,
        out_shape=jax.ShapeDtypeStruct((N, Cout, DHW), x_ncdhw.dtype),
        grid_spec=pltpu.PrefetchScalarGridSpec(
            num_scalar_prefetch=0,
            grid=(N,),                  # N>=2 keeps both v7x TensorCores busy
            in_specs=[
                pl.BlockSpec((1, Cin, DHW), lambda n: (n, 0, 0)),
                pl.BlockSpec((3, DHW), lambda n: (0, 0)),
                pl.BlockSpec((Cmid, K1), lambda n: (0, 0)),
                pl.BlockSpec((Cmid, 1), lambda n: (0, 0)),
                pl.BlockSpec((Cout, K2), lambda n: (0, 0)),
                pl.BlockSpec((Cout, 1), lambda n: (0, 0)),
            ],
            out_specs=pl.BlockSpec((1, Cout, DHW), lambda n: (n, 0, 0)),
            scratch_shapes=[
                pltpu.VMEM((Cin, pad + DHW + pad), jnp.float32),   # xflat1
                pltpu.VMEM((Cmid, pad + DHW + pad), jnp.float32),  # xflat2
                pltpu.VMEM((K1, DHW), jnp.bfloat16),               # col1
                pltpu.VMEM((K2, DHW), jnp.bfloat16),               # col2
            ],
        ),
        compiler_params=pltpu.CompilerParams(
            dimension_semantics=("parallel",),
            # plenty at this shape; raise together with DHW chunking when scaling
            vmem_limit_bytes=32 * 1024 * 1024,
        ),
    )(x_flat, coords, w1_mat, b1_col, w2_mat, b2_col)

    # free reshape (no transpose): (N, Cout, D*H*W) -> (N, Cout, D, H, W)
    return out.reshape(N, Cout, D, H, W)


def init_conv_params(key, cin, cout):
    """Deterministic Conv3d-style init (uniform +/- 1/sqrt(fan_in)), DHWIO layout."""
    kw_key, kb_key = jax.random.split(key)
    fan_in = cin * 27
    bound = 1.0 / jnp.sqrt(jnp.float32(fan_in))
    w = jax.random.uniform(kw_key, (3, 3, 3, cin, cout), jnp.float32,
                           minval=-bound, maxval=bound)
    b = jax.random.uniform(kb_key, (cout,), jnp.float32,
                           minval=-bound, maxval=bound)
    return w, b


def _reference_layer(x, w, b):
    """Pure-JAX f32 reference of one layer (NDHWC), for correctness checking."""
    y = lax.conv_general_dilated(
        x, w, window_strides=(1, 1, 1), padding="SAME",
        dimension_numbers=("NDHWC", "DHWIO", "NDHWC"))
    y = y + b[None, None, None, None, :]
    mean = jnp.mean(y, axis=(1, 2, 3), keepdims=True)
    var = jnp.mean((y - mean) ** 2, axis=(1, 2, 3), keepdims=True)
    y = (y - mean) * lax.rsqrt(var + IN_EPS)
    return jnp.where(y > 0, y, LRELU_SLOPE * y)


if __name__ == "__main__":
    # channels = (in_, mid_, out_)
    channels = (4, 8, 4)
    N, D, H, W = 2, 8, 8, 8

    key = jax.random.PRNGKey(0)
    kx, k1, k2 = jax.random.split(key, 3)

    x_ncdhw = jax.random.normal(kx, (N, channels[0], D, H, W), jnp.float32)
    params = (init_conv_params(k1, channels[0], channels[1]),
              init_conv_params(k2, channels[1], channels[2]))

    out = jax.jit(decode_conv_unit)(x_ncdhw, params)
    out = jax.block_until_ready(out)
    assert out.shape == (N, channels[2], D, H, W), out.shape

    # Correctness check vs. a pure-JAX f32 reference.  The kernel feeds the MXU
    # bf16 operands (f32 accumulation), so tolerances are bf16-level.
    x_ndhwc = jnp.transpose(x_ncdhw, (0, 2, 3, 4, 1))
    ref = _reference_layer(x_ndhwc, *params[0])
    ref = _reference_layer(ref, *params[1])
    ref = jnp.transpose(ref, (0, 4, 1, 2, 3))
    max_err = float(jnp.max(jnp.abs(out - ref)))
    assert jnp.allclose(out, ref, rtol=2e-2, atol=5e-2), max_err

    print("KERNEL_OK")
</pallas_src>

<mosaic_0001>
module attributes {stable_mosaic.version = 11 : i64} {
  func.func @_decode_conv_unit_kernel(%arg0: i32, %arg1: memref<1x4x512xf32, #tpu.memory_space<vmem>>, %arg2: memref<3x512xi32, #tpu.memory_space<vmem>>, %arg3: memref<8x128xbf16, #tpu.memory_space<vmem>>, %arg4: memref<8x1xf32, #tpu.memory_space<vmem>>, %arg5: memref<4x256xbf16, #tpu.memory_space<vmem>>, %arg6: memref<4x1xf32, #tpu.memory_space<vmem>>, %arg7: memref<1x4x512xf32, #tpu.memory_space<vmem>>, %arg8: memref<4x768xf32, #tpu.memory_space<vmem>>, %arg9: memref<8x768xf32, #tpu.memory_space<vmem>>, %arg10: memref<128x512xbf16, #tpu.memory_space<vmem>>, %arg11: memref<256x512xbf16, #tpu.memory_space<vmem>>) attributes {dimension_semantics = [#tpu.dimension_semantics<parallel>], iteration_bounds = array<i64: 2>, scalar_prefetch = 0 : i64, scratch_operands = 4 : i64, tpu.core_type = #tpu.core_type<tc>, window_params = [{transform_indices = @transform_0, window_bounds = array<i64: 1, 4, 512>}, {pipeline_mode = #tpu.pipeline_mode<synchronous>, transform_indices = @transform_1, window_bounds = array<i64: 3, 512>}, {pipeline_mode = #tpu.pipeline_mode<synchronous>, transform_indices = @transform_2, window_bounds = array<i64: 8, 128>}, {pipeline_mode = #tpu.pipeline_mode<synchronous>, transform_indices = @transform_3, window_bounds = array<i64: 8, 1>}, {pipeline_mode = #tpu.pipeline_mode<synchronous>, transform_indices = @transform_4, window_bounds = array<i64: 4, 256>}, {pipeline_mode = #tpu.pipeline_mode<synchronous>, transform_indices = @transform_5, window_bounds = array<i64: 4, 1>}, {transform_indices = @transform_6, window_bounds = array<i64: 1, 4, 512>}]} {
    %c0 = arith.constant 0 : index
    %c0_0 = arith.constant 0 : index
    %0 = vector.load %arg2[%c0, %c0_0] : memref<3x512xi32, #tpu.memory_space<vmem>>, vector<1x512xi32>
    %c1 = arith.constant 1 : index
    %c0_1 = arith.constant 0 : index
    %1 = vector.load %arg2[%c1, %c0_1] : memref<3x512xi32, #tpu.memory_space<vmem>>, vector<1x512xi32>
    %c2 = arith.constant 2 : index
    %c0_2 = arith.constant 0 : index
    %2 = vector.load %arg2[%c2, %c0_2] : memref<3x512xi32, #tpu.memory_space<vmem>>, vector<1x512xi32>
    %c1_i32 = arith.constant 1 : i32
    %3 = vector.broadcast %c1_i32 : i32 to vector<1x512xi32>
    %4 = arith.cmpi sge, %0, %3 : vector<1x512xi32>
    %c1_i32_3 = arith.constant 1 : i32
    %5 = vector.broadcast %c1_i32_3 : i32 to vector<1x512xi32>
    %6 = arith.cmpi sge, %1, %5 : vector<1x512xi32>
    %c1_i32_4 = arith.constant 1 : i32
    %7 = vector.broadcast %c1_i32_4 : i32 to vector<1x512xi32>
    %8 = arith.cmpi sge, %2, %7 : vector<1x512xi32>
    %c6_i32 = arith.constant 6 : i32
    %9 = vector.broadcast %c6_i32 : i32 to vector<1x512xi32>
    %10 = arith.cmpi sle, %0, %9 : vector<1x512xi32>
    %c6_i32_5 = arith.constant 6 : i32
    %11 = vector.broadcast %c6_i32_5 : i32 to vector<1x512xi32>
    %12 = arith.cmpi sle, %1, %11 : vector<1x512xi32>
    %c6_i32_6 = arith.constant 6 : i32
    %13 = vector.broadcast %c6_i32_6 : i32 to vector<1x512xi32>
    %14 = arith.cmpi sle, %2, %13 : vector<1x512xi32>
    %cst = arith.constant 0.000000e+00 : f32
    %15 = vector.broadcast %cst : f32 to vector<4x128xf32>
    %c0_7 = arith.constant 0 : index
    %c0_8 = arith.constant 0 : index
    %16 = vector.load %arg8[%c0_7, %c0_8] : memref<4x768xf32, #tpu.memory_space<vmem>>, vector<4x128xf32>
    tpu.vector_store %arg8[%c0_7, %c0_8], %15 {strides = array<i32>} : memref<4x768xf32, #tpu.memory_space<vmem>>, vector<4x128xf32>,
    %cst_9 = arith.constant 0.000000e+00 : f32
    %17 = vector.broadcast %cst_9 : f32 to vector<4x128xf32>
    %c0_10 = arith.constant 0 : index
    %c640 = arith.constant 640 : index
    %18 = vector.load %arg8[%c0_10, %c640] : memref<4x768xf32, #tpu.memory_space<vmem>>, vector<4x128xf32>
    tpu.vector_store %arg8[%c0_10, %c640], %17 {strides = array<i32>} : memref<4x768xf32, #tpu.memory_space<vmem>>, vector<4x128xf32>,
    %c0_11 = arith.constant 0 : index
    %c0_12 = arith.constant 0 : index
    %c0_13 = arith.constant 0 : index
    %19 = vector.load %arg1[%c0_11, %c0_12, %c0_13] : memref<1x4x512xf32, #tpu.memory_space<vmem>>, vector<1x4x512xf32>
    %20 = vector.shape_cast %19 : vector<1x4x512xf32> to vector<4x512xf32>
    %c0_14 = arith.constant 0 : index
    %c128 = arith.constant 128 : index
    %21 = vector.load %arg8[%c0_14, %c128] : memref<4x768xf32, #tpu.memory_space<vmem>>, vector<4x512xf32>
    tpu.vector_store %arg8[%c0_14, %c128], %20 {strides = array<i32>} : memref<4x768xf32, #tpu.memory_space<vmem>>, vector<4x512xf32>,
    %cst_15 = arith.constant 0.000000e+00 : bf16
    %22 = vector.broadcast %cst_15 : bf16 to vector<20x512xbf16>
    %c108 = arith.constant 108 : index
    %c0_16 = arith.constant 0 : index
    %23 = vector.load %arg10[%c108, %c0_16] : memref<128x512xbf16, #tpu.memory_space<vmem>>, vector<20x512xbf16>
    tpu.vector_store %arg10[%c108, %c0_16], %22 {strides = array<i32>} : memref<128x512xbf16, #tpu.memory_space<vmem>>, vector<20x512xbf16>,
    %c0_17 = arith.constant 0 : index
    %c55 = arith.constant 55 : index
    %24 = vector.load %arg8[%c0_17, %c55] : memref<4x768xf32, #tpu.memory_space<vmem>>, vector<4x512xf32>
    %25 = arith.andi %4, %6 : vector<1x512xi1>
    %26 = arith.andi %25, %8 : vector<1x512xi1>
    %cst_18 = arith.constant 0.000000e+00 : f32
    %27 = vector.shape_cast %26 : vector<1x512xi1> to vector<1x512xi1>
    %28 = vector.broadcast %27 : vector<1x512xi1> to vector<4x512xi1>
    %29 = vector.broadcast %cst_18 : f32 to vector<4x512xf32>
    %30 = arith.select %28, %24, %29 : vector<4x512xi1>, vector<4x512xf32>
    %31 = arith.truncf %30 : vector<4x512xf32> to vector<4x512xbf16>
    %c0_19 = arith.constant 0 : index
    %c0_20 = arith.constant 0 : index
    %32 = vector.load %arg10[%c0_19, %c0_20] : memref<128x512xbf16, #tpu.memory_space<vmem>>, vector<4x512xbf16>
    tpu.vector_store %arg10[%c0_19, %c0_20], %31 {strides = array<i32>} : memref<128x512xbf16, #tpu.memory_space<vmem>>, vector<4x512xbf16>,
    %c0_21 = arith.constant 0 : index
    %c56 = arith.constant 56 : index
    %33 = vector.load %arg8[%c0_21, %c56] : memref<4x768xf32, #tpu.memory_space<vmem>>, vector<4x512xf32>
    %34 = arith.andi %4, %6 : vector<1x512xi1>
    %cst_22 = arith.constant 0.000000e+00 : f32
    %35 = vector.shape_cast %34 : vector<1x512xi1> to vector<1x512xi1>
    %36 = vector.broadcast %35 : vector<1x512xi1> to vector<4x512xi1>
    %37 = vector.broadcast %cst_22 : f32 to vector<4x512xf32>
    %38 = arith.select %36, %33, %37 : vector<4x512xi1>, vector<4x512xf32>
    %39 = arith.truncf %38 : vector<4x512xf32> to vector<4x512xbf16>
    %c4 = arith.constant 4 : index
    %c0_23 = arith.constant 0 : index
    %40 = vector.load %arg10[%c4, %c0_23] : memref<128x512xbf16, #tpu.memory_space<vmem>>, vector<4x512xbf16>
    tpu.vector_store %arg10[%c4, %c0_23], %39 {strides = array<i32>} : memref<128x512xbf16, #tpu.memory_space<vmem>>, vector<4x512xbf16>,
    %c0_24 = arith.constant 0 : index
    %c57 = arith.constant 57 : index
    %41 = vector.load %arg8[%c0_24, %c57] : memref<4x768xf32, #tpu.memory_space<vmem>>, vector<4x512xf32>
    %42 = arith.andi %4, %6 : vector<1x512xi1>
    %43 = arith.andi %42, %14 : vector<1x512xi1>
    %cst_25 = arith.constant 0.000000e+00 : f32
    %44 = vector.shape_cast %43 : vector<1x512xi1> to vector<1x512xi1>
    %45 = vector.broadcast %44 : vector<1x512xi1> to vector<4x512xi1>
    %46 = vector.broadcast %cst_25 : f32 to vector<4x512xf32>
    %47 = arith.select %45, %41, %46 : vector<4x512xi1>, vector<4x512xf32>
    %48 = arith.truncf %47 : vector<4x512xf32> to vector<4x512xbf16>
    %c8 = arith.constant 8 : index
    %c0_26 = arith.constant 0 : index
    %49 = vector.load %arg10[%c8, %c0_26] : memref<128x512xbf16, #tpu.memory_space<vmem>>, vector<4x512xbf16>
    tpu.vector_store %arg10[%c8, %c0_26], %48 {strides = array<i32>} : memref<128x512xbf16, #tpu.memory_space<vmem>>, vector<4x512xbf16>,
    %c0_27 = arith.constant 0 : index
    %c63 = arith.constant 63 : index
    %50 = vector.load %arg8[%c0_27, %c63] : memref<4x768xf32, #tpu.memory_space<vmem>>, vector<4x512xf32>
    %51 = arith.andi %4, %8 : vector<1x512xi1>
    %cst_28 = arith.constant 0.000000e+00 : f32
    %52 = vector.shape_cast %51 : vector<1x512xi1> to vector<1x512xi1>
    %53 = vector.broadcast %52 : vector<1x512xi1> to vector<4x512xi1>
    %54 = vector.broadcast %cst_28 : f32 to vector<4x512xf32>
    %55 = arith.select %53, %50, %54 : vector<4x512xi1>, vector<4x512xf32>
    %56 = arith.truncf %55 : vector<4x512xf32> to vector<4x512xbf16>
    %c12 = arith.constant 12 : index
    %c0_29 = arith.constant 0 : index
    %57 = vector.load %arg10[%c12, %c0_29] : memref<128x512xbf16, #tpu.memory_space<vmem>>, vector<4x512xbf16>
    tpu.vector_store %arg10[%c12, %c0_29], %56 {strides = array<i32>} : memref<128x512xbf16, #tpu.memory_space<vmem>>, vector<4x512xbf16>,
    %c0_30 = arith.constant 0 : index
    %c64 = arith.constant 64 : index
    %58 = vector.load %arg8[%c0_30, %c64] : memref<4x768xf32, #tpu.memory_space<vmem>>, vector<4x512xf32>
    %cst_31 = arith.constant 0.000000e+00 : f32
    %59 = vector.shape_cast %4 : vector<1x512xi1> to vector<1x512xi1>
    %60 = vector.broadcast %59 : vector<1x512xi1> to vector<4x512xi1>
    %61 = vector.broadcast %cst_31 : f32 to vector<4x512xf32>
    %62 = arith.select %60, %58, %61 : vector<4x512xi1>, vector<4x512xf32>
    %63 = arith.truncf %62 : vector<4x512xf32> to vector<4x512xbf16>
    %c16 = arith.constant 16 : index
    %c0_32 = arith.constant 0 : index
    %64 = vector.load %arg10[%c16, %c0_32] : memref<128x512xbf16, #tpu.memory_space<vmem>>, vector<4x512xbf16>
    tpu.vector_store %arg10[%c16, %c0_32], %63 {strides = array<i32>} : memref<128x512xbf16, #tpu.memory_space<vmem>>, vector<4x512xbf16>,
    %c0_33 = arith.constant 0 : index
    %c65 = arith.constant 65 : index
    %65 = vector.load %arg8[%c0_33, %c65] : memref<4x768xf32, #tpu.memory_space<vmem>>, vector<4x512xf32>
    %66 = arith.andi %4, %14 : vector<1x512xi1>
    %cst_34 = arith.constant 0.000000e+00 : f32
    %67 = vector.shape_cast %66 : vector<1x512xi1> to vector<1x512xi1>
    %68 = vector.broadcast %67 : vector<1x512xi1> to vector<4x512xi1>
    %69 = vector.broadcast %cst_34 : f32 to vector<4x512xf32>
    %70 = arith.select %68, %65, %69 : vector<4x512xi1>, vector<4x512xf32>
    %71 = arith.truncf %70 : vector<4x512xf32> to vector<4x512xbf16>
    %c20 = arith.constant 20 : index
    %c0_35 = arith.constant 0 : index
    %72 = vector.load %arg10[%c20, %c0_35] : memref<128x512xbf16, #tpu.memory_space<vmem>>, vector<4x512xbf16>
    tpu.vector_store %arg10[%c20, %c0_35], %71 {strides = array<i32>} : memref<128x512xbf16, #tpu.memory_space<vmem>>, vector<4x512xbf16>,
    %c0_36 = arith.constant 0 : index
    %c71 = arith.constant 71 : index
    %73 = vector.load %arg8[%c0_36, %c71] : memref<4x768xf32, #tpu.memory_space<vmem>>, vector<4x512xf32>
    %74 = arith.andi %4, %12 : vector<1x512xi1>
    %75 = arith.andi %74, %8 : vector<1x512xi1>
    %cst_37 = arith.constant 0.000000e+00 : f32
    %76 = vector.shape_cast %75 : vector<1x512xi1> to vector<1x512xi1>
    %77 = vector.broadcast %76 : vector<1x512xi1> to vector<4x512xi1>
    %78 = vector.broadcast %cst_37 : f32 to vector<4x512xf32>
    %79 = arith.select %77, %73, %78 : vector<4x512xi1>, vector<4x512xf32>
    %80 = arith.truncf %79 : vector<4x512xf32> to vector<4x512xbf16>
    %c24 = arith.constant 24 : index
    %c0_38 = arith.constant 0 : index
    %81 = vector.load %arg10[%c24, %c0_38] : memref<128x512xbf16, #tpu.memory_space<vmem>>, vector<4x512xbf16>
    tpu.vector_store %arg10[%c24, %c0_38], %80 {strides = array<i32>} : memref<128x512xbf16, #tpu.memory_space<vmem>>, vector<4x512xbf16>,
    %c0_39 = arith.constant 0 : index
    %c72 = arith.constant 72 : index
    %82 = vector.load %arg8[%c0_39, %c72] : memref<4x768xf32, #tpu.memory_space<vmem>>, vector<4x512xf32>
    %83 = arith.andi %4, %12 : vector<1x512xi1>
    %cst_40 = arith.constant 0.000000e+00 : f32
    %84 = vector.shape_cast %83 : vector<1x512xi1> to vector<1x512xi1>
    %85 = vector.broadcast %84 : vector<1x512xi1> to vector<4x512xi1>
    %86 = vector.broadcast %cst_40 : f32 to vector<4x512xf32>
    %87 = arith.select %85, %82, %86 : vector<4x512xi1>, vector<4x512xf32>
    %88 = arith.truncf %87 : vector<4x512xf32> to vector<4x512xbf16>
    %c28 = arith.constant 28 : index
    %c0_41 = arith.constant 0 : index
    %89 = vector.load %arg10[%c28, %c0_41] : memref<128x512xbf16, #tpu.memory_space<vmem>>, vector<4x512xbf16>
    tpu.vector_store %arg10[%c28, %c0_41], %88 {strides = array<i32>} : memref<128x512xbf16, #tpu.memory_space<vmem>>, vector<4x512xbf16>,
    %c0_42 = arith.constant 0 : index
    %c73 = arith.constant 73 : index
    %90 = vector.load %arg8[%c0_42, %c73] : memref<4x768xf32, #tpu.memory_space<vmem>>, vector<4x512xf32>
    %91 = arith.andi %4, %12 : vector<1x512xi1>
    %92 = arith.andi %91, %14 : vector<1x512xi1>
    %cst_43 = arith.constant 0.000000e+00 : f32
    %93 = vector.shape_cast %92 : vector<1x512xi1> to vector<1x512xi1>
    %94 = vector.broadcast %93 : vector<1x512xi1> to vector<4x512xi1>
    %95 = vector.broadcast %cst_43 : f32 to vector<4x512xf32>
    %96 = arith.select %94, %90, %95 : vector<4x512xi1>, vector<4x512xf32>
    %97 = arith.truncf %96 : vector<4x512xf32> to vector<4x512xbf16>
    %c32 = arith.constant 32 : index
    %c0_44 = arith.constant 0 : index
    %98 = vector.load %arg10[%c32, %c0_44] : memref<128x512xbf16, #tpu.memory_space<vmem>>, vector<4x512xbf16>
    tpu.vector_store %arg10[%c32, %c0_44], %97 {strides = array<i32>} : memref<128x512xbf16, #tpu.memory_space<vmem>>, vector<4x512xbf16>,
    %c0_45 = arith.constant 0 : index
    %c119 = arith.constant 119 : index
    %99 = vector.load %arg8[%c0_45, %c119] : memref<4x768xf32, #tpu.memory_space<vmem>>, vector<4x512xf32>
    %100 = arith.andi %6, %8 : vector<1x512xi1>
    %cst_46 = arith.constant 0.000000e+00 : f32
    %101 = vector.shape_cast %100 : vector<1x512xi1> to vector<1x512xi1>
    %102 = vector.broadcast %101 : vector<1x512xi1> to vector<4x512xi1>
    %103 = vector.broadcast %cst_46 : f32 to vector<4x512xf32>
    %104 = arith.select %102, %99, %103 : vector<4x512xi1>, vector<4x512xf32>
    %105 = arith.truncf %104 : vector<4x512xf32> to vector<4x512xbf16>
    %c36 = arith.constant 36 : index
    %c0_47 = arith.constant 0 : index
    %106 = vector.load %arg10[%c36, %c0_47] : memref<128x512xbf16, #tpu.memory_space<vmem>>, vector<4x512xbf16>
    tpu.vector_store %arg10[%c36, %c0_47], %105 {strides = array<i32>} : memref<128x512xbf16, #tpu.memory_space<vmem>>, vector<4x512xbf16>,
    %c0_48 = arith.constant 0 : index
    %c120 = arith.constant 120 : index
    %107 = vector.load %arg8[%c0_48, %c120] : memref<4x768xf32, #tpu.memory_space<vmem>>, vector<4x512xf32>
    %cst_49 = arith.constant 0.000000e+00 : f32
    %108 = vector.shape_cast %6 : vector<1x512xi1> to vector<1x512xi1>
    %109 = vector.broadcast %108 : vector<1x512xi1> to vector<4x512xi1>
    %110 = vector.broadcast %cst_49 : f32 to vector<4x512xf32>
    %111 = arith.select %109, %107, %110 : vector<4x512xi1>, vector<4x512xf32>
    %112 = arith.truncf %111 : vector<4x512xf32> to vector<4x512xbf16>
    %c40 = arith.constant 40 : index
    %c0_50 = arith.constant 0 : index
    %113 = vector.load %arg10[%c40, %c0_50] : memref<128x512xbf16, #tpu.memory_space<vmem>>, vector<4x512xbf16>
    tpu.vector_store %arg10[%c40, %c0_50], %112 {strides = array<i32>} : memref<128x512xbf16, #tpu.memory_space<vmem>>, vector<4x512xbf16>,
    %c0_51 = arith.constant 0 : index
    %c121 = arith.constant 121 : index
    %114 = vector.load %arg8[%c0_51, %c121] : memref<4x768xf32, #tpu.memory_space<vmem>>, vector<4x512xf32>
    %115 = arith.andi %6, %14 : vector<1x512xi1>
    %cst_52 = arith.constant 0.000000e+00 : f32
    %116 = vector.shape_cast %115 : vector<1x512xi1> to vector<1x512xi1>
    %117 = vector.broadcast %116 : vector<1x512xi1> to vector<4x512xi1>
    %118 = vector.broadcast %cst_52 : f32 to vector<4x512xf32>
    %119 = arith.select %117, %114, %118 : vector<4x512xi1>, vector<4x512xf32>
    %120 = arith.truncf %119 : vector<4x512xf32> to vector<4x512xbf16>
    %c44 = arith.constant 44 : index
    %c0_53 = arith.constant 0 : index
    %121 = vector.load %arg10[%c44, %c0_53] : memref<128x512xbf16, #tpu.memory_space<vmem>>, vector<4x512xbf16>
    tpu.vector_store %arg10[%c44, %c0_53], %120 {strides = array<i32>} : memref<128x512xbf16, #tpu.memory_space<vmem>>, vector<4x512xbf16>,
    %c0_54 = arith.constant 0 : index
    %c127 = arith.constant 127 : index
    %122 = vector.load %arg8[%c0_54, %c127] : memref<4x768xf32, #tpu.memory_space<vmem>>, vector<4x512xf32>
    %cst_55 = arith.constant 0.000000e+00 : f32
    %123 = vector.shape_cast %8 : vector<1x512xi1> to vector<1x512xi1>
    %124 = vector.broadcast %123 : vector<1x512xi1> to vector<4x512xi1>
    %125 = vector.broadcast %cst_55 : f32 to vector<4x512xf32>
    %126 = arith.select %124, %122, %125 : vector<4x512xi1>, vector<4x512xf32>
    %127 = arith.truncf %126 : vector<4x512xf32> to vector<4x512xbf16>
    %c48 = arith.constant 48 : index
    %c0_56 = arith.constant 0 : index
    %128 = vector.load %arg10[%c48, %c0_56] : memref<128x512xbf16, #tpu.memory_space<vmem>>, vector<4x512xbf16>
    tpu.vector_store %arg10[%c48, %c0_56], %127 {strides = array<i32>} : memref<128x512xbf16, #tpu.memory_space<vmem>>, vector<4x512xbf16>,
    %c0_57 = arith.constant 0 : index
    %c128_58 = arith.constant 128 : index
    %129 = vector.load %arg8[%c0_57, %c128_58] : memref<4x768xf32, #tpu.memory_space<vmem>>, vector<4x512xf32>
    %130 = arith.truncf %129 : vector<4x512xf32> to vector<4x512xbf16>
    %c52 = arith.constant 52 : index
    %c0_59 = arith.constant 0 : index
    %131 = vector.load %arg10[%c52, %c0_59] : memref<128x512xbf16, #tpu.memory_space<vmem>>, vector<4x512xbf16>
    tpu.vector_store %arg10[%c52, %c0_59], %130 {strides = array<i32>} : memref<128x512xbf16, #tpu.memory_space<vmem>>, vector<4x512xbf16>,
    %c0_60 = arith.constant 0 : index
    %c129 = arith.constant 129 : index
    %132 = vector.load %arg8[%c0_60, %c129] : memref<4x768xf32, #tpu.memory_space<vmem>>, vector<4x512xf32>
    %cst_61 = arith.constant 0.000000e+00 : f32
    %133 = vector.shape_cast %14 : vector<1x512xi1> to vector<1x512xi1>
    %134 = vector.broadcast %133 : vector<1x512xi1> to vector<4x512xi1>
    %135 = vector.broadcast %cst_61 : f32 to vector<4x512xf32>
    %136 = arith.select %134, %132, %135 : vector<4x512xi1>, vector<4x512xf32>
    %137 = arith.truncf %136 : vector<4x512xf32> to vector<4x512xbf16>
    %c56_62 = arith.constant 56 : index
    %c0_63 = arith.constant 0 : index
    %138 = vector.load %arg10[%c56_62, %c0_63] : memref<128x512xbf16, #tpu.memory_space<vmem>>, vector<4x512xbf16>
    tpu.vector_store %arg10[%c56_62, %c0_63], %137 {strides = array<i32>} : memref<128x512xbf16, #tpu.memory_space<vmem>>, vector<4x512xbf16>,
    %c0_64 = arith.constant 0 : index
    %c135 = arith.constant 135 : index
    %139 = vector.load %arg8[%c0_64, %c135] : memref<4x768xf32, #tpu.memory_space<vmem>>, vector<4x512xf32>
    %140 = arith.andi %12, %8 : vector<1x512xi1>
    %cst_65 = arith.constant 0.000000e+00 : f32
    %141 = vector.shape_cast %140 : vector<1x512xi1> to vector<1x512xi1>
    %142 = vector.broadcast %141 : vector<1x512xi1> to vector<4x512xi1>
    %143 = vector.broadcast %cst_65 : f32 to vector<4x512xf32>
    %144 = arith.select %142, %139, %143 : vector<4x512xi1>, vector<4x512xf32>
    %145 = arith.truncf %144 : vector<4x512xf32> to vector<4x512xbf16>
    %c60 = arith.constant 60 : index
    %c0_66 = arith.constant 0 : index
    %146 = vector.load %arg10[%c60, %c0_66] : memref<128x512xbf16, #tpu.memory_space<vmem>>, vector<4x512xbf16>
    tpu.vector_store %arg10[%c60, %c0_66], %145 {strides = array<i32>} : memref<128x512xbf16, #tpu.memory_space<vmem>>, vector<4x512xbf16>,
    %c0_67 = arith.constant 0 : index
    %c136 = arith.constant 136 : index
    %147 = vector.load %arg8[%c0_67, %c136] : memref<4x768xf32, #tpu.memory_space<vmem>>, vector<4x512xf32>
    %cst_68 = arith.constant 0.000000e+00 : f32
    %148 = vector.shape_cast %12 : vector<1x512xi1> to vector<1x512xi1>
    %149 = vector.broadcast %148 : vector<1x512xi1> to vector<4x512xi1>
    %150 = vector.broadcast %cst_68 : f32 to vector<4x512xf32>
    %151 = arith.select %149, %147, %150 : vector<4x512xi1>, vector<4x512xf32>
    %152 = arith.truncf %151 : vector<4x512xf32> to vector<4x512xbf16>
    %c64_69 = arith.constant 64 : index
    %c0_70 = arith.constant 0 : index
    %153 = vector.load %arg10[%c64_69, %c0_70] : memref<128x512xbf16, #tpu.memory_space<vmem>>, vector<4x512xbf16>
    tpu.vector_store %arg10[%c64_69, %c0_70], %152 {strides = array<i32>} : memref<128x512xbf16, #tpu.memory_space<vmem>>, vector<4x512xbf16>,
    %c0_71 = arith.constant 0 : index
    %c137 = arith.constant 137 : index
    %154 = vector.load %arg8[%c0_71, %c137] : memref<4x768xf32, #tpu.memory_space<vmem>>, vector<4x512xf32>
    %155 = arith.andi %12, %14 : vector<1x512xi1>
    %cst_72 = arith.constant 0.000000e+00 : f32
    %156 = vector.shape_cast %155 : vector<1x512xi1> to vector<1x512xi1>
    %157 = vector.broadcast %156 : vector<1x512xi1> to vector<4x512xi1>
    %158 = vector.broadcast %cst_72 : f32 to vector<4x512xf32>
    %159 = arith.select %157, %154, %158 : vector<4x512xi1>, vector<4x512xf32>
    %160 = arith.truncf %159 : vector<4x512xf32> to vector<4x512xbf16>
    %c68 = arith.constant 68 : index
    %c0_73 = arith.constant 0 : index
    %161 = vector.load %arg10[%c68, %c0_73] : memref<128x512xbf16, #tpu.memory_space<vmem>>, vector<4x512xbf16>
    tpu.vector_store %arg10[%c68, %c0_73], %160 {strides = array<i32>} : memref<128x512xbf16, #tpu.memory_space<vmem>>, vector<4x512xbf16>,
    %c0_74 = arith.constant 0 : index
    %c183 = arith.constant 183 : index
    %162 = vector.load %arg8[%c0_74, %c183] : memref<4x768xf32, #tpu.memory_space<vmem>>, vector<4x512xf32>
    %163 = arith.andi %10, %6 : vector<1x512xi1>
    %164 = arith.andi %163, %8 : vector<1x512xi1>
    %cst_75 = arith.constant 0.000000e+00 : f32
    %165 = vector.shape_cast %164 : vector<1x512xi1> to vector<1x512xi1>
    %166 = vector.broadcast %165 : vector<1x512xi1> to vector<4x512xi1>
    %167 = vector.broadcast %cst_75 : f32 to vector<4x512xf32>
    %168 = arith.select %166, %162, %167 : vector<4x512xi1>, vector<4x512xf32>
    %169 = arith.truncf %168 : vector<4x512xf32> to vector<4x512xbf16>
    %c72_76 = arith.constant 72 : index
    %c0_77 = arith.constant 0 : index
    %170 = vector.load %arg10[%c72_76, %c0_77] : memref<128x512xbf16, #tpu.memory_space<vmem>>, vector<4x512xbf16>
    tpu.vector_store %arg10[%c72_76, %c0_77], %169 {strides = array<i32>} : memref<128x512xbf16, #tpu.memory_space<vmem>>, vector<4x512xbf16>,
    %c0_78 = arith.constant 0 : index
    %c184 = arith.constant 184 : index
    %171 = vector.load %arg8[%c0_78, %c184] : memref<4x768xf32, #tpu.memory_space<vmem>>, vector<4x512xf32>
    %172 = arith.andi %10, %6 : vector<1x512xi1>
    %cst_79 = arith.constant 0.000000e+00 : f32
    %173 = vector.shape_cast %172 : vector<1x512xi1> to vector<1x512xi1>
    %174 = vector.broadcast %173 : vector<1x512xi1> to vector<4x512xi1>
    %175 = vector.broadcast %cst_79 : f32 to vector<4x512xf32>
    %176 = arith.select %174, %171, %175 : vector<4x512xi1>, vector<4x512xf32>
    %177 = arith.truncf %176 : vector<4x512xf32> to vector<4x512xbf16>
    %c76 = arith.constant 76 : index
    %c0_80 = arith.constant 0 : index
    %178 = vector.load %arg10[%c76, %c0_80] : memref<128x512xbf16, #tpu.memory_space<vmem>>, vector<4x512xbf16>
    tpu.vector_store %arg10[%c76, %c0_80], %177 {strides = array<i32>} : memref<128x512xbf16, #tpu.memory_space<vmem>>, vector<4x512xbf16>,
    %c0_81 = arith.constant 0 : index
    %c185 = arith.constant 185 : index
    %179 = vector.load %arg8[%c0_81, %c185] : memref<4x768xf32, #tpu.memory_space<vmem>>, vector<4x512xf32>
    %180 = arith.andi %10, %6 : vector<1x512xi1>
    %181 = arith.andi %180, %14 : vector<1x512xi1>
    %cst_82 = arith.constant 0.000000e+00 : f32
    %182 = vector.shape_cast %181 : vector<1x512xi1> to vector<1x512xi1>
    %183 = vector.broadcast %182 : vector<1x512xi1> to vector<4x512xi1>
    %184 = vector.broadcast %cst_82 : f32 to vector<4x512xf32>
    %185 = arith.select %183, %179, %184 : vector<4x512xi1>, vector<4x512xf32>
    %186 = arith.truncf %185 : vector<4x512xf32> to vector<4x512xbf16>
    %c80 = arith.constant 80 : index
    %c0_83 = arith.constant 0 : index
    %187 = vector.load %arg10[%c80, %c0_83] : memref<128x512xbf16, #tpu.memory_space<vmem>>, vector<4x512xbf16>
    tpu.vector_store %arg10[%c80, %c0_83], %186 {strides = array<i32>} : memref<128x512xbf16, #tpu.memory_space<vmem>>, vector<4x512xbf16>,
    %c0_84 = arith.constant 0 : index
    %c191 = arith.constant 191 : index
    %188 = vector.load %arg8[%c0_84, %c191] : memref<4x768xf32, #tpu.memory_space<vmem>>, vector<4x512xf32>
    %189 = arith.andi %10, %8 : vector<1x512xi1>
    %cst_85 = arith.constant 0.000000e+00 : f32
    %190 = vector.shape_cast %189 : vector<1x512xi1> to vector<1x512xi1>
    %191 = vector.broadcast %190 : vector<1x512xi1> to vector<4x512xi1>
    %192 = vector.broadcast %cst_85 : f32 to vector<4x512xf32>
    %193 = arith.select %191, %188, %192 : vector<4x512xi1>, vector<4x512xf32>
    %194 = arith.truncf %193 : vector<4x512xf32> to vector<4x512xbf16>
    %c84 = arith.constant 84 : index
    %c0_86 = arith.constant 0 : index
    %195 = vector.load %arg10[%c84, %c0_86] : memref<128x512xbf16, #tpu.memory_space<vmem>>, vector<4x512xbf16>
    tpu.vector_store %arg10[%c84, %c0_86], %194 {strides = array<i32>} : memref<128x512xbf16, #tpu.memory_space<vmem>>, vector<4x512xbf16>,
    %c0_87 = arith.constant 0 : index
    %c192 = arith.constant 192 : index
    %196 = vector.load %arg8[%c0_87, %c192] : memref<4x768xf32, #tpu.memory_space<vmem>>, vector<4x512xf32>
    %cst_88 = arith.constant 0.000000e+00 : f32
    %197 = vector.shape_cast %10 : vector<1x512xi1> to vector<1x512xi1>
    %198 = vector.broadcast %197 : vector<1x512xi1> to vector<4x512xi1>
    %199 = vector.broadcast %cst_88 : f32 to vector<4x512xf32>
    %200 = arith.select %198, %196, %199 : vector<4x512xi1>, vector<4x512xf32>
    %201 = arith.truncf %200 : vector<4x512xf32> to vector<4x512xbf16>
    %c88 = arith.constant 88 : index
    %c0_89 = arith.constant 0 : index
    %202 = vector.load %arg10[%c88, %c0_89] : memref<128x512xbf16, #tpu.memory_space<vmem>>, vector<4x512xbf16>
    tpu.vector_store %arg10[%c88, %c0_89], %201 {strides = array<i32>} : memref<128x512xbf16, #tpu.memory_space<vmem>>, vector<4x512xbf16>,
    %c0_90 = arith.constant 0 : index
    %c193 = arith.constant 193 : index
    %203 = vector.load %arg8[%c0_90, %c193] : memref<4x768xf32, #tpu.memory_space<vmem>>, vector<4x512xf32>
    %204 = arith.andi %10, %14 : vector<1x512xi1>
    %cst_91 = arith.constant 0.000000e+00 : f32
    %205 = vector.shape_cast %204 : vector<1x512xi1> to vector<1x512xi1>
    %206 = vector.broadcast %205 : vector<1x512xi1> to vector<4x512xi1>
    %207 = vector.broadcast %cst_91 : f32 to vector<4x512xf32>
    %208 = arith.select %206, %203, %207 : vector<4x512xi1>, vector<4x512xf32>
    %209 = arith.truncf %208 : vector<4x512xf32> to vector<4x512xbf16>
    %c92 = arith.constant 92 : index
    %c0_92 = arith.constant 0 : index
    %210 = vector.load %arg10[%c92, %c0_92] : memref<128x512xbf16, #tpu.memory_space<vmem>>, vector<4x512xbf16>
    tpu.vector_store %arg10[%c92, %c0_92], %209 {strides = array<i32>} : memref<128x512xbf16, #tpu.memory_space<vmem>>, vector<4x512xbf16>,
    %c0_93 = arith.constant 0 : index
    %c199 = arith.constant 199 : index
    %211 = vector.load %arg8[%c0_93, %c199] : memref<4x768xf32, #tpu.memory_space<vmem>>, vector<4x512xf32>
    %212 = arith.andi %10, %12 : vector<1x512xi1>
    %213 = arith.andi %212, %8 : vector<1x512xi1>
    %cst_94 = arith.constant 0.000000e+00 : f32
    %214 = vector.shape_cast %213 : vector<1x512xi1> to vector<1x512xi1>
    %215 = vector.broadcast %214 : vector<1x512xi1> to vector<4x512xi1>
    %216 = vector.broadcast %cst_94 : f32 to vector<4x512xf32>
    %217 = arith.select %215, %211, %216 : vector<4x512xi1>, vector<4x512xf32>
    %218 = arith.truncf %217 : vector<4x512xf32> to vector<4x512xbf16>
    %c96 = arith.constant 96 : index
    %c0_95 = arith.constant 0 : index
    %219 = vector.load %arg10[%c96, %c0_95] : memref<128x512xbf16, #tpu.memory_space<vmem>>, vector<4x512xbf16>
    tpu.vector_store %arg10[%c96, %c0_95], %218 {strides = array<i32>} : memref<128x512xbf16, #tpu.memory_space<vmem>>, vector<4x512xbf16>,
    %c0_96 = arith.constant 0 : index
    %c200 = arith.constant 200 : index
    %220 = vector.load %arg8[%c0_96, %c200] : memref<4x768xf32, #tpu.memory_space<vmem>>, vector<4x512xf32>
    %221 = arith.andi %10, %12 : vector<1x512xi1>
    %cst_97 = arith.constant 0.000000e+00 : f32
    %222 = vector.shape_cast %221 : vector<1x512xi1> to vector<1x512xi1>
    %223 = vector.broadcast %222 : vector<1x512xi1> to vector<4x512xi1>
    %224 = vector.broadcast %cst_97 : f32 to vector<4x512xf32>
    %225 = arith.select %223, %220, %224 : vector<4x512xi1>, vector<4x512xf32>
    %226 = arith.truncf %225 : vector<4x512xf32> to vector<4x512xbf16>
    %c100 = arith.constant 100 : index
    %c0_98 = arith.constant 0 : index
    %227 = vector.load %arg10[%c100, %c0_98] : memref<128x512xbf16, #tpu.memory_space<vmem>>, vector<4x512xbf16>
    tpu.vector_store %arg10[%c100, %c0_98], %226 {strides = array<i32>} : memref<128x512xbf16, #tpu.memory_space<vmem>>, vector<4x512xbf16>,
    %c0_99 = arith.constant 0 : index
    %c201 = arith.constant 201 : index
    %228 = vector.load %arg8[%c0_99, %c201] : memref<4x768xf32, #tpu.memory_space<vmem>>, vector<4x512xf32>
    %229 = arith.andi %10, %12 : vector<1x512xi1>
    %230 = arith.andi %229, %14 : vector<1x512xi1>
    %cst_100 = arith.constant 0.000000e+00 : f32
    %231 = vector.shape_cast %230 : vector<1x512xi1> to vector<1x512xi1>
    %232 = vector.broadcast %231 : vector<1x512xi1> to vector<4x512xi1>
    %233 = vector.broadcast %cst_100 : f32 to vector<4x512xf32>
    %234 = arith.select %232, %228, %233 : vector<4x512xi1>, vector<4x512xf32>
    %235 = arith.truncf %234 : vector<4x512xf32> to vector<4x512xbf16>
    %c104 = arith.constant 104 : index
    %c0_101 = arith.constant 0 : index
    %236 = vector.load %arg10[%c104, %c0_101] : memref<128x512xbf16, #tpu.memory_space<vmem>>, vector<4x512xbf16>
    tpu.vector_store %arg10[%c104, %c0_101], %235 {strides = array<i32>} : memref<128x512xbf16, #tpu.memory_space<vmem>>, vector<4x512xbf16>,
    %c0_102 = arith.constant 0 : index
    %c0_103 = arith.constant 0 : index
    %237 = vector.load %arg3[%c0_102, %c0_103] : memref<8x128xbf16, #tpu.memory_space<vmem>>, vector<8x128xbf16>
    %c0_104 = arith.constant 0 : index
    %c0_105 = arith.constant 0 : index
    %238 = vector.load %arg10[%c0_104, %c0_105] : memref<128x512xbf16, #tpu.memory_space<vmem>>, vector<128x512xbf16>
    %cst_106 = arith.constant dense<0.000000e+00> : vector<8x512xf32>
    %239 = tpu.matmul %237, %238, %cst_106 {dimension_numbers = #tpu.dot_dimension_numbers<[1], [0], [0], [1], [0, 0, 1, 1], [], []>} : vector<8x128xbf16>, vector<128x512xbf16>, vector<8x512xf32> -> vector<8x512xf32>
    %c0_107 = arith.constant 0 : index
    %c0_108 = arith.constant 0 : index
    %240 = vector.load %arg4[%c0_107, %c0_108] : memref<8x1xf32, #tpu.memory_space<vmem>>, vector<8x1xf32>
    %241 = vector.broadcast %240 : vector<8x1xf32> to vector<8x512xf32>
    %242 = arith.addf %239, %241 : vector<8x512xf32>
    %cst_109 = arith.constant dense<0.000000e+00> : vector<8xf32>
    %243 = vector.multi_reduction <add>, %242, %cst_109 [1] : vector<8x512xf32> to vector<8xf32>
    %244 = vector.shape_cast %243 : vector<8xf32> to vector<8x1xf32>
    %cst_110 = arith.constant 5.120000e+02 : f32
    %245 = vector.broadcast %cst_110 : f32 to vector<8x1xf32>
    %246 = arith.divf %244, %245 : vector<8x1xf32>
    %247 = vector.broadcast %246 : vector<8x1xf32> to vector<8x512xf32>
    %248 = arith.subf %242, %247 : vector<8x512xf32>
    %249 = arith.mulf %248, %248 : vector<8x512xf32>
    %cst_111 = arith.constant dense<0.000000e+00> : vector<8xf32>
    %250 = vector.multi_reduction <add>, %249, %cst_111 [1] : vector<8x512xf32> to vector<8xf32>
    %251 = vector.shape_cast %250 : vector<8xf32> to vector<8x1xf32>
    %cst_112 = arith.constant 5.120000e+02 : f32
    %252 = vector.broadcast %cst_112 : f32 to vector<8x1xf32>
    %253 = arith.divf %251, %252 : vector<8x1xf32>
    %254 = vector.broadcast %246 : vector<8x1xf32> to vector<8x512xf32>
    %255 = arith.subf %242, %254 : vector<8x512xf32>
    %cst_113 = arith.constant 9.99999974E-6 : f32
    %256 = vector.broadcast %cst_113 : f32 to vector<8x1xf32>
    %257 = arith.addf %253, %256 : vector<8x1xf32>
    %258 = math.rsqrt %257 : vector<8x1xf32>
    %259 = vector.broadcast %258 : vector<8x1xf32> to vector<8x512xf32>
    %260 = arith.mulf %255, %259 : vector<8x512xf32>
    %cst_114 = arith.constant 0.000000e+00 : f32
    %261 = vector.broadcast %cst_114 : f32 to vector<8x512xf32>
    %262 = arith.cmpf ogt, %260, %261 : vector<8x512xf32>
    %cst_115 = arith.constant 0.00999999977 : f32
    %263 = vector.broadcast %cst_115 : f32 to vector<8x512xf32>
    %264 = arith.mulf %263, %260 : vector<8x512xf32>
    %265 = arith.select %262, %260, %264 : vector<8x512xi1>, vector<8x512xf32>
    %cst_116 = arith.constant 0.000000e+00 : f32
    %266 = vector.broadcast %cst_116 : f32 to vector<8x128xf32>
    %c0_117 = arith.constant 0 : index
    %c0_118 = arith.constant 0 : index
    %267 = vector.load %arg9[%c0_117, %c0_118] : memref<8x768xf32, #tpu.memory_space<vmem>>, vector<8x128xf32>
    tpu.vector_store %arg9[%c0_117, %c0_118], %266 {strides = array<i32>} : memref<8x768xf32, #tpu.memory_space<vmem>>, vector<8x128xf32>,
    %cst_119 = arith.constant 0.000000e+00 : f32
    %268 = vector.broadcast %cst_119 : f32 to vector<8x128xf32>
    %c0_120 = arith.constant 0 : index
    %c640_121 = arith.constant 640 : index
    %269 = vector.load %arg9[%c0_120, %c640_121] : memref<8x768xf32, #tpu.memory_space<vmem>>, vector<8x128xf32>
    tpu.vector_store %arg9[%c0_120, %c640_121], %268 {strides = array<i32>} : memref<8x768xf32, #tpu.memory_space<vmem>>, vector<8x128xf32>,
    %c0_122 = arith.constant 0 : index
    %c128_123 = arith.constant 128 : index
    %270 = vector.load %arg9[%c0_122, %c128_123] : memref<8x768xf32, #tpu.memory_space<vmem>>, vector<8x512xf32>
    tpu.vector_store %arg9[%c0_122, %c128_123], %265 {strides = array<i32>} : memref<8x768xf32, #tpu.memory_space<vmem>>, vector<8x512xf32>,
    %cst_124 = arith.constant 0.000000e+00 : bf16
    %271 = vector.broadcast %cst_124 : bf16 to vector<40x512xbf16>
    %c216 = arith.constant 216 : index
    %c0_125 = arith.constant 0 : index
    %272 = vector.load %arg11[%c216, %c0_125] : memref<256x512xbf16, #tpu.memory_space<vmem>>, vector<40x512xbf16>
    tpu.vector_store %arg11[%c216, %c0_125], %271 {strides = array<i32>} : memref<256x512xbf16, #tpu.memory_space<vmem>>, vector<40x512xbf16>,
    %c0_126 = arith.constant 0 : index
    %c55_127 = arith.constant 55 : index
    %273 = vector.load %arg9[%c0_126, %c55_127] : memref<8x768xf32, #tpu.memory_space<vmem>>, vector<8x512xf32>
    %274 = arith.andi %4, %6 : vector<1x512xi1>
    %275 = arith.andi %274, %8 : vector<1x512xi1>
    %cst_128 = arith.constant 0.000000e+00 : f32
    %276 = vector.shape_cast %275 : vector<1x512xi1> to vector<1x512xi1>
    %277 = vector.broadcast %276 : vector<1x512xi1> to vector<8x512xi1>
    %278 = vector.broadcast %cst_128 : f32 to vector<8x512xf32>
    %279 = arith.select %277, %273, %278 : vector<8x512xi1>, vector<8x512xf32>
    %280 = arith.truncf %279 : vector<8x512xf32> to vector<8x512xbf16>
    %c0_129 = arith.constant 0 : index
    %c0_130 = arith.constant 0 : index
    %281 = vector.load %arg11[%c0_129, %c0_130] : memref<256x512xbf16, #tpu.memory_space<vmem>>, vector<8x512xbf16>
    tpu.vector_store %arg11[%c0_129, %c0_130], %280 {strides = array<i32>} : memref<256x512xbf16, #tpu.memory_space<vmem>>, vector<8x512xbf16>,
    %c0_131 = arith.constant 0 : index
    %c56_132 = arith.constant 56 : index
    %282 = vector.load %arg9[%c0_131, %c56_132] : memref<8x768xf32, #tpu.memory_space<vmem>>, vector<8x512xf32>
    %283 = arith.andi %4, %6 : vector<1x512xi1>
    %cst_133 = arith.constant 0.000000e+00 : f32
    %284 = vector.shape_cast %283 : vector<1x512xi1> to vector<1x512xi1>
    %285 = vector.broadcast %284 : vector<1x512xi1> to vector<8x512xi1>
    %286 = vector.broadcast %cst_133 : f32 to vector<8x512xf32>
    %287 = arith.select %285, %282, %286 : vector<8x512xi1>, vector<8x512xf32>
    %288 = arith.truncf %287 : vector<8x512xf32> to vector<8x512xbf16>
    %c8_134 = arith.constant 8 : index
    %c0_135 = arith.constant 0 : index
    %289 = vector.load %arg11[%c8_134, %c0_135] : memref<256x512xbf16, #tpu.memory_space<vmem>>, vector<8x512xbf16>
    tpu.vector_store %arg11[%c8_134, %c0_135], %288 {strides = array<i32>} : memref<256x512xbf16, #tpu.memory_space<vmem>>, vector<8x512xbf16>,
    %c0_136 = arith.constant 0 : index
    %c57_137 = arith.constant 57 : index
    %290 = vector.load %arg9[%c0_136, %c57_137] : memref<8x768xf32, #tpu.memory_space<vmem>>, vector<8x512xf32>
    %291 = arith.andi %4, %6 : vector<1x512xi1>
    %292 = arith.andi %291, %14 : vector<1x512xi1>
    %cst_138 = arith.constant 0.000000e+00 : f32
    %293 = vector.shape_cast %292 : vector<1x512xi1> to vector<1x512xi1>
    %294 = vector.broadcast %293 : vector<1x512xi1> to vector<8x512xi1>
    %295 = vector.broadcast %cst_138 : f32 to vector<8x512xf32>
    %296 = arith.select %294, %290, %295 : vector<8x512xi1>, vector<8x512xf32>
    %297 = arith.truncf %296 : vector<8x512xf32> to vector<8x512xbf16>
    %c16_139 = arith.constant 16 : index
    %c0_140 = arith.constant 0 : index
    %298 = vector.load %arg11[%c16_139, %c0_140] : memref<256x512xbf16, #tpu.memory_space<vmem>>, vector<8x512xbf16>
    tpu.vector_store %arg11[%c16_139, %c0_140], %297 {strides = array<i32>} : memref<256x512xbf16, #tpu.memory_space<vmem>>, vector<8x512xbf16>,
    %c0_141 = arith.constant 0 : index
    %c63_142 = arith.constant 63 : index
    %299 = vector.load %arg9[%c0_141, %c63_142] : memref<8x768xf32, #tpu.memory_space<vmem>>, vector<8x512xf32>
    %300 = arith.andi %4, %8 : vector<1x512xi1>
    %cst_143 = arith.constant 0.000000e+00 : f32
    %301 = vector.shape_cast %300 : vector<1x512xi1> to vector<1x512xi1>
    %302 = vector.broadcast %301 : vector<1x512xi1> to vector<8x512xi1>
    %303 = vector.broadcast %cst_143 : f32 to vector<8x512xf32>
    %304 = arith.select %302, %299, %303 : vector<8x512xi1>, vector<8x512xf32>
    %305 = arith.truncf %304 : vector<8x512xf32> to vector<8x512xbf16>
    %c24_144 = arith.constant 24 : index
    %c0_145 = arith.constant 0 : index
    %306 = vector.load %arg11[%c24_144, %c0_145] : memref<256x512xbf16, #tpu.memory_space<vmem>>, vector<8x512xbf16>
    tpu.vector_store %arg11[%c24_144, %c0_145], %305 {strides = array<i32>} : memref<256x512xbf16, #tpu.memory_space<vmem>>, vector<8x512xbf16>,
    %c0_146 = arith.constant 0 : index
    %c64_147 = arith.constant 64 : index
    %307 = vector.load %arg9[%c0_146, %c64_147] : memref<8x768xf32, #tpu.memory_space<vmem>>, vector<8x512xf32>
    %cst_148 = arith.constant 0.000000e+00 : f32
    %308 = vector.shape_cast %4 : vector<1x512xi1> to vector<1x512xi1>
    %309 = vector.broadcast %308 : vector<1x512xi1> to vector<8x512xi1>
    %310 = vector.broadcast %cst_148 : f32 to vector<8x512xf32>
    %311 = arith.select %309, %307, %310 : vector<8x512xi1>, vector<8x512xf32>
    %312 = arith.truncf %311 : vector<8x512xf32> to vector<8x512xbf16>
    %c32_149 = arith.constant 32 : index
    %c0_150 = arith.constant 0 : index
    %313 = vector.load %arg11[%c32_149, %c0_150] : memref<256x512xbf16, #tpu.memory_space<vmem>>, vector<8x512xbf16>
    tpu.vector_store %arg11[%c32_149, %c0_150], %312 {strides = array<i32>} : memref<256x512xbf16, #tpu.memory_space<vmem>>, vector<8x512xbf16>,
    %c0_151 = arith.constant 0 : index
    %c65_152 = arith.constant 65 : index
    %314 = vector.load %arg9[%c0_151, %c65_152] : memref<8x768xf32, #tpu.memory_space<vmem>>, vector<8x512xf32>
    %315 = arith.andi %4, %14 : vector<1x512xi1>
    %cst_153 = arith.constant 0.000000e+00 : f32
    %316 = vector.shape_cast %315 : vector<1x512xi1> to vector<1x512xi1>
    %317 = vector.broadcast %316 : vector<1x512xi1> to vector<8x512xi1>
    %318 = vector.broadcast %cst_153 : f32 to vector<8x512xf32>
    %319 = arith.select %317, %314, %318 : vector<8x512xi1>, vector<8x512xf32>
    %320 = arith.truncf %319 : vector<8x512xf32> to vector<8x512xbf16>
    %c40_154 = arith.constant 40 : index
    %c0_155 = arith.constant 0 : index
    %321 = vector.load %arg11[%c40_154, %c0_155] : memref<256x512xbf16, #tpu.memory_space<vmem>>, vector<8x512xbf16>
    tpu.vector_store %arg11[%c40_154, %c0_155], %320 {strides = array<i32>} : memref<256x512xbf16, #tpu.memory_space<vmem>>, vector<8x512xbf16>,
    %c0_156 = arith.constant 0 : index
    %c71_157 = arith.constant 71 : index
    %322 = vector.load %arg9[%c0_156, %c71_157] : memref<8x768xf32, #tpu.memory_space<vmem>>, vector<8x512xf32>
    %323 = arith.andi %4, %12 : vector<1x512xi1>
    %324 = arith.andi %323, %8 : vector<1x512xi1>
    %cst_158 = arith.constant 0.000000e+00 : f32
    %325 = vector.shape_cast %324 : vector<1x512xi1> to vector<1x512xi1>
    %326 = vector.broadcast %325 : vector<1x512xi1> to vector<8x512xi1>
    %327 = vector.broadcast %cst_158 : f32 to vector<8x512xf32>
    %328 = arith.select %326, %322, %327 : vector<8x512xi1>, vector<8x512xf32>
    %329 = arith.truncf %328 : vector<8x512xf32> to vector<8x512xbf16>
    %c48_159 = arith.constant 48 : index
    %c0_160 = arith.constant 0 : index
    %330 = vector.load %arg11[%c48_159, %c0_160] : memref<256x512xbf16, #tpu.memory_space<vmem>>, vector<8x512xbf16>
    tpu.vector_store %arg11[%c48_159, %c0_160], %329 {strides = array<i32>} : memref<256x512xbf16, #tpu.memory_space<vmem>>, vector<8x512xbf16>,
    %c0_161 = arith.constant 0 : index
    %c72_162 = arith.constant 72 : index
    %331 = vector.load %arg9[%c0_161, %c72_162] : memref<8x768xf32, #tpu.memory_space<vmem>>, vector<8x512xf32>
    %332 = arith.andi %4, %12 : vector<1x512xi1>
    %cst_163 = arith.constant 0.000000e+00 : f32
    %333 = vector.shape_cast %332 : vector<1x512xi1> to vector<1x512xi1>
    %334 = vector.broadcast %333 : vector<1x512xi1> to vector<8x512xi1>
    %335 = vector.broadcast %cst_163 : f32 to vector<8x512xf32>
    %336 = arith.select %334, %331, %335 : vector<8x512xi1>, vector<8x512xf32>
    %337 = arith.truncf %336 : vector<8x512xf32> to vector<8x512xbf16>
    %c56_164 = arith.constant 56 : index
    %c0_165 = arith.constant 0 : index
    %338 = vector.load %arg11[%c56_164, %c0_165] : memref<256x512xbf16, #tpu.memory_space<vmem>>, vector<8x512xbf16>
    tpu.vector_store %arg11[%c56_164, %c0_165], %337 {strides = array<i32>} : memref<256x512xbf16, #tpu.memory_space<vmem>>, vector<8x512xbf16>,
    %c0_166 = arith.constant 0 : index
    %c73_167 = arith.constant 73 : index
    %339 = vector.load %arg9[%c0_166, %c73_167] : memref<8x768xf32, #tpu.memory_space<vmem>>, vector<8x512xf32>
    %340 = arith.andi %4, %12 : vector<1x512xi1>
    %341 = arith.andi %340, %14 : vector<1x512xi1>
    %cst_168 = arith.constant 0.000000e+00 : f32
    %342 = vector.shape_cast %341 : vector<1x512xi1> to vector<1x512xi1>
    %343 = vector.broadcast %342 : vector<1x512xi1> to vector<8x512xi1>
    %344 = vector.broadcast %cst_168 : f32 to vector<8x512xf32>
    %345 = arith.select %343, %339, %344 : vector<8x512xi1>, vector<8x512xf32>
    %346 = arith.truncf %345 : vector<8x512xf32> to vector<8x512xbf16>
    %c64_169 = arith.constant 64 : index
    %c0_170 = arith.constant 0 : index
    %347 = vector.load %arg11[%c64_169, %c0_170] : memref<256x512xbf16, #tpu.memory_space<vmem>>, vector<8x512xbf16>
    tpu.vector_store %arg11[%c64_169, %c0_170], %346 {strides = array<i32>} : memref<256x512xbf16, #tpu.memory_space<vmem>>, vector<8x512xbf16>,
    %c0_171 = arith.constant 0 : index
    %c119_172 = arith.constant 119 : index
    %348 = vector.load %arg9[%c0_171, %c119_172] : memref<8x768xf32, #tpu.memory_space<vmem>>, vector<8x512xf32>
    %349 = arith.andi %6, %8 : vector<1x512xi1>
    %cst_173 = arith.constant 0.000000e+00 : f32
    %350 = vector.shape_cast %349 : vector<1x512xi1> to vector<1x512xi1>
    %351 = vector.broadcast %350 : vector<1x512xi1> to vector<8x512xi1>
    %352 = vector.broadcast %cst_173 : f32 to vector<8x512xf32>
    %353 = arith.select %351, %348, %352 : vector<8x512xi1>, vector<8x512xf32>
    %354 = arith.truncf %353 : vector<8x512xf32> to vector<8x512xbf16>
    %c72_174 = arith.constant 72 : index
    %c0_175 = arith.constant 0 : index
    %355 = vector.load %arg11[%c72_174, %c0_175] : memref<256x512xbf16, #tpu.memory_space<vmem>>, vector<8x512xbf16>
    tpu.vector_store %arg11[%c72_174, %c0_175], %354 {strides = array<i32>} : memref<256x512xbf16, #tpu.memory_space<vmem>>, vector<8x512xbf16>,
    %c0_176 = arith.constant 0 : index
    %c120_177 = arith.constant 120 : index
    %356 = vector.load %arg9[%c0_176, %c120_177] : memref<8x768xf32, #tpu.memory_space<vmem>>, vector<8x512xf32>
    %cst_178 = arith.constant 0.000000e+00 : f32
    %357 = vector.shape_cast %6 : vector<1x512xi1> to vector<1x512xi1>
    %358 = vector.broadcast %357 : vector<1x512xi1> to vector<8x512xi1>
    %359 = vector.broadcast %cst_178 : f32 to vector<8x512xf32>
    %360 = arith.select %358, %356, %359 : vector<8x512xi1>, vector<8x512xf32>
    %361 = arith.truncf %360 : vector<8x512xf32> to vector<8x512xbf16>
    %c80_179 = arith.constant 80 : index
    %c0_180 = arith.constant 0 : index
    %362 = vector.load %arg11[%c80_179, %c0_180] : memref<256x512xbf16, #tpu.memory_space<vmem>>, vector<8x512xbf16>
    tpu.vector_store %arg11[%c80_179, %c0_180], %361 {strides = array<i32>} : memref<256x512xbf16, #tpu.memory_space<vmem>>, vector<8x512xbf16>,
    %c0_181 = arith.constant 0 : index
    %c121_182 = arith.constant 121 : index
    %363 = vector.load %arg9[%c0_181, %c121_182] : memref<8x768xf32, #tpu.memory_space<vmem>>, vector<8x512xf32>
    %364 = arith.andi %6, %14 : vector<1x512xi1>
    %cst_183 = arith.constant 0.000000e+00 : f32
    %365 = vector.shape_cast %364 : vector<1x512xi1> to vector<1x512xi1>
    %366 = vector.broadcast %365 : vector<1x512xi1> to vector<8x512xi1>
    %367 = vector.broadcast %cst_183 : f32 to vector<8x512xf32>
    %368 = arith.select %366, %363, %367 : vector<8x512xi1>, vector<8x512xf32>
    %369 = arith.truncf %368 : vector<8x512xf32> to vector<8x512xbf16>
    %c88_184 = arith.constant 88 : index
    %c0_185 = arith.constant 0 : index
    %370 = vector.load %arg11[%c88_184, %c0_185] : memref<256x512xbf16, #tpu.memory_space<vmem>>, vector<8x512xbf16>
    tpu.vector_store %arg11[%c88_184, %c0_185], %369 {strides = array<i32>} : memref<256x512xbf16, #tpu.memory_space<vmem>>, vector<8x512xbf16>,
    %c0_186 = arith.constant 0 : index
    %c127_187 = arith.constant 127 : index
    %371 = vector.load %arg9[%c0_186, %c127_187] : memref<8x768xf32, #tpu.memory_space<vmem>>, vector<8x512xf32>
    %cst_188 = arith.constant 0.000000e+00 : f32
    %372 = vector.shape_cast %8 : vector<1x512xi1> to vector<1x512xi1>
    %373 = vector.broadcast %372 : vector<1x512xi1> to vector<8x512xi1>
    %374 = vector.broadcast %cst_188 : f32 to vector<8x512xf32>
    %375 = arith.select %373, %371, %374 : vector<8x512xi1>, vector<8x512xf32>
    %376 = arith.truncf %375 : vector<8x512xf32> to vector<8x512xbf16>
    %c96_189 = arith.constant 96 : index
    %c0_190 = arith.constant 0 : index
    %377 = vector.load %arg11[%c96_189, %c0_190] : memref<256x512xbf16, #tpu.memory_space<vmem>>, vector<8x512xbf16>
    tpu.vector_store %arg11[%c96_189, %c0_190], %376 {strides = array<i32>} : memref<256x512xbf16, #tpu.memory_space<vmem>>, vector<8x512xbf16>,
    %c0_191 = arith.constant 0 : index
    %c128_192 = arith.constant 128 : index
    %378 = vector.load %arg9[%c0_191, %c128_192] : memref<8x768xf32, #tpu.memory_space<vmem>>, vector<8x512xf32>
    %379 = arith.truncf %378 : vector<8x512xf32> to vector<8x512xbf16>
    %c104_193 = arith.constant 104 : index
    %c0_194 = arith.constant 0 : index
    %380 = vector.load %arg11[%c104_193, %c0_194] : memref<256x512xbf16, #tpu.memory_space<vmem>>, vector<8x512xbf16>
    tpu.vector_store %arg11[%c104_193, %c0_194], %379 {strides = array<i32>} : memref<256x512xbf16, #tpu.memory_space<vmem>>, vector<8x512xbf16>,
    %c0_195 = arith.constant 0 : index
    %c129_196 = arith.constant 129 : index
    %381 = vector.load %arg9[%c0_195, %c129_196] : memref<8x768xf32, #tpu.memory_space<vmem>>, vector<8x512xf32>
    %cst_197 = arith.constant 0.000000e+00 : f32
    %382 = vector.shape_cast %14 : vector<1x512xi1> to vector<1x512xi1>
    %383 = vector.broadcast %382 : vector<1x512xi1> to vector<8x512xi1>
    %384 = vector.broadcast %cst_197 : f32 to vector<8x512xf32>
    %385 = arith.select %383, %381, %384 : vector<8x512xi1>, vector<8x512xf32>
    %386 = arith.truncf %385 : vector<8x512xf32> to vector<8x512xbf16>
    %c112 = arith.constant 112 : index
    %c0_198 = arith.constant 0 : index
    %387 = vector.load %arg11[%c112, %c0_198] : memref<256x512xbf16, #tpu.memory_space<vmem>>, vector<8x512xbf16>
    tpu.vector_store %arg11[%c112, %c0_198], %386 {strides = array<i32>} : memref<256x512xbf16, #tpu.memory_space<vmem>>, vector<8x512xbf16>,
    %c0_199 = arith.constant 0 : index
    %c135_200 = arith.constant 135 : index
    %388 = vector.load %arg9[%c0_199, %c135_200] : memref<8x768xf32, #tpu.memory_space<vmem>>, vector<8x512xf32>
    %389 = arith.andi %12, %8 : vector<1x512xi1>
    %cst_201 = arith.constant 0.000000e+00 : f32
    %390 = vector.shape_cast %389 : vector<1x512xi1> to vector<1x512xi1>
    %391 = vector.broadcast %390 : vector<1x512xi1> to vector<8x512xi1>
    %392 = vector.broadcast %cst_201 : f32 to vector<8x512xf32>
    %393 = arith.select %391, %388, %392 : vector<8x512xi1>, vector<8x512xf32>
    %394 = arith.truncf %393 : vector<8x512xf32> to vector<8x512xbf16>
    %c120_202 = arith.constant 120 : index
    %c0_203 = arith.constant 0 : index
    %395 = vector.load %arg11[%c120_202, %c0_203] : memref<256x512xbf16, #tpu.memory_space<vmem>>, vector<8x512xbf16>
    tpu.vector_store %arg11[%c120_202, %c0_203], %394 {strides = array<i32>} : memref<256x512xbf16, #tpu.memory_space<vmem>>, vector<8x512xbf16>,
    %c0_204 = arith.constant 0 : index
    %c136_205 = arith.constant 136 : index
    %396 = vector.load %arg9[%c0_204, %c136_205] : memref<8x768xf32, #tpu.memory_space<vmem>>, vector<8x512xf32>
    %cst_206 = arith.constant 0.000000e+00 : f32
    %397 = vector.shape_cast %12 : vector<1x512xi1> to vector<1x512xi1>
    %398 = vector.broadcast %397 : vector<1x512xi1> to vector<8x512xi1>
    %399 = vector.broadcast %cst_206 : f32 to vector<8x512xf32>
    %400 = arith.select %398, %396, %399 : vector<8x512xi1>, vector<8x512xf32>
    %401 = arith.truncf %400 : vector<8x512xf32> to vector<8x512xbf16>
    %c128_207 = arith.constant 128 : index
    %c0_208 = arith.constant 0 : index
    %402 = vector.load %arg11[%c128_207, %c0_208] : memref<256x512xbf16, #tpu.memory_space<vmem>>, vector<8x512xbf16>
    tpu.vector_store %arg11[%c128_207, %c0_208], %401 {strides = array<i32>} : memref<256x512xbf16, #tpu.memory_space<vmem>>, vector<8x512xbf16>,
    %c0_209 = arith.constant 0 : index
    %c137_210 = arith.constant 137 : index
    %403 = vector.load %arg9[%c0_209, %c137_210] : memref<8x768xf32, #tpu.memory_space<vmem>>, vector<8x512xf32>
    %404 = arith.andi %12, %14 : vector<1x512xi1>
    %cst_211 = arith.constant 0.000000e+00 : f32
    %405 = vector.shape_cast %404 : vector<1x512xi1> to vector<1x512xi1>
    %406 = vector.broadcast %405 : vector<1x512xi1> to vector<8x512xi1>
    %407 = vector.broadcast %cst_211 : f32 to vector<8x512xf32>
    %408 = arith.select %406, %403, %407 : vector<8x512xi1>, vector<8x512xf32>
    %409 = arith.truncf %408 : vector<8x512xf32> to vector<8x512xbf16>
    %c136_212 = arith.constant 136 : index
    %c0_213 = arith.constant 0 : index
    %410 = vector.load %arg11[%c136_212, %c0_213] : memref<256x512xbf16, #tpu.memory_space<vmem>>, vector<8x512xbf16>
    tpu.vector_store %arg11[%c136_212, %c0_213], %409 {strides = array<i32>} : memref<256x512xbf16, #tpu.memory_space<vmem>>, vector<8x512xbf16>,
    %c0_214 = arith.constant 0 : index
    %c183_215 = arith.constant 183 : index
    %411 = vector.load %arg9[%c0_214, %c183_215] : memref<8x768xf32, #tpu.memory_space<vmem>>, vector<8x512xf32>
    %412 = arith.andi %10, %6 : vector<1x512xi1>
    %413 = arith.andi %412, %8 : vector<1x512xi1>
    %cst_216 = arith.constant 0.000000e+00 : f32
    %414 = vector.shape_cast %413 : vector<1x512xi1> to vector<1x512xi1>
    %415 = vector.broadcast %414 : vector<1x512xi1> to vector<8x512xi1>
    %416 = vector.broadcast %cst_216 : f32 to vector<8x512xf32>
    %417 = arith.select %415, %411, %416 : vector<8x512xi1>, vector<8x512xf32>
    %418 = arith.truncf %417 : vector<8x512xf32> to vector<8x512xbf16>
    %c144 = arith.constant 144 : index
    %c0_217 = arith.constant 0 : index
    %419 = vector.load %arg11[%c144, %c0_217] : memref<256x512xbf16, #tpu.memory_space<vmem>>, vector<8x512xbf16>
    tpu.vector_store %arg11[%c144, %c0_217], %418 {strides = array<i32>} : memref<256x512xbf16, #tpu.memory_space<vmem>>, vector<8x512xbf16>,
    %c0_218 = arith.constant 0 : index
    %c184_219 = arith.constant 184 : index
    %420 = vector.load %arg9[%c0_218, %c184_219] : memref<8x768xf32, #tpu.memory_space<vmem>>, vector<8x512xf32>
    %421 = arith.andi %10, %6 : vector<1x512xi1>
    %cst_220 = arith.constant 0.000000e+00 : f32
    %422 = vector.shape_cast %421 : vector<1x512xi1> to vector<1x512xi1>
    %423 = vector.broadcast %422 : vector<1x512xi1> to vector<8x512xi1>
    %424 = vector.broadcast %cst_220 : f32 to vector<8x512xf32>
    %425 = arith.select %423, %420, %424 : vector<8x512xi1>, vector<8x512xf32>
    %426 = arith.truncf %425 : vector<8x512xf32> to vector<8x512xbf16>
    %c152 = arith.constant 152 : index
    %c0_221 = arith.constant 0 : index
    %427 = vector.load %arg11[%c152, %c0_221] : memref<256x512xbf16, #tpu.memory_space<vmem>>, vector<8x512xbf16>
    tpu.vector_store %arg11[%c152, %c0_221], %426 {strides = array<i32>} : memref<256x512xbf16, #tpu.memory_space<vmem>>, vector<8x512xbf16>,
    %c0_222 = arith.constant 0 : index
    %c185_223 = arith.constant 185 : index
    %428 = vector.load %arg9[%c0_222, %c185_223] : memref<8x768xf32, #tpu.memory_space<vmem>>, vector<8x512xf32>
    %429 = arith.andi %10, %6 : vector<1x512xi1>
    %430 = arith.andi %429, %14 : vector<1x512xi1>
    %cst_224 = arith.constant 0.000000e+00 : f32
    %431 = vector.shape_cast %430 : vector<1x512xi1> to vector<1x512xi1>
    %432 = vector.broadcast %431 : vector<1x512xi1> to vector<8x512xi1>
    %433 = vector.broadcast %cst_224 : f32 to vector<8x512xf32>
    %434 = arith.select %432, %428, %433 : vector<8x512xi1>, vector<8x512xf32>
    %435 = arith.truncf %434 : vector<8x512xf32> to vector<8x512xbf16>
    %c160 = arith.constant 160 : index
    %c0_225 = arith.constant 0 : index
    %436 = vector.load %arg11[%c160, %c0_225] : memref<256x512xbf16, #tpu.memory_space<vmem>>, vector<8x512xbf16>
    tpu.vector_store %arg11[%c160, %c0_225], %435 {strides = array<i32>} : memref<256x512xbf16, #tpu.memory_space<vmem>>, vector<8x512xbf16>,
    %c0_226 = arith.constant 0 : index
    %c191_227 = arith.constant 191 : index
    %437 = vector.load %arg9[%c0_226, %c191_227] : memref<8x768xf32, #tpu.memory_space<vmem>>, vector<8x512xf32>
    %438 = arith.andi %10, %8 : vector<1x512xi1>
    %cst_228 = arith.constant 0.000000e+00 : f32
    %439 = vector.shape_cast %438 : vector<1x512xi1> to vector<1x512xi1>
    %440 = vector.broadcast %439 : vector<1x512xi1> to vector<8x512xi1>
    %441 = vector.broadcast %cst_228 : f32 to vector<8x512xf32>
    %442 = arith.select %440, %437, %441 : vector<8x512xi1>, vector<8x512xf32>
    %443 = arith.truncf %442 : vector<8x512xf32> to vector<8x512xbf16>
    %c168 = arith.constant 168 : index
    %c0_229 = arith.constant 0 : index
    %444 = vector.load %arg11[%c168, %c0_229] : memref<256x512xbf16, #tpu.memory_space<vmem>>, vector<8x512xbf16>
    tpu.vector_store %arg11[%c168, %c0_229], %443 {strides = array<i32>} : memref<256x512xbf16, #tpu.memory_space<vmem>>, vector<8x512xbf16>,
    %c0_230 = arith.constant 0 : index
    %c192_231 = arith.constant 192 : index
    %445 = vector.load %arg9[%c0_230, %c192_231] : memref<8x768xf32, #tpu.memory_space<vmem>>, vector<8x512xf32>
    %cst_232 = arith.constant 0.000000e+00 : f32
    %446 = vector.shape_cast %10 : vector<1x512xi1> to vector<1x512xi1>
    %447 = vector.broadcast %446 : vector<1x512xi1> to vector<8x512xi1>
    %448 = vector.broadcast %cst_232 : f32 to vector<8x512xf32>
    %449 = arith.select %447, %445, %448 : vector<8x512xi1>, vector<8x512xf32>
    %450 = arith.truncf %449 : vector<8x512xf32> to vector<8x512xbf16>
    %c176 = arith.constant 176 : index
    %c0_233 = arith.constant 0 : index
    %451 = vector.load %arg11[%c176, %c0_233] : memref<256x512xbf16, #tpu.memory_space<vmem>>, vector<8x512xbf16>
    tpu.vector_store %arg11[%c176, %c0_233], %450 {strides = array<i32>} : memref<256x512xbf16, #tpu.memory_space<vmem>>, vector<8x512xbf16>,
    %c0_234 = arith.constant 0 : index
    %c193_235 = arith.constant 193 : index
    %452 = vector.load %arg9[%c0_234, %c193_235] : memref<8x768xf32, #tpu.memory_space<vmem>>, vector<8x512xf32>
    %453 = arith.andi %10, %14 : vector<1x512xi1>
    %cst_236 = arith.constant 0.000000e+00 : f32
    %454 = vector.shape_cast %453 : vector<1x512xi1> to vector<1x512xi1>
    %455 = vector.broadcast %454 : vector<1x512xi1> to vector<8x512xi1>
    %456 = vector.broadcast %cst_236 : f32 to vector<8x512xf32>
    %457 = arith.select %455, %452, %456 : vector<8x512xi1>, vector<8x512xf32>
    %458 = arith.truncf %457 : vector<8x512xf32> to vector<8x512xbf16>
    %c184_237 = arith.constant 184 : index
    %c0_238 = arith.constant 0 : index
    %459 = vector.load %arg11[%c184_237, %c0_238] : memref<256x512xbf16, #tpu.memory_space<vmem>>, vector<8x512xbf16>
    tpu.vector_store %arg11[%c184_237, %c0_238], %458 {strides = array<i32>} : memref<256x512xbf16, #tpu.memory_space<vmem>>, vector<8x512xbf16>,
    %c0_239 = arith.constant 0 : index
    %c199_240 = arith.constant 199 : index
    %460 = vector.load %arg9[%c0_239, %c199_240] : memref<8x768xf32, #tpu.memory_space<vmem>>, vector<8x512xf32>
    %461 = arith.andi %10, %12 : vector<1x512xi1>
    %462 = arith.andi %461, %8 : vector<1x512xi1>
    %cst_241 = arith.constant 0.000000e+00 : f32
    %463 = vector.shape_cast %462 : vector<1x512xi1> to vector<1x512xi1>
    %464 = vector.broadcast %463 : vector<1x512xi1> to vector<8x512xi1>
    %465 = vector.broadcast %cst_241 : f32 to vector<8x512xf32>
    %466 = arith.select %464, %460, %465 : vector<8x512xi1>, vector<8x512xf32>
    %467 = arith.truncf %466 : vector<8x512xf32> to vector<8x512xbf16>
    %c192_242 = arith.constant 192 : index
    %c0_243 = arith.constant 0 : index
    %468 = vector.load %arg11[%c192_242, %c0_243] : memref<256x512xbf16, #tpu.memory_space<vmem>>, vector<8x512xbf16>
    tpu.vector_store %arg11[%c192_242, %c0_243], %467 {strides = array<i32>} : memref<256x512xbf16, #tpu.memory_space<vmem>>, vector<8x512xbf16>,
    %c0_244 = arith.constant 0 : index
    %c200_245 = arith.constant 200 : index
    %469 = vector.load %arg9[%c0_244, %c200_245] : memref<8x768xf32, #tpu.memory_space<vmem>>, vector<8x512xf32>
    %470 = arith.andi %10, %12 : vector<1x512xi1>
    %cst_246 = arith.constant 0.000000e+00 : f32
    %471 = vector.shape_cast %470 : vector<1x512xi1> to vector<1x512xi1>
    %472 = vector.broadcast %471 : vector<1x512xi1> to vector<8x512xi1>
    %473 = vector.broadcast %cst_246 : f32 to vector<8x512xf32>
    %474 = arith.select %472, %469, %473 : vector<8x512xi1>, vector<8x512xf32>
    %475 = arith.truncf %474 : vector<8x512xf32> to vector<8x512xbf16>
    %c200_247 = arith.constant 200 : index
    %c0_248 = arith.constant 0 : index
    %476 = vector.load %arg11[%c200_247, %c0_248] : memref<256x512xbf16, #tpu.memory_space<vmem>>, vector<8x512xbf16>
    tpu.vector_store %arg11[%c200_247, %c0_248], %475 {strides = array<i32>} : memref<256x512xbf16, #tpu.memory_space<vmem>>, vector<8x512xbf16>,
    %c0_249 = arith.constant 0 : index
    %c201_250 = arith.constant 201 : index
    %477 = vector.load %arg9[%c0_249, %c201_250] : memref<8x768xf32, #tpu.memory_space<vmem>>, vector<8x512xf32>
    %478 = arith.andi %10, %12 : vector<1x512xi1>
    %479 = arith.andi %478, %14 : vector<1x512xi1>
    %cst_251 = arith.constant 0.000000e+00 : f32
    %480 = vector.shape_cast %479 : vector<1x512xi1> to vector<1x512xi1>
    %481 = vector.broadcast %480 : vector<1x512xi1> to vector<8x512xi1>
    %482 = vector.broadcast %cst_251 : f32 to vector<8x512xf32>
    %483 = arith.select %481, %477, %482 : vector<8x512xi1>, vector<8x512xf32>
    %484 = arith.truncf %483 : vector<8x512xf32> to vector<8x512xbf16>
    %c208 = arith.constant 208 : index
    %c0_252 = arith.constant 0 : index
    %485 = vector.load %arg11[%c208, %c0_252] : memref<256x512xbf16, #tpu.memory_space<vmem>>, vector<8x512xbf16>
    tpu.vector_store %arg11[%c208, %c0_252], %484 {strides = array<i32>} : memref<256x512xbf16, #tpu.memory_space<vmem>>, vector<8x512xbf16>,
    %c0_253 = arith.constant 0 : index
    %c0_254 = arith.constant 0 : index
    %486 = vector.load %arg5[%c0_253, %c0_254] : memref<4x256xbf16, #tpu.memory_space<vmem>>, vector<4x256xbf16>
    %c0_255 = arith.constant 0 : index
    %c0_256 = arith.constant 0 : index
    %487 = vector.load %arg11[%c0_255, %c0_256] : memref<256x512xbf16, #tpu.memory_space<vmem>>, vector<256x512xbf16>
    %cst_257 = arith.constant dense<0.000000e+00> : vector<4x512xf32>
    %488 = tpu.matmul %486, %487, %cst_257 {dimension_numbers = #tpu.dot_dimension_numbers<[1], [0], [0], [1], [0, 0, 1, 1], [], []>} : vector<4x256xbf16>, vector<256x512xbf16>, vector<4x512xf32> -> vector<4x512xf32>
    %c0_258 = arith.constant 0 : index
    %c0_259 = arith.constant 0 : index
    %489 = vector.load %arg6[%c0_258, %c0_259] : memref<4x1xf32, #tpu.memory_space<vmem>>, vector<4x1xf32>
    %490 = vector.broadcast %489 : vector<4x1xf32> to vector<4x512xf32>
    %491 = arith.addf %488, %490 : vector<4x512xf32>
    %cst_260 = arith.constant dense<0.000000e+00> : vector<4xf32>
    %492 = vector.multi_reduction <add>, %491, %cst_260 [1] : vector<4x512xf32> to vector<4xf32>
    %493 = vector.shape_cast %492 : vector<4xf32> to vector<4x1xf32>
    %cst_261 = arith.constant 5.120000e+02 : f32
    %494 = vector.broadcast %cst_261 : f32 to vector<4x1xf32>
    %495 = arith.divf %493, %494 : vector<4x1xf32>
    %496 = vector.broadcast %495 : vector<4x1xf32> to vector<4x512xf32>
    %497 = arith.subf %491, %496 : vector<4x512xf32>
    %498 = arith.mulf %497, %497 : vector<4x512xf32>
    %cst_262 = arith.constant dense<0.000000e+00> : vector<4xf32>
    %499 = vector.multi_reduction <add>, %498, %cst_262 [1] : vector<4x512xf32> to vector<4xf32>
    %500 = vector.shape_cast %499 : vector<4xf32> to vector<4x1xf32>
    %cst_263 = arith.constant 5.120000e+02 : f32
    %501 = vector.broadcast %cst_263 : f32 to vector<4x1xf32>
    %502 = arith.divf %500, %501 : vector<4x1xf32>
    %503 = vector.broadcast %495 : vector<4x1xf32> to vector<4x512xf32>
    %504 = arith.subf %491, %503 : vector<4x512xf32>
    %cst_264 = arith.constant 9.99999974E-6 : f32
    %505 = vector.broadcast %cst_264 : f32 to vector<4x1xf32>
    %506 = arith.addf %502, %505 : vector<4x1xf32>
    %507 = math.rsqrt %506 : vector<4x1xf32>
    %508 = vector.broadcast %507 : vector<4x1xf32> to vector<4x512xf32>
    %509 = arith.mulf %504, %508 : vector<4x512xf32>
    %cst_265 = arith.constant 0.000000e+00 : f32
    %510 = vector.broadcast %cst_265 : f32 to vector<4x512xf32>
    %511 = arith.cmpf ogt, %509, %510 : vector<4x512xf32>
    %cst_266 = arith.constant 0.00999999977 : f32
    %512 = vector.broadcast %cst_266 : f32 to vector<4x512xf32>
    %513 = arith.mulf %512, %509 : vector<4x512xf32>
    %514 = arith.select %511, %509, %513 : vector<4x512xi1>, vector<4x512xf32>
    %c0_267 = arith.constant 0 : index
    %c0_268 = arith.constant 0 : index
    %c0_269 = arith.constant 0 : index
    %515 = vector.load %arg7[%c0_267, %c0_268, %c0_269] : memref<1x4x512xf32, #tpu.memory_space<vmem>>, vector<1x4x512xf32>
    %516 = vector.shape_cast %515 : vector<1x4x512xf32> to vector<4x512xf32>
    %517 = vector.shape_cast %514 : vector<4x512xf32> to vector<1x4x512xf32>
    tpu.vector_store %arg7[%c0_267, %c0_268, %c0_269], %517 {strides = array<i32>} : memref<1x4x512xf32, #tpu.memory_space<vmem>>, vector<1x4x512xf32>,
    return
  }
  func.func @transform_0(%arg0: i32) -> (i32, i32, i32) {
    %c0_i32 = arith.constant 0 : i32
    %c0_i32_0 = arith.constant 0 : i32
    %c0_i32_1 = arith.constant 0 : i32
    return %arg0, %c0_i32, %c0_i32_0 : i32, i32, i32
  }
  func.func @transform_1(%arg0: i32) -> (i32, i32) {
    %c0_i32 = arith.constant 0 : i32
    %c0_i32_0 = arith.constant 0 : i32
    %c0_i32_1 = arith.constant 0 : i32
    return %c0_i32, %c0_i32_0 : i32, i32
  }
  func.func @transform_2(%arg0: i32) -> (i32, i32) {
    %c0_i32 = arith.constant 0 : i32
    %c0_i32_0 = arith.constant 0 : i32
    %c0_i32_1 = arith.constant 0 : i32
    return %c0_i32, %c0_i32_0 : i32, i32
  }
  func.func @transform_3(%arg0: i32) -> (i32, i32) {
    %c0_i32 = arith.constant 0 : i32
    %c0_i32_0 = arith.constant 0 : i32
    %c0_i32_1 = arith.constant 0 : i32
    return %c0_i32, %c0_i32_0 : i32, i32
  }
  func.func @transform_4(%arg0: i32) -> (i32, i32) {
    %c0_i32 = arith.constant 0 : i32
    %c0_i32_0 = arith.constant 0 : i32
    %c0_i32_1 = arith.constant 0 : i32
    return %c0_i32, %c0_i32_0 : i32, i32
  }
  func.func @transform_5(%arg0: i32) -> (i32, i32) {
    %c0_i32 = arith.constant 0 : i32
    %c0_i32_0 = arith.constant 0 : i32
    %c0_i32_1 = arith.constant 0 : i32
    return %c0_i32, %c0_i32_0 : i32, i32
  }
  func.func @transform_6(%arg0: i32) -> (i32, i32, i32) {
    %c0_i32 = arith.constant 0 : i32
    %c0_i32_0 = arith.constant 0 : i32
    %c0_i32_1 = arith.constant 0 : i32
    return %arg0, %c0_i32, %c0_i32_0 : i32, i32, i32
  }
}

</mosaic_0001>

<bundles_post_ra>
// kernel: decode_conv_unit.1
= control target key start
LH: loop header
LB: loop body
LE: loop exit
PB: predicated region body
PF: predicated region fallthrough
CT: control target
= control target key end

     0   :  { %s4473_s21 = smov 0   ;;  %s7085_s0 = inlined_call_operand.vmem [shape: f32[2,4,512], index: 0, kind: input, shape index: {}]   ;;  %s7086_s1 = inlined_call_operand.vmem [shape: s32[3,512], index: 1, kind: input, shape index: {}]   ;;  %s7087_s2 = inlined_call_operand.vmem [shape: bf16[8,128], index: 2, kind: input, shape index: {}]   ;;  %s7088_s3 = inlined_call_operand.vmem [shape: f32[8,1], index: 3, kind: input, shape index: {}]   ;;  %s7089_s4 = inlined_call_operand.vmem [shape: bf16[4,256], index: 4, kind: input, shape index: {}]   ;;  %s7090_s5 = inlined_call_operand.vmem [shape: f32[4,1], index: 5, kind: input, shape index: {}]   ;;  %s7091_s6 = inlined_call_operand.vmem [shape: f32[2,4,512], index: 6, kind: output, shape index: {}]  }
   0x1 LB: > { %s3767_s22 = sadd.s32 4294967295, %s4417_s21   ;;  %p3771_p0 = scmp.ge.s32.totalorder %s4417_s21, 1  ;;  %s4417_s21 = sphi %s4473_s21, %s16_s21  }
   0x2   : > { %p212_p1 = scmp.lt.s32.totalorder %s4417_s21, 3 }
   0x4   : > { %p213_p2 = pnand %p3771_p0, %p212_p1 }
   0x6   : > { %216 = sbr.rel (%p213_p2) target bundleno = 1788 (0x6fc), region = 44 }
   0xd   : > { %p242_p3 = scmp.lt.s32.totalorder %s3767_s22, 1  ;;  %v7093_v0 = vmov 0.0   ;;  %v7114_v1 = vmov 0   ;;  %s4421_s27 = smov 65   ;;  %v284_v49 = vlaneseq  ;;  %vm7106_vm14 = vcmask 531456  }
   0xe   : > { %264 = vst [vmem:[#allocation2] sm:$0xf] %v7093_v0  ;;  %265 = vst [vmem:[#allocation2 + $0x14] sm:$0xf] %v7093_v0  ;;  %2176 = vmatprep.mubr.bf16.mxu0 %v7114_v1  ;;  %2217 = vmatprep.mubr.bf16.mxu1 %v7114_v1  ;;  %s4422_s28 = smov 72   ;;  %s4423_s29 = smov 71  }
   0xf   : > { %s8127_s22 = smov (!%p242_p3, %s3767_s22), 1  ;;  %270 = vst [vmem:[#allocation4 + $0xc0] sm:$0xc0] %v7114_v1  ;;  %271 = vst [vmem:[#allocation4 + $0xc8] sm:$0xc0] %v7114_v1  ;;  %4110 = vset.pattern.permute.xlu0 %v7114_v1  ;;  %4396 = vset.pattern.permute.xlu1 %v7114_v1  ;;  %s4424_s30 = smov 73  }
  0x10   : > { %s7092_s23 = sshll.u32 %s8127_s22, 4  ;;  %272 = vst [vmem:[#allocation4 + $0xd0] sm:$0xc0] %v7114_v1  ;;  %273 = vst [vmem:[#allocation4 + $0xd8] sm:$0xc0] %v7114_v1  ;;  %s4425_s7 = smov 63  }
  0x11   : > { %s246_s26 = scalar_lea.vmem %s7085_s0, %s7092_s23  ;;  %274 = vst [vmem:[#allocation4 + $0xe0] sm:$0xff] %v7114_v1  ;;  %2271 = vst [vmem:[#allocation5 + $0x1a0] sm:$0xf0] %v7114_v1  ;;  %s4426_s8 = smov 56   ;;  %v285_v54 = vshrl.u32 %v284_v49, 7  ;;  %vm7097_vm15 = vcmask 588800  }
  0x12   : > { %2272 = vst [vmem:[#allocation5 + $0x1a8] sm:$0xf0] %v7114_v1  ;;  %2273 = vst [vmem:[#allocation5 + $0x1b0] sm:$0xf0] %v7114_v1  ;;  %v266_v2 = vld [vmem:[%s246_s26] sm:$0xff]  ;;  %v4502_v3 = vld [vmem:[%s246_s26 + $0x8] sm:$0xff] }
  0x13   : > { %2274 = vst [vmem:[#allocation5 + $0x1b8] sm:$0xf0] %v7114_v1  ;;  %268 = vst [vmem:[#allocation2 + $0x4] sm:$0xff] %v266_v2  ;;  %v4509_v4 = vcombine.high %v4502_v3, %v4502_v3  ;;  %v4512_v5 = vpack.i.bf16 %v266_v2, %v4502_v3  ;;  %v1654_v13 = vcombine.high %v266_v2, %v266_v2  ;;  %s4427_s9 = smov 57   ;;  %s4428_s10 = smov 64   ;;  %v4636_v56 = vsub.s32 1, %v285_v54 }
  0x14   : > { %269 = vst [vmem:[#allocation2 + $0xc] sm:$0xff] %v4502_v3  ;;  %s4429_s11 = smov 9   ;;  %s4430_s12 = smov 7   ;;  %v4601_v47 = vld [vmem:[%s7086_s1 + $0x2] ss:$4 sm:$0xf] }
  0x15   : > { %v4515_v6 = vpack.i.bf16 %v4509_v4, %v266_v2  ;;  %s4431_s13 = smov 8   ;;  %s4432_s14 = smov 55   ;;  %v4580_v31 = vpack.i.bf16 %v4502_v3, %v1654_v13  ;;  %v1278_v44 = vld [vmem:[#allocation2 + $0x14] sm:$0xf]  ;;  %vm7102_vm0 = vcmp.ge.s32.totalorder %v4601_v47, 1  ;;  %vm7096_vm5 = vcmp.le.s32.totalorder %v4601_v47, 6 }
  0x16   : > { %s4433_s15 = smov 127   ;;  %s4434_s16 = smov 121   ;;  %v1206_v45 = vld [vmem:[#allocation2 + $0x14] sm:$0xf]  ;;  %v4657_v62 = vsub.s32 0, %v285_v54  ;;  %v4659_v63 = vsub.s32 2, %v285_v54 }
  0x17   : > { %s4435_s17 = smov 1   ;;  %v4606_v48 = vld [vmem:[%s7086_s1] ss:$4 sm:$0xf]  ;;  %s4436_s23 = smov 119   ;;  %v7307_v55 = vmov 0 }
  0x18   : > { %v4611_v50 = vld [vmem:[%s7086_s1 + $0x1] ss:$4 sm:$0xf]  ;;  %vm258_vm1 = vcmp.ge.s32.totalorder %v4606_v48, 1  ;;  %v1557_v57 = vld [vmem:[#allocation2 + $0x14] sm:$0xf] }
  0x19   : > { %vm7098_vm2 = vcmp.ge.s32.totalorder %v4611_v50, 1  ;;  %vm488_vm3 = vmand %vm258_vm1, %vm7102_vm0  ;;  %vm7095_vm6 = vcmp.le.s32.totalorder %v4611_v50, 6  ;;  %v1484_v58 = vld [vmem:[#allocation2 + $0x14] sm:$0xf]  ;;  %s4437_s18 = smov 120  }
  0x1a   : > { %v485_v7 = vld [vmem:[#allocation2] sm:$0xff]  ;;  %vm4631_vm4 = vmand %vm258_vm1, %vm7098_vm2  ;;  %v4640_v59 = vsel %vm488_vm3, 1, %v7114_v1  ;;  %v4655_v61 = vld [vmem:[#allocation2 + $0x14] sm:$0xf] }
  0x1b   : > { %v486_v8 = vld [vmem:[#allocation2 + $0x8] sm:$0xff]  ;;  %v513_v9 = vcombine.high %v485_v7, %v485_v7  ;;  %v414_v14 = vld [vmem:[#allocation2 + $0x10] sm:$0xf]  ;;  %v4645_v60 = vsel %vm4631_vm4, 1, %v7114_v1  ;;  %vm415_vm7 = vmand %vm4631_vm4, %vm7096_vm5 }
  0x1c   : > { %v514_v10 = vcombine.high %v486_v8, %v486_v8  ;;  %v342_v15 = vld [vmem:[#allocation2 + $0x10] sm:$0xf]  ;;  %v3855_v16 = vpack.i.bf16 %v1654_v13, %v414_v14  ;;  %v1176_v35 = vld [vmem:[#allocation2 + $0x4] sm:$0xff]  ;;  %v4661_v2 = vld [vmem:[#allocation2 + $0x14] sm:$0xf]  ;;  %v351_v14 = vrot.slane %v4645_v60, %v4636_v56 }
  0x1d   : > { %v4517_v11 = vpack.i.bf16 %v486_v8, %v513_v9  ;;  %v3850_v17 = vpack.i.bf16 %v1654_v13, %v342_v15  ;;  %v487_v18 = vld [vmem:[#allocation2 + $0x10] sm:$0xf]  ;;  %v1180_v36 = vcombine.high %v1176_v35, %v1176_v35  ;;  %v1184_v39 = vpack.c.bf16 %v1176_v35, %v1176_v35  ;;  %vm282_vm8 = vmand %vm4631_vm4, %vm7102_vm0  ;;  %v1411_v3 = vld [vmem:[#allocation2 + $0x14] sm:$0xf] }
  0x1e   : > { %v4523_v12 = vpack.i.bf16 %v514_v10, %v485_v7  ;;  %v3860_v19 = vpack.i.bf16 %v1654_v13, %v487_v18  ;;  %v280_v20 = vld [vmem:[#allocation2 + $0x10] sm:$0xf]  ;;  %v4667_v7 = vld [vmem:[#allocation2 + $0x14] sm:$0xf]  ;;  %vm4673_vm9 = vmand %vm258_vm1, %vm7095_vm6  ;;  %v4035_v9 = vpack.i.bf16 %v1557_v57, %v4509_v4  ;;  %v4030_v10 = vpack.i.bf16 %v1484_v58, %v4509_v4 }
  0x1f   : > { %3821 = vrot.lane.b32.xlu1 %v4517_v11, %s4421_s27  ;;  %3811 = vrot.lane.b32.xlu0 %v4517_v11, %s4422_s28  ;;  %v3880_v21 = vpack.i.bf16 %v1654_v13, %v280_v20  ;;  %v620_v22 = vld [vmem:[#allocation2 + $0x10] sm:$0xf]  ;;  %v1185_v38 = vpack.c.bf16 %v1180_v36, %v1180_v36  ;;  %v1192_v42 = vrot.slane %v1184_v39, 6  ;;  %v4060_v15 = vpack.i.bf16 %v4655_v61, %v4509_v4  ;;  %vm4699_vm10 = vmand %vm258_vm1, %vm7096_vm5  ;;  %v1351_v0 = vld [vmem:[#allocation2 + $0x14] sm:$0xf] }
  0x20   : > { %v3910_v23 = vpack.i.bf16 %v1654_v13, %v620_v22  ;;  %v693_v24 = vld [vmem:[#allocation2 + $0x10] sm:$0xf]  ;;  %v355_v20 = vrot.slane %v4645_v60, %v4659_v63  ;;  %v4712_v22 = vsub.s32 3, %v285_v54  ;;  %vm695_vm11 = vmand %vm4673_vm9, %vm7102_vm0  ;;  %v4748_v36 = vsel %vm4673_vm9, 1, %v7114_v1 }
  0x21   : > { %v767_v25 = vld [vmem:[#allocation2 + $0x10] sm:$0xf]  ;;  %v1193_v41 = vrot.slane %v1185_v38, 6  ;;  %1200 = vst [vmem:[#allocation4 + $0x60] sm:$0xc] %v1192_v42  ;;  %vm4765_vm12 = vmand %vm7098_vm2, %vm7102_vm0  ;;  %vm4808_vm4 = vcmp.eq.s32.totalorder %v351_v14, 1 }
  0x22   : > { %v3915_v26 = vpack.i.bf16 %v1654_v13, %v767_v25  ;;  %v560_v27 = vld [vmem:[#allocation2 + $0x10] sm:$0xf]  ;;  %v501_v25 = vrot.slane %v4640_v59, %v4659_v63  ;;  %vm4784_vm13 = vmand %vm7098_vm2, %vm7096_vm5  ;;  %v7310_v57 = vmov 0  ;;  %v4831_v14 = vsel %vm7098_vm2, 1, %v7114_v1 }
  0x23   : > { %3826 = vrot.lane.b32.xlu1 %v4523_v12, %s4422_s28  ;;  %3816 = vrot.lane.b32.xlu0 %v4517_v11, %s4423_s29  ;;  %v3935_v28 = vpack.i.bf16 %v1654_v13, %v560_v27  ;;  %v973_v29 = vld [vmem:[#allocation2 + $0x10] sm:$0xf]  ;;  %1201 = vst [vmem:[#allocation4 + $0x68] sm:$0xc] %v1193_v41  ;;  %v4726_v27 = vld [vmem:[#allocation2 + $0x14] sm:$0xf] }
  0x24   : > { %v900_v30 = vld [vmem:[#allocation2 + $0x10] sm:$0xf]  ;;  %v7311_v57 = vsel %vm4808_vm4, 4294967295, %v7310_v57  ;;  %v4836_v18 = vsel %vm4765_vm12, 1, %v7114_v1  ;;  %v7312_v54 = vmov 0  ;;  %vm4920_vm12 = vcmp.eq.s32.totalorder %v501_v25, 1 }
  0x25   : > { %v1045_v32 = vld [vmem:[#allocation2 + $0x10] sm:$0xf]  ;;  %v7325_v25 = vmov 0  ;;  %vm7343_vm2 = vcmask 580608  }
  0x26   : > { %v839_v33 = vld [vmem:[#allocation2 + $0x10] sm:$0xf] }
  0x27   : > { %3836 = vrot.lane.b32.xlu1 %v4523_v12, %s4421_s27  ;;  %3831 = vrot.lane.b32.xlu0 %v4523_v12, %s4423_s29  ;;  %v3975_v34 = vpack.i.bf16 %v1654_v13, %v839_v33  ;;  %v1177_v37 = vld [vmem:[#allocation2 + $0xc] sm:$0xff]  ;;  %v4684_v13 = vld [vmem:[#allocation2 + $0x14] sm:$0xf] }
  0x28   : > { %v1186_v40 = vpack.c.bf16 %v1177_v37, %v1177_v37  ;;  %v1181_v46 = vcombine.high %v1177_v37, %v1177_v37  ;;  %v1118_v53 = vld [vmem:[#allocation2 + $0x10] sm:$0xf]  ;;  %v4739_v33 = vld [vmem:[#allocation2 + $0x14] sm:$0xf]  ;;  %v4751_v37 = vsel %vm695_vm11, 1, %v7114_v1 }
  0x2a   : > { %v1194_v43 = vrot.slane %v1186_v40, 6  ;;  %v1187_v51 = vpack.c.bf16 %v1181_v46, %v1181_v46 }
  0x2b   : > { %3846 = vrot.lane.b32.xlu1 %v4523_v12, %s4424_s30  ;;  %3841 = vrot.lane.b32.xlu0 %v4517_v11, %s4424_s30 }
  0x2c   : > { %1202 = vst [vmem:[#allocation4 + $0x70] sm:$0xc] %v1194_v43  ;;  %v1195_v52 = vrot.slane %v1187_v51, 6  ;;  %v7328_v51 = vmov 0 }
  0x2e   : > { %1203 = vst [vmem:[#allocation4 + $0x78] sm:$0xc] %v1195_v52 }
  0x2f   : > { %3856 = vrot.lane.b32.xlu1 %v3855_v16, %s4423_s29  ;;  %3851 = vrot.lane.b32.xlu0 %v3850_v17, %s4422_s28  ;;  %v4070_v16 = vpack.i.bf16 %v4661_v2, %v4509_v4  ;;  %v4693_v17 = vsel %vm282_vm8, 1, %v7114_v1  ;;  %vm4864_vm8 = vcmp.eq.s32.totalorder %v355_v20, 1  ;;  %v7316_v20 = vmov 0 }
  0x30   : > { %v295_v35 = vrot.slane %v4693_v17, %v4659_v63 }
  0x33   : > { %3866 = vrot.lane.b32.xlu1 %v4517_v11, %s4425_s7  ;;  %3861 = vrot.lane.b32.xlu0 %v3860_v19, %s4421_s27  ;;  %v347_v19 = vrot.slane %v4645_v60, %v4657_v62 }
  0x37   : > { %3876 = vrot.lane.b32.xlu1 %v4517_v11, %s4426_s8  ;;  %3871 = vrot.lane.b32.xlu0 %v4517_v11, %s4427_s9 }
  0x3b   : > { %3886 = vrot.lane.b32.xlu1 %v4523_v12, %s4425_s7  ;;  %3881 = vrot.lane.b32.xlu0 %v3880_v21, %s4424_s30  ;;  %v4065_v21 = vpack.i.bf16 %v4667_v7, %v4509_v4  ;;  %v7331_v7 = vmov 0 }
  0x3f   : > { %3896 = vrot.lane.b32.xlu1 %v4523_v12, %s4426_s8  ;;  %3891 = vrot.lane.b32.xlu0 %v4523_v12, %s4427_s9 }
  0x43   : > { %3906 = vrot.lane.b32.xlu1 %v4523_v12, %s4428_s10  ;;  %3901 = vrot.lane.b32.xlu0 %v4517_v11, %s4428_s10 }
  0x47   : > { %730 = vrot.lane.b32.xlu1 %v693_v24, %s4427_s9  ;;  %3911 = vrot.lane.b32.xlu0 %v3910_v23, %s4425_s7  ;;  %v493_v24 = vrot.slane %v4640_v59, %v4657_v62 }
  0x4b   : > { %3921 = vrot.lane.b32.xlu1 %v4517_v11, %s4429_s11  ;;  %3916 = vrot.lane.b32.xlu0 %v3915_v26, %s4426_s8 }
  0x4f   : > { %3931 = vrot.lane.b32.xlu1 %v4517_v11, %s4430_s12  ;;  %3926 = vrot.lane.b32.xlu0 %v4517_v11, %s4431_s13 }
  0x53   : > { %3941 = vrot.lane.b32.xlu1 %v4523_v12, %s4429_s11  ;;  %3936 = vrot.lane.b32.xlu0 %v3935_v28, %s4428_s10 }
  0x57   : > { %3951 = vrot.lane.b32.xlu1 %v4523_v12, %s4430_s12  ;;  %3946 = vrot.lane.b32.xlu0 %v4523_v12, %s4431_s13 }
  0x5b   : > { %3961 = vrot.lane.b32.xlu1 %v4523_v12, %s4432_s14  ;;  %3956 = vrot.lane.b32.xlu0 %v4517_v11, %s4432_s14 }
  0x5f   : > { %1008 = vrot.lane.b32.xlu1 %v973_v29, %s4431_s13  ;;  %936 = vrot.lane.b32.xlu0 %v900_v30, %s4429_s11  ;;  %v287_v30 = vrot.slane %v4693_v17, %v4657_v62 }
  0x63   : > { %3966 = vrot.lane.b32.xlu1 %v4580_v31, %s4433_s15  ;;  %1081 = vrot.lane.b32.xlu0 %v1045_v32, %s4430_s12  ;;  %v4737_v32 = vsel %vm4699_vm10, 1, %v7114_v1  ;;  %vm1279_vm10 = vmand %vm7095_vm6, %vm7102_vm0 }
  0x64   : > { %v4908_v41 = vsel %vm1279_vm10, 1, %v7114_v1 }
  0x67   : > { %3976 = vrot.lane.b32.xlu1 %v3975_v34, %s4432_s14  ;;  %3971 = vrot.lane.b32.xlu0 %v4580_v31, %s4434_s16  ;;  %v291_v34 = vrot.slane %v4693_v17, %v4636_v56 }
  0x69   : > { %vm5021_vm6 = vcmp.eq.s32.totalorder %v291_v34, 1 }
  0x6b   : > { %3986 = vrot.lane.b32.xlu1 %v4515_v6, %s4434_s16  ;;  %3981 = vrot.lane.b32.xlu0 %v4515_v6, %s4433_s15 }
  0x6f   : > { %3996 = vrot.lane.b32.xlu1 %v4523_v12, %s4435_s17  ;;  %3991 = vrot.lane.b32.xlu0 %v4517_v11, %s4435_s17  ;;  %v497_v11 = vrot.slane %v4640_v59, %v4636_v56  ;;  %v4682_v12 = vsel %vm415_vm7, 1, %v7114_v1  ;;  %vm4860_vm7 = vcmp.eq.s32.totalorder %v347_v19, 1  ;;  %v7319_v19 = vmov 0 }
  0x70   : > { %v424_v23 = vrot.slane %v4682_v12, %v4636_v56  ;;  %v420_v28 = vrot.slane %v4682_v12, %v4657_v62  ;;  %v428_v29 = vrot.slane %v4682_v12, %v4659_v63  ;;  %v432_v38 = vrot.slane %v4682_v12, %v4712_v22 }
  0x71   : > { %vm4804_vm3 = vcmp.eq.s32.totalorder %v497_v11, 1  ;;  %v7313_v54 = vsel %vm4860_vm7, 4294967295, %v7312_v54  ;;  %v7320_v19 = vsel %vm4920_vm12, 4294967295, %v7319_v19 }
  0x72   : > { %v7308_v55 = vsel %vm4804_vm3, 4294967295, %v7307_v55  ;;  %vm4883_vm11 = vcmp.eq.s32.totalorder %v424_v23, 1  ;;  %7321 = vst [vmem:[#allocation8_spill] sm:$0xff] %v7320_v19  ;;  %vm4959_vm10 = vcmp.eq.s32.totalorder %v428_v29, 1 }
  0x73   : > { %1314 = vrot.lane.b32.xlu1 %v1278_v44, %s4434_s16  ;;  %1241 = vrot.lane.b32.xlu0 %v1206_v45, %s4433_s15  ;;  %v4778_v45 = vsel %vm258_vm1, 1, %v7114_v1  ;;  %vm4800_vm1 = vmand %vm4673_vm9, %vm7096_vm5  ;;  %7309 = vst [vmem:[#allocation6_spill] sm:$0xff] %v7308_v55  ;;  %vm7099_vm9 = vcmask 580608   ;;  %v7317_v20 = vsel %vm4883_vm11, 4294967295, %v7316_v20  ;;  %v7329_v51 = vsel %vm4959_vm10, 4294967295, %v7328_v51 }
  0x74   : > { %v4845_v11 = vsel %vm4800_vm1, 1, %v7114_v1  ;;  %7318 = vst [vmem:[#allocation7_spill] sm:$0xff] %v7317_v20  ;;  %vm4940_vm1 = vcmp.eq.s32.totalorder %v420_v28, 1  ;;  %7330 = vst [vmem:[#allocation11_spill] sm:$0xff] %v7329_v51  ;;  %v7416_v51 = vmov 0 }
  0x75   : > { %v7326_v25 = vsel %vm4940_vm1, 4294967295, %v7325_v25 }
  0x76   : > { %7327 = vst [vmem:[#allocation10_spill] sm:$0xff] %v7326_v25 }
  0x77   : > { %4006 = vrot.lane.b32.xlu1 %v4512_v5, %s4424_s30  ;;  %4001 = vrot.lane.b32.xlu0 %v4580_v31, %s4436_s23 }
  0x7b   : > { %1153 = vrot.lane.b32.xlu1 %v1118_v53, %s4435_s17  ;;  %4011 = vrot.lane.b32.xlu0 %v4512_v5, %s4422_s28 }
  0x7f   : > { %4021 = vrot.lane.b32.xlu1 %v4580_v31, %s4437_s18  ;;  %4016 = vrot.lane.b32.xlu0 %v4515_v6, %s4436_s23 }
  0x83   : > { %1447 = vrot.lane.b32.xlu1 %v1411_v3, %s4436_s23  ;;  %4026 = vrot.lane.b32.xlu0 %v4515_v6, %s4437_s18  ;;  %v4850_v3 = vsel %vm4784_vm13, 1, %v7114_v1  ;;  %vm4933_vm13 = vcmp.eq.s32.totalorder %v493_v24, 1 }
  0x87   : > { %4036 = vrot.lane.b32.xlu1 %v4035_v9, %s4422_s28  ;;  %4031 = vrot.lane.b32.xlu0 %v4030_v10, %s4424_s30 }
  0x8b   : > { %4046 = vrot.lane.b32.xlu1 %v4512_v5, %s4428_s10  ;;  %4041 = vrot.lane.b32.xlu0 %v4512_v5, %s4421_s27 }
  0x8f   : > { %1386 = vrot.lane.b32.xlu1 %v1351_v0, %s4437_s18  ;;  %4051 = vrot.lane.b32.xlu0 %v4512_v5, %s4425_s7  ;;  %v4913_v0 = vsel %vm7096_vm5, 1, %v7114_v1  ;;  %vm4998_vm5 = vcmp.eq.s32.totalorder %v295_v35, 1  ;;  %v7334_v35 = vmov 0 }
  0x90   : > { %v7332_v7 = vsel %vm4998_vm5, 4294967295, %v7331_v7 }
  0x91   : > { %v4901_v58 = vpop.permute.xlu1 %3821  ;;  %v3812_v8 = vpop.permute.xlu0 %3811  ;;  %7333 = vst [vmem:[#allocation12_spill] sm:$0xff] %v7332_v7 }
  0x92   : > { %v3824_v23 = vunpack.i.h.bf16 %v4901_v58  ;;  %v3823_v9 = vunpack.i.l.bf16 %v4901_v58  ;;  %v3814_v44 = vunpack.i.h.bf16 %v3812_v8  ;;  %v3813_v52 = vunpack.i.l.bf16 %v3812_v8 }
  0x93   : > { %4061 = vrot.lane.b32.xlu1 %v4060_v15, %s4421_s27  ;;  %4056 = vrot.lane.b32.xlu0 %v4512_v5, %s4423_s29  ;;  %v7322_v8 = vmov 0 }
  0x94   : > { %v7323_v8 = vsel %vm4933_vm13, 4294967295, %v7322_v8  ;;  %v527_v24 = vsel %vm7106_vm14, %v3823_v9, %v3824_v23  ;;  %v381_v28 = vsel %vm7097_vm15, %v3813_v52, %v3814_v44 }
  0x95   : > { %7324 = vst [vmem:[#allocation9_spill] sm:$0xff] %v7323_v8  ;;  %v535_v61 = vsel %vm4804_vm3, %v527_v24, 0.0  ;;  %v389_v53 = vsel %vm4808_vm4, %v381_v28, 0.0  ;;  %v4971_v40 = vpop.permute.xlu1 %3826  ;;  %v3817_v49 = vpop.permute.xlu0 %3816  ;;  %v7437_v8 = vmov 0 }
  0x96   : > { %v539_v26 = vpack.c.bf16 %v535_v61, %v535_v61  ;;  %v393_v15 = vpack.c.bf16 %v389_v53, %v389_v53  ;;  %v7108_v42 = vunpack.i.h.bf16 %v4971_v40  ;;  %v3828_v10 = vunpack.i.l.bf16 %v4971_v40 }
  0x97   : > { %v3819_v39 = vunpack.i.h.bf16 %v3817_v49  ;;  %v3818_v24 = vunpack.i.l.bf16 %v3817_v49  ;;  %4071 = vrot.lane.b32.xlu1 %v4070_v16, %s4425_s7  ;;  %4066 = vrot.lane.b32.xlu0 %v4065_v21, %s4428_s10  ;;  %v7340_v53 = vmov 0 }
  0x98   : > { %v547_v28 = vrot.slane %v539_v26, 2  ;;  %v401_v43 = vrot.slane %v393_v15, 6  ;;  %v380_v49 = vsel %vm7097_vm15, %v3828_v10, %v3813_v52  ;;  %v382_v2 = vsel %vm7097_vm15, %v3814_v44, %v7108_v42 }
  0x99   : > { %v388_v16 = vsel %vm4860_vm7, %v380_v49, 0.0  ;;  %v390_v21 = vsel %vm4864_vm8, %v382_v2, 0.0  ;;  %v454_v26 = vsel %vm7099_vm9, %v3818_v24, %v3819_v39  ;;  %v5007_v52 = vpop.permute.xlu1 %3836  ;;  %v5009_v10 = vpop.permute.xlu0 %3831  ;;  %vm5014_vm15 = vcmp.eq.s32.totalorder %v287_v30, 1 }
  0x9a   : > { %v7335_v35 = vsel %vm5014_vm15, 4294967295, %v7334_v35  ;;  %v7337_v44 = vmov 0  ;;  %555 = vst [vmem:[#allocation4 + $0x8] sm:$0xc0] %v547_v28  ;;  %409 = vst [vmem:[#allocation4 + $0x8] sm:$0xc] %v401_v43  ;;  %v392_v15 = vpack.c.bf16 %v388_v16, %v388_v16  ;;  %v394_v49 = vpack.c.bf16 %v390_v21, %v390_v21 }
  0x9b   : > { %7336 = vst [vmem:[#allocation13_spill] sm:$0xff] %v7335_v35  ;;  %v7338_v44 = vsel %vm5021_vm6, 4294967295, %v7337_v44  ;;  %v462_v2 = vsel %vm4883_vm11, %v454_v26, 0.0  ;;  %v7101_v30 = vunpack.i.h.bf16 %v5007_v52  ;;  %vm5032_vm9 = vcmp.eq.s32.totalorder %v432_v38, 1  ;;  %4081 = vrot.lane.b32.xlu1 %v4512_v5, %s4432_s14  ;;  %4076 = vrot.lane.b32.xlu0 %v4512_v5, %s4426_s8 }
  0x9c   : > { %7339 = vst [vmem:[#allocation14_spill] sm:$0xff] %v7338_v44  ;;  %v7341_v53 = vsel %vm5032_vm9, 4294967295, %v7340_v53  ;;  %v466_v34 = vpack.c.bf16 %v462_v2, %v462_v2  ;;  %v3838_v61 = vunpack.i.l.bf16 %v5007_v52  ;;  %v3834_v28 = vunpack.i.h.bf16 %v5009_v10 }
  0x9d   : > { %7342 = vst [vmem:[#allocation15_spill] sm:$0xff] %v7341_v53  ;;  %v3833_v43 = vunpack.i.l.bf16 %v5009_v10  ;;  %v400_v16 = vrot.slane %v392_v15, 6  ;;  %v402_v21 = vrot.slane %v394_v49, 6  ;;  %v528_v12 = vsel %vm7106_vm14, %v3824_v23, %v7101_v30  ;;  %v5059_v49 = vpop.permute.xlu1 %3846  ;;  %v3842_v29 = vpop.permute.xlu0 %3841 }
  0x9e   : > { %v5051_v38 = vsel %vm7102_vm0, 1, %v7114_v1  ;;  %v474_v26 = vrot.slane %v466_v34, 4  ;;  %v536_v2 = vsel %vm4920_vm12, %v528_v12, 0.0  ;;  %v526_v5 = vsel %vm7106_vm14, %v3838_v61, %v3823_v9 }
  0x9f   : > { %v453_v15 = vsel %vm7343_vm2, %v3833_v43, %v3818_v24  ;;  %v7344_v23 = vrot.slane %v4645_v60, %v4712_v22  ;;  %v7345_v30 = vmov 0  ;;  %vm7348_vm11 = vcmp.ge.s32.totalorder %v4611_v50, 1  ;;  %408 = vst [vmem:[#allocation4] sm:$0xc] %v400_v16  ;;  %410 = vst [vmem:[#allocation4 + $0x10] sm:$0xc] %v402_v21  ;;  %4091 = vrot.lane.b32.xlu1 %v4580_v31, %s4427_s9 }
  0xa0   : > { %vm7349_vm12 = vcmp.le.s32.totalorder %v4606_v48, 6  ;;  %v540_v9 = vpack.c.bf16 %v536_v2, %v536_v2  ;;  %v534_v24 = vsel %vm4933_vm13, %v526_v5, 0.0  ;;  %v455_v60 = vsel %vm7343_vm2, %v3819_v39, %v3834_v28  ;;  %482 = vst [vmem:[#allocation4 + $0x8] sm:$0x30] %v474_v26 }
  0xa1   : > { %vm5064_vm3 = vcmp.eq.s32.totalorder %v7344_v23, 1  ;;  %vm5072_vm4 = vmand %vm7349_vm12, %vm7348_vm11  ;;  %v461_v61 = vsel %vm4940_vm1, %v453_v15, 0.0  ;;  %v7352_v34 = vrot.slane %v4737_v32, %v4636_v56  ;;  %v7353_v43 = vmov 0 }
  0xa2   : > { %v7346_v30 = vsel %vm5064_vm3, 4294967295, %v7345_v30  ;;  %v538_v16 = vpack.c.bf16 %v534_v24, %v534_v24  ;;  %v463_v21 = vsel %vm4959_vm10, %v455_v60, 0.0  ;;  %v465_v12 = vpack.c.bf16 %v461_v61, %v461_v61 }
  0xa3   : > { %7347 = vst [vmem:[#allocation16_spill] sm:$0xff] %v7346_v30  ;;  %vm5086_vm11 = vcmp.eq.s32.totalorder %v7352_v34, 1  ;;  %v7113_v2 = vunpack.i.h.bf16 %v5059_v49  ;;  %v7356_v39 = vpack.i.bf16 %v4684_v13, %v4509_v4  ;;  %v7357_v5 = vrot.slane %v4640_v59, %v4712_v22  ;;  %v5115_v34 = vpop.permute.xlu1 %3856 }
  0xa4   : > { %v7354_v43 = vsel %vm5086_vm11, 4294967295, %v7353_v43  ;;  %v7358_v26 = vmov 0  ;;  %v548_v15 = vrot.slane %v540_v9, 2  ;;  %v467_v23 = vpack.c.bf16 %v463_v21, %v463_v21 }
  0xa5   : > { %7355 = vst [vmem:[#allocation17_spill] sm:$0xff] %v7354_v43  ;;  %4086 = vrot.lane.b32.xlu0 %v7356_v39, %s4423_s29  ;;  %vm5102_vm12 = vcmp.eq.s32.totalorder %v7357_v5, 1  ;;  %v3848_v24 = vunpack.i.l.bf16 %v5059_v49  ;;  %v3844_v60 = vunpack.i.h.bf16 %v3842_v29  ;;  %vm7361_vm2 = vcmp.ge.s32.totalorder %v4601_v47, 1  ;;  %v5117_v39 = vpop.permute.xlu0 %3851 }
  0xa6   : > { %v7359_v26 = vsel %vm5102_vm12, 4294967295, %v7358_v26  ;;  %vm5111_vm14 = vmand %vm5072_vm4, %vm7361_vm2  ;;  %v546_v13 = vrot.slane %v538_v16, 2  ;;  %v473_v61 = vrot.slane %v465_v12, 4  ;;  %v3843_v59 = vunpack.i.l.bf16 %v3842_v29  ;;  %556 = vst [vmem:[#allocation4 + $0x10] sm:$0xc0] %v548_v15 }
  0xa7   : > { %7360 = vst [vmem:[#allocation18_spill] sm:$0xff] %v7359_v26  ;;  %v475_v21 = vrot.slane %v467_v23, 4  ;;  %vm7364_vm1 = vcmask 596992   ;;  %v3858_v42 = vunpack.i.l.bf16 %v5115_v34  ;;  %v7365_v16 = vrot.slane %v4748_v36, %v4636_v56 }
  0xa8   : > { %v322_v5 = vsel %vm7364_vm1, %v3844_v60, %v7113_v2  ;;  %v7366_v29 = vmov 0  ;;  %554 = vst [vmem:[#allocation4] sm:$0xc0] %v546_v13  ;;  %481 = vst [vmem:[#allocation4] sm:$0x30] %v473_v61  ;;  %v5147_v13 = vsel %vm5111_vm14, 1, %v7114_v1  ;;  %v7392_v2 = vrot.slane %v4693_v17, %v4712_v22 }
  0xa9   : > { %vm5128_vm2 = vcmp.eq.s32.totalorder %v7365_v16, 1  ;;  %v330_v15 = vsel %vm4998_vm5, %v322_v5, 0.0  ;;  %vm7369_vm0 = vmmov %vm7364_vm1  ;;  %v7371_v16 = vpack.i.bf16 %v4726_v27, %v4509_v4  ;;  %4096 = vrot.lane.b32.xlu0 %v4515_v6, %s4427_s9  ;;  %483 = vst [vmem:[#allocation4 + $0x10] sm:$0x30] %v475_v21  ;;  %v7373_v6 = vrot.slane %v4751_v37, %v4636_v56  ;;  %v5168_v10 = vpop.permute.xlu0 %3861 }
  0xaa   : > { %v7367_v29 = vsel %vm5128_vm2, 4294967295, %v7366_v29  ;;  %v320_v23 = vsel %vm7369_vm0, %v3848_v24, %v3843_v59  ;;  %vm7370_vm1 = vmmov %vm7369_vm0  ;;  %v334_v61 = vpack.c.bf16 %v330_v15, %v330_v15  ;;  %vm7372_vm0 = vcmask 580608  }
  0xab   : > { %7368 = vst [vmem:[#allocation19_spill] sm:$0xff] %v7367_v29  ;;  %v321_v9 = vsel %vm7370_vm1, %v3843_v59, %v3844_v60  ;;  %4101 = vrot.lane.b32.xlu1 %v7371_v16, %s4426_s8  ;;  %v328_v24 = vsel %vm5014_vm15, %v320_v23, 0.0  ;;  %v456_v27 = vsel %vm7372_vm0, %v3834_v28, %v3858_v42  ;;  %v1903_v59 = vld [vmem:[#allocation2 + $0x14] sm:$0xf]  ;;  %vm5159_vm1 = vcmp.eq.s32.totalorder %v7373_v6, 1 }
  0xac   : > { %v329_v60 = vsel %vm5021_vm6, %v321_v9, 0.0  ;;  %v7374_v31 = vmov 0  ;;  %v332_v21 = vpack.c.bf16 %v328_v24, %v328_v24  ;;  %v464_v15 = vsel %vm5032_vm9, %v456_v27, 0.0  ;;  %v5166_v9 = vpop.permute.xlu1 %3866  ;;  %338 = vst [vmem:[#allocation4 + $0x10] sm:$0x3] %v334_v61 }
  0xad   : > { %v7375_v31 = vsel %vm5159_vm1, 4294967295, %v7374_v31  ;;  %v333_v5 = vpack.c.bf16 %v329_v60, %v329_v60  ;;  %v3853_v23 = vunpack.i.l.bf16 %v5117_v39  ;;  %v468_v42 = vpack.c.bf16 %v464_v15, %v464_v15 }
  0xae   : > { %7376 = vst [vmem:[#allocation20_spill] sm:$0xff] %v7375_v31  ;;  %v7116_v28 = vunpack.i.h.bf16 %v5166_v9  ;;  %v7117_v16 = vunpack.i.l.bf16 %v5166_v9  ;;  %v7377_v6 = vrot.slane %v4737_v32, %v4657_v62  ;;  %v7378_v24 = vmov 0  ;;  %336 = vst [vmem:[#allocation4] sm:$0x3] %v332_v21 }
  0xaf   : > { %v7381_v60 = vrot.slane %v4737_v32, %v4659_v63  ;;  %v7382_v27 = vmov 0  ;;  %vm7385_vm10 = vcmp.le.s32.totalorder %v4601_v47, 6  ;;  %vm7386_vm9 = vcmp.le.s32.totalorder %v4611_v50, 6  ;;  %337 = vst [vmem:[#allocation4 + $0x8] sm:$0x3] %v333_v5  ;;  %1940 = vrot.lane.b32.xlu1 %v1903_v59, %s4427_s9 }
  0xb0   : > { %vm5175_vm14 = vcmp.eq.s32.totalorder %v7377_v6, 1  ;;  %vm5192_vm13 = vmand %vm7386_vm9, %vm7385_vm10  ;;  %v7389_v6 = vunpack.i.h.bf16 %v4971_v40  ;;  %vm7390_vm5 = vcmask 588800   ;;  %v3863_v12 = vunpack.i.l.bf16 %v5168_v10 }
  0xb1   : > { %v7379_v24 = vsel %vm5175_vm14, 4294967295, %v7378_v24  ;;  %vm5182_vm0 = vcmp.eq.s32.totalorder %v7381_v60, 1  ;;  %v7391_v61 = vpack.i.bf16 %v4739_v33, %v4509_v4  ;;  %vm5208_vm9 = vcmp.eq.s32.totalorder %v7392_v2, 1 }
  0xb2   : > { %7380 = vst [vmem:[#allocation21_spill] sm:$0xff] %v7379_v24  ;;  %v7383_v27 = vsel %vm5182_vm0, 4294967295, %v7382_v27  ;;  %v383_v60 = vsel %vm7390_vm5, %v7389_v6, %v3853_v23  ;;  %v7393_v1 = vmov 0  ;;  %v476_v5 = vrot.slane %v468_v42, 4  ;;  %v5232_v6 = vpop.permute.xlu0 %3871 }
  0xb3   : > { %7384 = vst [vmem:[#allocation22_spill] sm:$0xff] %v7383_v27  ;;  %4106 = vrot.lane.b32.xlu0 %v7391_v61, %s4432_s14  ;;  %v7394_v1 = vsel %vm5208_vm9, 4294967295, %v7393_v1  ;;  %v391_v59 = vsel %vm5064_vm3, %v383_v60, 0.0  ;;  %vm7396_vm5 = vcmask 515072   ;;  %v7397_v23 = vunpack.i.h.bf16 %v5007_v52  ;;  %v5230_v61 = vpop.permute.xlu1 %3876 }
  0xb4   : > { %7395 = vst [vmem:[#allocation23_spill] sm:$0xff] %v7394_v1  ;;  %v660_v4 = vsel %vm7396_vm5, %v7117_v16, %v7116_v28  ;;  %v395_v33 = vpack.c.bf16 %v391_v59, %v391_v59  ;;  %vm7398_vm10 = vcmask 531456   ;;  %v7399_v60 = vmov 0   ;;  %484 = vst [vmem:[#allocation4 + $0x18] sm:$0x30] %v476_v5 }
  0xb5   : > { %v668_v2 = vsel %vm5086_vm11, %v660_v4, 0.0  ;;  %v529_v42 = vsel %vm7398_vm10, %v7397_v23, %v3863_v12  ;;  %v5237_v21 = vsel %vm5192_vm13, 1, %v7399_v60  ;;  %v3879_v4 = vunpack.i.h.bf16 %v5230_v61  ;;  %v2106_v19 = vld [vmem:[#allocation4] sm:$0xff] }
  0xb6   : > { %v672_v40 = vpack.c.bf16 %v668_v2, %v668_v2  ;;  %v537_v59 = vsel %vm5102_vm12, %v529_v42, 0.0  ;;  %v7119_v52 = vunpack.i.l.bf16 %v5230_v61  ;;  %v7400_v12 = vrot.slane %v4748_v36, %v4659_v63  ;;  %v5283_v53 = vpop.permute.xlu0 %3881 }
  0xb7   : > { %v7401_v23 = vmov 0  ;;  %v403_v17 = vrot.slane %v395_v33, 6  ;;  %v541_v15 = vpack.c.bf16 %v537_v59, %v537_v59  ;;  %v3873_v5 = vunpack.i.l.bf16 %v5232_v6  ;;  %v5281_v25 = vpop.permute.xlu1 %3886 }
  0xb8   : > { %vm5246_vm5 = vcmp.eq.s32.totalorder %v7400_v12, 1  ;;  %v7404_v2 = vrot.slane %v4748_v36, %v4657_v62  ;;  %v7405_v42 = vmov 0  ;;  %v680_v16 = vrot.slane %v672_v40, 6 }
  0xb9   : > { %v7402_v23 = vsel %vm5246_vm5, 4294967295, %v7401_v23  ;;  %vm7408_vm10 = vcmask 457728   ;;  %v7409_v33 = vrot.slane %v4751_v37, %v4657_v62  ;;  %v7410_v59 = vmov 0  ;;  %411 = vst [vmem:[#allocation4 + $0x18] sm:$0xc] %v403_v17 }
  0xba   : > { %7403 = vst [vmem:[#allocation24_spill] sm:$0xff] %v7402_v23  ;;  %vm5255_vm13 = vcmp.eq.s32.totalorder %v7404_v2, 1  ;;  %v806_v12 = vsel %vm7408_vm10, %v7119_v52, %v3879_v4  ;;  %v5274_v2 = vsel %vm5072_vm4, 1, %v7399_v60  ;;  %v549_v40 = vrot.slane %v541_v15, 2  ;;  %688 = vst [vmem:[#allocation4 + $0x28] sm:$0xc] %v680_v16 }
  0xbb   : > { %v7406_v42 = vsel %vm5255_vm13, 4294967295, %v7405_v42  ;;  %vm5265_vm11 = vcmp.eq.s32.totalorder %v7409_v33, 1  ;;  %v814_v52 = vsel %vm5128_vm2, %v806_v12, 0.0  ;;  %v7413_v43 = vunpack.i.h.bf16 %v5232_v6  ;;  %v2107_v12 = vld [vmem:[#allocation4 + $0x8] sm:$0xff] }
  0xbc   : > { %7407 = vst [vmem:[#allocation25_spill] sm:$0xff] %v7406_v42  ;;  %v7411_v59 = vsel %vm5265_vm11, 4294967295, %v7410_v59  ;;  %vm7414_vm10 = vcmask 465920   ;;  %v7415_v28 = vrot.slane %v4751_v37, %v4659_v63  ;;  %v818_v15 = vpack.c.bf16 %v814_v52, %v814_v52  ;;  %557 = vst [vmem:[#allocation4 + $0x18] sm:$0xc0] %v549_v40  ;;  %2144 = vmatprep.subr.bf16.mxu0 %v2107_v12 }
  0xbd   : > { %7412 = vst [vmem:[#allocation26_spill] sm:$0xff] %v7411_v59  ;;  %v734_v33 = vsel %vm7414_vm10, %v3873_v5, %v7413_v43  ;;  %v3888_v43 = vunpack.i.l.bf16 %v5281_v25  ;;  %v7419_v26 = vrot.slane %v4778_v45, %v4657_v62  ;;  %v7420_v16 = vmov 0  ;;  %2145 = vmatpush1.bf16.msra.mxu0 %v2106_v19  ;;  %v3892_v19 = vpop.permute.xlu0 %3891  ;;  %v5503_v59 = vld [vmem:[#allocation4 + $0xe0] sm:$0xff] }
  0xbe   : > { %vm5288_vm12 = vcmp.eq.s32.totalorder %v7415_v28, 1  ;;  %v3883_v28 = vunpack.i.l.bf16 %v5283_v53  ;;  %v7423_v52 = vrot.slane %v4778_v45, %v4636_v56  ;;  %v7424_v17 = vmov 0 }
  0xbf   : > { %v7417_v51 = vsel %vm5288_vm12, 4294967295, %v7416_v51  ;;  %vm5302_vm2 = vcmp.eq.s32.totalorder %v7419_v26, 1  ;;  %v7427_v40 = vrot.slane %v4778_v45, %v4659_v63  ;;  %v7428_v12 = vmov 0 }
  0xc0   : > { %7418 = vst [vmem:[#allocation27_spill] sm:$0xff] %v7417_v51  ;;  %v7421_v16 = vsel %vm5302_vm2, 4294967295, %v7420_v16  ;;  %vm5309_vm15 = vcmp.eq.s32.totalorder %v7423_v52, 1  ;;  %v742_v26 = vsel %vm5159_vm1, %v734_v33, 0.0  ;;  %v826_v52 = vrot.slane %v818_v15, 2 }
  0xc1   : > { %7422 = vst [vmem:[#allocation28_spill] sm:$0xff] %v7421_v16  ;;  %v7425_v17 = vsel %vm5309_vm15, 4294967295, %v7424_v17  ;;  %vm5316_vm10 = vcmp.eq.s32.totalorder %v7427_v40, 1  ;;  %v7431_v55 = vunpack.i.l.bf16 %v5166_v9  ;;  %vm7432_vm6 = vcmask 515072  }
  0xc2   : > { %7426 = vst [vmem:[#allocation29_spill] sm:$0xff] %v7425_v17  ;;  %v7429_v12 = vsel %vm5316_vm10, 4294967295, %v7428_v12  ;;  %v7433_v7 = vunpack.i.h.bf16 %v5281_v25  ;;  %v7434_v40 = vunpack.i.h.bf16 %v5166_v9  ;;  %vm7435_vm3 = vmmov %vm7432_vm6  ;;  %v7436_v33 = vrot.slane %v4751_v37, %v4712_v22 }
  0xc3   : > { %7430 = vst [vmem:[#allocation30_spill] sm:$0xff] %v7429_v12  ;;  %v659_v20 = vsel %vm7432_vm6, %v3888_v43, %v7431_v55  ;;  %v746_v29 = vpack.c.bf16 %v742_v26, %v742_v26  ;;  %v7440_v43 = vunpack.i.h.bf16 %v5059_v49  ;;  %vm7441_vm6 = vcmask 596992   ;;  %834 = vst [vmem:[#allocation4 + $0x28] sm:$0xc0] %v826_v52 }
  0xc4   : > { %v661_v35 = vsel %vm7435_vm3, %v7434_v40, %v7433_v7  ;;  %vm5337_vm1 = vcmp.eq.s32.totalorder %v7436_v33, 1  ;;  %v667_v15 = vsel %vm5175_vm14, %v659_v20, 0.0  ;;  %v5348_v7 = vpop.permute.xlu1 %3896  ;;  %vm7442_vm3 = vcmp.le.s32.totalorder %v4611_v50, 6 }
  0xc5   : > { %v7438_v8 = vsel %vm5337_vm1, 4294967295, %v7437_v8  ;;  %v669_v55 = vsel %vm5182_vm0, %v661_v35, 0.0  ;;  %v323_v9 = vsel %vm7441_vm6, %v7440_v43, %v3883_v28  ;;  %v5353_v37 = vsel %vm7442_vm3, 1, %v7399_v60 }
  0xc6   : > { %7439 = vst [vmem:[#allocation31_spill] sm:$0xff] %v7438_v8  ;;  %v671_v26 = vpack.c.bf16 %v667_v15, %v667_v15  ;;  %v673_v40 = vpack.c.bf16 %v669_v55, %v669_v55  ;;  %v331_v20 = vsel %vm5208_vm9, %v323_v9, 0.0  ;;  %v7147_v35 = vunpack.i.h.bf16 %v5348_v7 }
  0xc7   : > { %v335_v33 = vpack.c.bf16 %v331_v20, %v331_v20  ;;  %v3898_v49 = vunpack.i.l.bf16 %v5348_v7  ;;  %v3894_v28 = vunpack.i.h.bf16 %v3892_v19  ;;  %v3893_v43 = vunpack.i.l.bf16 %v3892_v19 }
  0xc8   : > { %v679_v31 = vrot.slane %v671_v26, 6  ;;  %v681_v24 = vrot.slane %v673_v40, 6  ;;  %vm7443_vm6 = vcmask 457728   ;;  %v754_v27 = vrot.slane %v746_v29, 4  ;;  %v5371_v26 = vpop.permute.xlu1 %3906  ;;  %v3902_v40 = vpop.permute.xlu0 %3901 }
  0xc9   : > { %v807_v60 = vsel %vm7443_vm6, %v3879_v4, %v7147_v35  ;;  %339 = vst [vmem:[#allocation4 + $0x18] sm:$0x3] %v335_v33  ;;  %v7444_v52 = vunpack.i.l.bf16 %v5230_v61  ;;  %vm7445_vm3 = vmmov %vm7443_vm6  ;;  %vm7446_vm14 = vcmask 465920   ;;  %v7447_v20 = vunpack.i.h.bf16 %v5232_v6 }
  0xca   : > { %v815_v55 = vsel %vm5246_vm5, %v807_v60, 0.0  ;;  %v733_v9 = vsel %vm7446_vm14, %v3893_v43, %v3873_v5  ;;  %vm7448_vm0 = vmmov %vm7446_vm14  ;;  %v7449_v29 = vrot.slane %v4737_v32, %v4712_v22  ;;  %v7450_v4 = vmov 0  ;;  %687 = vst [vmem:[#allocation4 + $0x20] sm:$0xc] %v679_v31 }
  0xcb   : > { %v805_v15 = vsel %vm7445_vm3, %v3898_v49, %v7444_v52  ;;  %v735_v19 = vsel %vm7448_vm0, %v7447_v20, %v3894_v28  ;;  %689 = vst [vmem:[#allocation4 + $0x30] sm:$0xc] %v681_v24  ;;  %v819_v5 = vpack.c.bf16 %v815_v55, %v815_v55  ;;  %v7146_v6 = vunpack.i.h.bf16 %v5371_v26  ;;  %762 = vst [vmem:[#allocation4 + $0x28] sm:$0x30] %v754_v27 }
  0xcc   : > { %vm5376_vm6 = vcmp.eq.s32.totalorder %v7449_v29, 1  ;;  %v813_v61 = vsel %vm5255_vm13, %v805_v15, 0.0  ;;  %v3908_v33 = vunpack.i.l.bf16 %v5371_v26  ;;  %v7453_v49 = vrot.slane %v4836_v18, %v4636_v56 }
  0xcd   : > { %v7451_v4 = vsel %vm5376_vm6, 4294967295, %v7450_v4  ;;  %v7454_v32 = vmov 0  ;;  %v817_v43 = vpack.c.bf16 %v813_v61, %v813_v61  ;;  %v3904_v60 = vunpack.i.h.bf16 %v3902_v40 }
  0xce   : > { %7452 = vst [vmem:[#allocation32_spill] sm:$0xff] %v7451_v4  ;;  %vm5387_vm14 = vcmp.eq.s32.totalorder %v7453_v49, 1  ;;  %v3903_v31 = vunpack.i.l.bf16 %v3902_v40  ;;  %v741_v24 = vsel %vm5265_vm11, %v733_v9, 0.0  ;;  %v7457_v52 = vrot.slane %v4748_v36, %v4712_v22  ;;  %v731_v49 = vpop.permute.xlu1 %730 }
  0xcf   : > { %v7455_v32 = vsel %vm5387_vm14, 4294967295, %v7454_v32  ;;  %v7458_v15 = vmov 0  ;;  %v827_v27 = vrot.slane %v819_v5, 2  ;;  %v743_v55 = vsel %vm5288_vm12, %v735_v19, 0.0  ;;  %v2138_v19 = vld [vmem:[%s7088_s3] sm:$0xff] }
  0xd0   : > { %7456 = vst [vmem:[#allocation33_spill] sm:$0xff] %v7455_v32  ;;  %vm5396_vm0 = vcmp.eq.s32.totalorder %v7457_v52, 1  ;;  %v745_v20 = vpack.c.bf16 %v741_v24, %v741_v24  ;;  %v825_v61 = vrot.slane %v817_v43, 2  ;;  %vm7461_vm3 = vcmask 523264   ;;  %v5409_v52 = vpop.permute.xlu0 %3911  ;;  %2141 = vperm.xlu0 %4110, %v2138_v19  }
  0xd1   : > { %v7459_v15 = vsel %vm5396_vm0, 4294967295, %v7458_v15  ;;  %v600_v9 = vsel %vm7461_vm3, %v3904_v60, %v7146_v6  ;;  %vm7462_vm11 = vmmov %vm7461_vm3  ;;  %835 = vst [vmem:[#allocation4 + $0x30] sm:$0xc0] %v827_v27  ;;  %v7466_v24 = vmov 0  ;;  %v747_v6 = vpack.c.bf16 %v743_v55, %v743_v55 }
  0xd2   : > { %7460 = vst [vmem:[#allocation34_spill] sm:$0xff] %v7459_v15  ;;  %v598_v40 = vsel %vm7462_vm11, %v3908_v33, %v3903_v31  ;;  %vm7463_vm5 = vmmov %vm7461_vm3  ;;  %v608_v5 = vsel %vm5316_vm10, %v600_v9, 0.0  ;;  %vm7464_vm11 = vcmask 465920   ;;  %v753_v35 = vrot.slane %v745_v20, 4  ;;  %v5440_v55 = vpop.permute.xlu1 %3921 }
  0xd3   : > { %v599_v36 = vsel %vm7463_vm5, %v3903_v31, %v3904_v60  ;;  %v606_v43 = vsel %vm5302_vm2, %v598_v40, 0.0  ;;  %v736_v60 = vsel %vm7464_vm11, %v3894_v28, %v731_v49  ;;  %v7465_v31 = vrot.slane %v4850_v3, %v4636_v56  ;;  %833 = vst [vmem:[#allocation4 + $0x20] sm:$0xc0] %v825_v61  ;;  %v2109_v28 = vld [vmem:[#allocation4 + $0x18] sm:$0xff] }
  0xd4   : > { %v607_v33 = vsel %vm5309_vm15, %v599_v36, 0.0  ;;  %v612_v27 = vpack.c.bf16 %v608_v5, %v608_v5  ;;  %v610_v9 = vpack.c.bf16 %v606_v43, %v606_v43  ;;  %v744_v40 = vsel %vm5337_vm1, %v736_v60, 0.0  ;;  %2185 = vmatprep.subr.bf16.mxu1 %v2109_v28  ;;  %v5442_v20 = vpop.permute.xlu0 %3916  ;;  %v2108_v5 = vld [vmem:[#allocation4 + $0x10] sm:$0xff]  ;;  %761 = vst [vmem:[#allocation4 + $0x20] sm:$0x30] %v753_v35 }
  0xd5   : > { %vm5424_vm3 = vcmp.eq.s32.totalorder %v7465_v31, 1  ;;  %v611_v29 = vpack.c.bf16 %v607_v33, %v607_v33  ;;  %v748_v36 = vpack.c.bf16 %v744_v40, %v744_v40  ;;  %v7469_v49 = vrot.slane %v4831_v14, %v4636_v56  ;;  %2186 = vmatpush1.bf16.msra.mxu1 %v2108_v5 }
  0xd6   : > { %v7467_v24 = vsel %vm5424_vm3, 4294967295, %v7466_v24  ;;  %v7470_v31 = vmov 0  ;;  %616 = vst [vmem:[#allocation4 + $0x30] sm:$0x3] %v612_v27  ;;  %614 = vst [vmem:[#allocation4 + $0x20] sm:$0x3] %v610_v9  ;;  %v3913_v19 = vunpack.i.l.bf16 %v5409_v52  ;;  %v7156_v40 = vunpack.i.l.bf16 %v5440_v55 }
  0xd7   : > { %7468 = vst [vmem:[#allocation35_spill] sm:$0xff] %v7467_v24  ;;  %vm5433_vm11 = vcmp.eq.s32.totalorder %v7469_v49, 1  ;;  %615 = vst [vmem:[#allocation4 + $0x28] sm:$0x3] %v611_v29  ;;  %v755_v27 = vrot.slane %v747_v6, 4  ;;  %v756_v9 = vrot.slane %v748_v36, 4  ;;  %v7155_v29 = vunpack.i.h.bf16 %v5440_v55 }
  0xd8   : > { %v7471_v31 = vsel %vm5433_vm11, 4294967295, %v7470_v31  ;;  %v7473_v28 = vrot.slane %v4778_v45, %v4712_v22  ;;  %v7474_v49 = vmov 0  ;;  %v7477_v33 = vrot.slane %v4836_v18, %v4657_v62 }
  0xd9   : > { %7472 = vst [vmem:[#allocation36_spill] sm:$0xff] %v7471_v31  ;;  %v7478_v60 = vmov 0  ;;  %v7481_v35 = vrot.slane %v4836_v18, %v4659_v63  ;;  %v7482_v6 = vmov 0  ;;  %v7485_v45 = vmov 0.0   ;;  %763 = vst [vmem:[#allocation4 + $0x30] sm:$0x30] %v755_v27 }
  0xda   : > { %vm5455_vm5 = vcmp.eq.s32.totalorder %v7473_v28, 1  ;;  %vm5462_vm13 = vcmp.eq.s32.totalorder %v7477_v33, 1  ;;  %3285 = vrot.lane.b32.xlu0 %v7485_v45, %s4428_s10  ;;  %v7486_v36 = vunpack.i.h.bf16 %v5281_v25  ;;  %vm7487_vm12 = vcmask 515072   ;;  %764 = vst [vmem:[#allocation4 + $0x38] sm:$0x30] %v756_v9  ;;  %v5497_v9 = vpop.permute.xlu1 %3931 }
  0xdb   : > { %v7475_v49 = vsel %vm5455_vm5, 4294967295, %v7474_v49  ;;  %v7479_v60 = vsel %vm5462_vm13, 4294967295, %v7478_v60  ;;  %vm5469_vm1 = vcmp.eq.s32.totalorder %v7481_v35, 1  ;;  %v3918_v28 = vunpack.i.l.bf16 %v5442_v20 }
  0xdc   : > { %7476 = vst [vmem:[#allocation37_spill] sm:$0xff] %v7475_v49  ;;  %7480 = vst [vmem:[#allocation38_spill] sm:$0xff] %v7479_v60  ;;  %v7483_v6 = vsel %vm5469_vm1, 4294967295, %v7482_v6  ;;  %v662_v5 = vsel %vm7487_vm12, %v7486_v36, %v3913_v19  ;;  %vm7488_vm2 = vcmask 72704   ;;  %v7489_v43 = vunpack.i.h.bf16 %v5348_v7 }
  0xdd   : > { %7484 = vst [vmem:[#allocation39_spill] sm:$0xff] %v7483_v6  ;;  %v670_v35 = vsel %vm5376_vm6, %v662_v5, 0.0  ;;  %v940_v25 = vsel %vm7488_vm2, %v7156_v40, %v7155_v29  ;;  %vm7490_vm12 = vcmask 457728   ;;  %v5499_v5 = vpop.permute.xlu0 %3926  ;;  %vm7491_vm2 = vcmp.le.s32.totalorder %v4606_v48, 6 }
  0xde   : > { %v674_v33 = vpack.c.bf16 %v670_v35, %v670_v35  ;;  %v808_v27 = vsel %vm7490_vm12, %v7489_v43, %v3918_v28  ;;  %v948_v61 = vsel %vm5387_vm14, %v940_v25, 0.0  ;;  %v5508_v19 = vsel %vm7491_vm2, 1, %v5503_v59  ;;  %vm7493_vm6 = vmmov %vm7491_vm2  ;;  %3417 = vrot.lane.b32.xlu0 %v7485_v45, %s4426_s8  ;;  %v2111_v51 = vld [vmem:[#allocation4 + $0x28] sm:$0xff]  ;;  %v5571_v16 = vpop.permute.xlu1 %3941 }
  0xdf   : > { %vm7492_vm10 = vcmp.ge.s32.totalorder %v4601_v47, 1  ;;  %v816_v43 = vsel %vm5396_vm0, %v808_v27, 0.0  ;;  %v7162_v28 = vunpack.i.h.bf16 %v5497_v9  ;;  %v7163_v35 = vunpack.i.l.bf16 %v5497_v9  ;;  %2146 = vmatprep.subr.bf16.mxu0 %v2111_v51 }
  0xe0   : > { %vm5514_vm15 = vmand %vm7493_vm6, %vm7492_vm10  ;;  %v7496_v36 = vrot.slane %v4831_v14, %v4659_v63  ;;  %v7497_v29 = vmov 0  ;;  %v682_v40 = vrot.slane %v674_v33, 6  ;;  %v820_v32 = vpack.c.bf16 %v816_v43, %v816_v43 }
  0xe1   : > { %v3928_v27 = vunpack.i.l.bf16 %v5499_v5  ;;  %v952_v8 = vpack.c.bf16 %v948_v61, %v948_v61  ;;  %vm7500_vm10 = vcmask 56320   ;;  %v7502_v23 = vmov 0  ;;  %v5573_v12 = vpop.permute.xlu0 %3936 }
  0xe2   : > { %vm5526_vm12 = vcmp.eq.s32.totalorder %v7496_v36, 1  ;;  %v1085_v25 = vsel %vm7500_vm10, %v7163_v35, %v7162_v28  ;;  %v7501_v36 = vrot.slane %v4831_v14, %v4657_v62  ;;  %v7505_v33 = vrot.slane %v4850_v3, %v4657_v62  ;;  %690 = vst [vmem:[#allocation4 + $0x38] sm:$0xc] %v682_v40 }
  0xe3   : > { %v7498_v29 = vsel %vm5526_vm12, 4294967295, %v7497_v29  ;;  %v7506_v43 = vmov 0  ;;  %v7509_v61 = vrot.slane %v4850_v3, %v4659_v63  ;;  %v7510_v28 = vmov 0 }
  0xe4   : > { %7499 = vst [vmem:[#allocation40_spill] sm:$0xff] %v7498_v29  ;;  %vm5541_vm6 = vcmp.eq.s32.totalorder %v7501_v36, 1  ;;  %vm5548_vm2 = vcmp.eq.s32.totalorder %v7505_v33, 1  ;;  %v5566_v33 = vsel %vm5514_vm15, 1, %v5503_v59  ;;  %v828_v42 = vrot.slane %v820_v32, 2  ;;  %v2110_v36 = vld [vmem:[#allocation4 + $0x20] sm:$0xff] }
  0xe5   : > { %v7503_v23 = vsel %vm5541_vm6, 4294967295, %v7502_v23  ;;  %v7507_v43 = vsel %vm5548_vm2, 4294967295, %v7506_v43  ;;  %vm5555_vm14 = vcmp.eq.s32.totalorder %v7509_v61, 1  ;;  %v7513_v15 = vunpack.i.h.bf16 %v5499_v5  ;;  %2147 = vmatpush1.bf16.msra.mxu0 %v2110_v36 }
  0xe6   : > { %7504 = vst [vmem:[#allocation41_spill] sm:$0xff] %v7503_v23  ;;  %7508 = vst [vmem:[#allocation42_spill] sm:$0xff] %v7507_v43  ;;  %v7511_v28 = vsel %vm5555_vm14, 4294967295, %v7510_v28  ;;  %vm7514_vm10 = vcmask 64512   ;;  %v960_v4 = vrot.slane %v952_v8, 6  ;;  %v1093_v35 = vsel %vm5424_vm3, %v1085_v25, 0.0 }
  0xe7   : > { %7512 = vst [vmem:[#allocation43_spill] sm:$0xff] %v7511_v28  ;;  %v1012_v61 = vsel %vm7514_vm10, %v3928_v27, %v7513_v15  ;;  %v3943_v40 = vunpack.i.l.bf16 %v5571_v16  ;;  %v3938_v32 = vunpack.i.l.bf16 %v5573_v12  ;;  %v7515_v51 = vrot.slane %v4845_v11, %v4657_v62  ;;  %836 = vst [vmem:[#allocation4 + $0x38] sm:$0xc0] %v828_v42 }
  0xe8   : > { %v7516_v15 = vmov 0  ;;  %v7519_v8 = vrot.slane %v4845_v11, %v4636_v56  ;;  %v7522_v25 = vrot.slane %v4845_v11, %v4659_v63  ;;  %v7523_v7 = vmov 0  ;;  %968 = vst [vmem:[#allocation4 + $0x48] sm:$0xc] %v960_v4 }
  0xe9   : > { %vm5583_vm15 = vcmp.eq.s32.totalorder %v7515_v51, 1  ;;  %v1020_v51 = vsel %vm5433_vm11, %v1012_v61, 0.0  ;;  %v1097_v17 = vpack.c.bf16 %v1093_v35, %v1093_v35  ;;  %vm7526_vm3 = vcmask 72704  }
  0xea   : > { %v7517_v15 = vsel %vm5583_vm15, 4294967295, %v7516_v15  ;;  %vm5590_vm10 = vcmp.eq.s32.totalorder %v7519_v8, 1  ;;  %vm5597_vm0 = vcmp.eq.s32.totalorder %v7522_v25, 1  ;;  %v7525_v25 = vunpack.i.l.bf16 %v5440_v55  ;;  %vm7529_vm9 = vmmov %vm7526_vm3 }
  0xeb   : > { %7518 = vst [vmem:[#allocation44_spill] sm:$0xff] %v7517_v15  ;;  %v7524_v7 = vsel %vm5597_vm0, 4294967295, %v7523_v7  ;;  %v7527_v30 = vunpack.i.h.bf16 %v5571_v16  ;;  %v7528_v36 = vunpack.i.h.bf16 %v5440_v55  ;;  %v7530_v61 = vunpack.i.h.bf16 %v5371_v26  ;;  %v3947_v55 = vpop.permute.xlu0 %3946 }
  0xec   : > { %v939_v44 = vsel %vm7526_vm3, %v3943_v40, %v7525_v25  ;;  %vm7531_vm11 = vcmask 523264   ;;  %v7532_v35 = vrot.slane %v4831_v14, %v4712_v22  ;;  %v7533_v8 = vmov 0  ;;  %v5629_v25 = vpop.permute.xlu1 %3951 }
  0xed   : > { %v941_v42 = vsel %vm7529_vm9, %v7528_v36, %v7527_v30  ;;  %v601_v4 = vsel %vm7531_vm11, %v7530_v61, %v3938_v32  ;;  %v1024_v1 = vpack.c.bf16 %v1020_v51, %v1020_v51  ;;  %v7536_v30 = vrot.slane %v4836_v18, %v4712_v22 }
  0xee   : > { %vm5623_vm7 = vcmp.eq.s32.totalorder %v7532_v35, 1  ;;  %v609_v40 = vsel %vm5455_vm5, %v601_v4, 0.0  ;;  %v7537_v26 = vmov 0  ;;  %v947_v14 = vsel %vm5462_vm13, %v939_v44, 0.0 }
  0xef   : > { %v7534_v8 = vsel %vm5623_vm7, 4294967295, %v7533_v8  ;;  %vm5634_vm9 = vcmp.eq.s32.totalorder %v7536_v30, 1  ;;  %v949_v32 = vsel %vm5469_vm1, %v941_v42, 0.0  ;;  %v1105_v36 = vrot.slane %v1097_v17, 2 }
  0xf0   : > { %7535 = vst [vmem:[#allocation45_spill] sm:$0xff] %v7534_v8  ;;  %v7538_v26 = vsel %vm5634_vm9, 4294967295, %v7537_v26  ;;  %vm7539_vm3 = vcmp.le.s32.totalorder %v4601_v47, 6  ;;  %vm7540_vm11 = vcmp.le.s32.totalorder %v4606_v48, 6  ;;  %v613_v51 = vpack.c.bf16 %v609_v40, %v609_v40 }
  0xf1   : > { %vm1832_vm5 = vmand %vm7540_vm11, %vm7539_vm3  ;;  %v7186_v61 = vunpack.i.h.bf16 %v5629_v25  ;;  %v3953_v18 = vunpack.i.l.bf16 %v5629_v25  ;;  %v3949_v4 = vunpack.i.h.bf16 %v3947_v55  ;;  %v3948_v35 = vunpack.i.l.bf16 %v3947_v55  ;;  %1113 = vst [vmem:[#allocation4 + $0x48] sm:$0xc0] %v1105_v36 }
  0xf2   : > { %v1032_v30 = vrot.slane %v1024_v1, 4  ;;  %v951_v31 = vpack.c.bf16 %v947_v14, %v947_v14  ;;  %v953_v60 = vpack.c.bf16 %v949_v32, %v949_v32  ;;  %617 = vst [vmem:[#allocation4 + $0x38] sm:$0x3] %v613_v51  ;;  %v7541_v44 = vunpack.i.l.bf16 %v5497_v9  ;;  %v5663_v14 = vpop.permute.xlu1 %3961  ;;  %v3957_v32 = vpop.permute.xlu0 %3956 }
  0xf3   : > { %vm7542_vm1 = vcmask 56320   ;;  %v7543_v42 = vunpack.i.h.bf16 %v5497_v9  ;;  %v7545_v6 = vunpack.i.h.bf16 %v5499_v5  ;;  %vm7546_vm11 = vcmask 64512  }
  0xf4   : > { %v1084_v17 = vsel %vm7542_vm1, %v3953_v18, %v7541_v44  ;;  %vm7544_vm3 = vmmov %vm7542_vm1  ;;  %v5660_v1 = vsel %vm1832_vm5, 1, %v5503_v59  ;;  %1040 = vst [vmem:[#allocation4 + $0x48] sm:$0x30] %v1032_v30  ;;  %v959_v51 = vrot.slane %v951_v31, 6  ;;  %v961_v9 = vrot.slane %v953_v60, 6 }
  0xf5   : > { %v1086_v40 = vsel %vm7544_vm3, %v7543_v42, %v7186_v61  ;;  %v1013_v49 = vsel %vm7546_vm11, %v7545_v6, %v3949_v4  ;;  %vm7547_vm13 = vmmov %vm7546_vm11  ;;  %v7548_v5 = vrot.slane %v4850_v3, %v4712_v22  ;;  %v7549_v6 = vmov 0 }
  0xf6   : > { %v1011_v55 = vsel %vm7547_vm13, %v3948_v35, %v3928_v27  ;;  %v1021_v36 = vsel %vm5526_vm12, %v1013_v49, 0.0  ;;  %v7189_v18 = vunpack.i.h.bf16 %v5663_v14  ;;  %v3963_v27 = vunpack.i.l.bf16 %v5663_v14  ;;  %967 = vst [vmem:[#allocation4 + $0x40] sm:$0xc] %v959_v51  ;;  %969 = vst [vmem:[#allocation4 + $0x50] sm:$0xc] %v961_v9  ;;  %v1009_v51 = vpop.permute.xlu1 %1008  ;;  %v937_v9 = vpop.permute.xlu0 %936 }
  0xf7   : > { %vm5670_vm3 = vcmp.eq.s32.totalorder %v7548_v5, 1  ;;  %v3959_v35 = vunpack.i.h.bf16 %v3957_v32  ;;  %v3958_v44 = vunpack.i.l.bf16 %v3957_v32  ;;  %v7552_v49 = vrot.slane %v4913_v0, %v4636_v56 }
  0xf8   : > { %v7550_v6 = vsel %vm5670_vm3, 4294967295, %v7549_v6  ;;  %v7553_v31 = vmov 0  ;;  %v1019_v3 = vsel %vm5541_vm6, %v1011_v55, 0.0  ;;  %v1025_v60 = vpack.c.bf16 %v1021_v36, %v1021_v36 }
  0xf9   : > { %7551 = vst [vmem:[#allocation46_spill] sm:$0xff] %v7550_v6  ;;  %vm5679_vm13 = vcmp.eq.s32.totalorder %v7552_v49, 1  ;;  %v1092_v30 = vsel %vm5548_vm2, %v1084_v17, 0.0  ;;  %v1094_v42 = vsel %vm5555_vm14, %v1086_v40, 0.0  ;;  %vm7556_vm5 = vcmask 449536  }
  0xfa   : > { %v7554_v31 = vsel %vm5679_vm13, 4294967295, %v7553_v31  ;;  %v880_v32 = vsel %vm7556_vm5, %v3959_v35, %v7189_v18  ;;  %vm7557_vm11 = vmmov %vm7556_vm5  ;;  %v1023_v61 = vpack.c.bf16 %v1019_v3, %v1019_v3  ;;  %v1033_v40 = vrot.slane %v1025_v60, 4 }
  0xfb   : > { %7555 = vst [vmem:[#allocation47_spill] sm:$0xff] %v7554_v31  ;;  %v878_v5 = vsel %vm7557_vm11, %v3963_v27, %v3958_v44  ;;  %vm7558_vm1 = vmmov %vm7556_vm5  ;;  %v888_v55 = vsel %vm5597_vm0, %v880_v32, 0.0  ;;  %vm7559_vm5 = vcmask 64512   ;;  %v7563_v3 = vrot.slane %v4908_v41, %v4636_v56 }
  0xfc   : > { %v879_v49 = vsel %vm7558_vm1, %v3958_v44, %v3959_v35  ;;  %v886_v36 = vsel %vm5583_vm15, %v878_v5, 0.0  ;;  %v892_v23 = vpack.c.bf16 %v888_v55, %v888_v55  ;;  %v1014_v27 = vsel %vm7559_vm5, %v3949_v4, %v1009_v51  ;;  %1041 = vst [vmem:[#allocation4 + $0x50] sm:$0x30] %v1033_v40  ;;  %v2113_v55 = vld [vmem:[#allocation4 + $0x38] sm:$0xff] }
  0xfd   : > { %v887_v17 = vsel %vm5590_vm10, %v879_v49, 0.0  ;;  %v890_v18 = vpack.c.bf16 %v886_v36, %v886_v36  ;;  %v7560_v35 = vrot.slane %v4845_v11, %v4712_v22  ;;  %v7561_v44 = vmov 0  ;;  %2187 = vmatprep.subr.bf16.mxu1 %v2113_v55 }
  0xfe   : > { %v891_v29 = vpack.c.bf16 %v887_v17, %v887_v17  ;;  %vm5711_vm11 = vcmp.eq.s32.totalorder %v7563_v3, 1  ;;  %v7564_v32 = vmov 0  ;;  %vm7567_vm6 = vcmp.le.s32.totalorder %v4601_v47, 6  ;;  %896 = vst [vmem:[#allocation4 + $0x50] sm:$0x3] %v892_v23 }
  0xff   : > { %vm5704_vm1 = vcmp.eq.s32.totalorder %v7560_v35, 1  ;;  %v7565_v32 = vsel %vm5711_vm11, 4294967295, %v7564_v32  ;;  %vm5719_vm12 = vmand %vm5072_vm4, %vm7567_vm6  ;;  %v1022_v11 = vsel %vm5623_vm7, %v1014_v27, 0.0  ;;  %v1031_v60 = vrot.slane %v1023_v61, 4  ;;  %894 = vst [vmem:[#allocation4 + $0x40] sm:$0x3] %v890_v18 }
 0x100   : > { %v7562_v44 = vsel %vm5704_vm1, 4294967295, %v7561_v44  ;;  %7566 = vst [vmem:[#allocation48_spill] sm:$0xff] %v7565_v32  ;;  %v7570_v5 = vunpack.i.h.bf16 %v5571_v16  ;;  %vm7571_vm5 = vcmask 72704   ;;  %v1096_v36 = vpack.c.bf16 %v1092_v30, %v1092_v30  ;;  %895 = vst [vmem:[#allocation4 + $0x48] sm:$0x3] %v891_v29  ;;  %v2112_v35 = vld [vmem:[#allocation4 + $0x30] sm:$0xff]  ;;  %v5740_v29 = vpop.permute.xlu1 %3966  ;;  %v1082_v30 = vpop.permute.xlu0 %1081 }
 0x101   : > { %v1026_v17 = vpack.c.bf16 %v1022_v11, %v1022_v11  ;;  %v1098_v51 = vpack.c.bf16 %v1094_v42, %v1094_v42  ;;  %vm7572_vm4 = vcmp.le.s32.totalorder %v4611_v50, 6  ;;  %vm7573_vm6 = vcmp.le.s32.totalorder %v4606_v48, 6  ;;  %1039 = vst [vmem:[#allocation4 + $0x40] sm:$0x30] %v1031_v60  ;;  %2188 = vmatpush1.bf16.msra.mxu1 %v2112_v35 }
 0x102   : > { %v942_v49 = vsel %vm7571_vm5, %v7570_v5, %v937_v9  ;;  %vm5736_vm5 = vmand %vm7573_vm6, %vm7572_vm4  ;;  %v1104_v18 = vrot.slane %v1096_v36, 2  ;;  %v5747_v50 = vsel %vm5719_vm12, 1, %v5503_v59  ;;  %v7200_v40 = vunpack.i.h.bf16 %v5740_v29 }
 0x103   : > { %v950_v58 = vsel %vm5634_vm9, %v942_v49, 0.0  ;;  %v1034_v48 = vrot.slane %v1026_v17, 4  ;;  %v7196_v9 = vunpack.i.l.bf16 %v5740_v29  ;;  %v1106_v27 = vrot.slane %v1098_v51, 2 }
 0x104   : > { %v954_v23 = vpack.c.bf16 %v950_v58, %v950_v58  ;;  %v7576_v3 = vrot.slane %v4908_v41, %v4657_v62  ;;  %v7577_v11 = vmov 0  ;;  %v7580_v60 = vrot.slane %v4908_v41, %v4659_v63  ;;  %1112 = vst [vmem:[#allocation4 + $0x40] sm:$0xc0] %v1104_v18 }
 0x105   : > { %v7581_v4 = vmov 0  ;;  %v7584_v49 = vunpack.i.h.bf16 %v5629_v25  ;;  %vm7585_vm12 = vcmask 56320   ;;  %vm7586_vm7 = vcmp.le.s32.totalorder %v4601_v47, 6  ;;  %1042 = vst [vmem:[#allocation4 + $0x58] sm:$0x30] %v1034_v48 }
 0x106   : > { %vm5754_vm4 = vcmp.eq.s32.totalorder %v7576_v3, 1  ;;  %vm5761_vm6 = vcmp.eq.s32.totalorder %v7580_v60, 1  ;;  %v962_v5 = vrot.slane %v954_v23, 6  ;;  %vm5776_vm14 = vmand %vm5736_vm5, %vm7586_vm7  ;;  %1114 = vst [vmem:[#allocation4 + $0x50] sm:$0xc0] %v1106_v27  ;;  %v7590_v35 = vrot.slane %v4913_v0, %v4657_v62  ;;  %v5805_v60 = vpop.permute.xlu1 %3976 }
 0x107   : > { %v7578_v11 = vsel %vm5754_vm4, 4294967295, %v7577_v11  ;;  %v7582_v4 = vsel %vm5761_vm6, 4294967295, %v7581_v4  ;;  %v1087_v55 = vsel %vm7585_vm12, %v7584_v49, %v1082_v30  ;;  %vm7589_vm12 = vcmask 1039360   ;;  %v3972_v49 = vpop.permute.xlu0 %3971 }
 0x108   : > { %7579 = vst [vmem:[#allocation49_spill] sm:$0xff] %v7578_v11  ;;  %7583 = vst [vmem:[#allocation50_spill] sm:$0xff] %v7582_v4  ;;  %v1245_v25 = vsel %vm7589_vm12, %v7196_v9, %v7200_v40  ;;  %v1095_v51 = vsel %vm5670_vm3, %v1087_v55, 0.0  ;;  %vm5790_vm2 = vcmp.eq.s32.totalorder %v7590_v35, 1  ;;  %v7591_v23 = vmov 0  ;;  %v2115_v35 = vld [vmem:[#allocation4 + $0x48] sm:$0xff] }
 0x109   : > { %v7592_v23 = vsel %vm5790_vm2, 4294967295, %v7591_v23  ;;  %v7594_v18 = vrot.slane %v4913_v0, %v4659_v63  ;;  %v7595_v30 = vmov 0  ;;  %970 = vst [vmem:[#allocation4 + $0x58] sm:$0xc] %v962_v5  ;;  %v1099_v3 = vpack.c.bf16 %v1095_v51, %v1095_v51  ;;  %2148 = vmatprep.subr.bf16.mxu0 %v2115_v35 }
 0x10a   : > { %7593 = vst [vmem:[#allocation51_spill] sm:$0xff] %v7592_v23  ;;  %v1253_v55 = vsel %vm5679_vm13, %v1245_v25, 0.0  ;;  %v3978_v48 = vunpack.i.l.bf16 %v5805_v60  ;;  %v3974_v17 = vunpack.i.h.bf16 %v3972_v49  ;;  %v3973_v36 = vunpack.i.l.bf16 %v3972_v49 }
 0x10b   : > { %vm5797_vm7 = vcmp.eq.s32.totalorder %v7594_v18, 1  ;;  %v7598_v5 = vrot.slane %v5051_v38, %v4657_v62  ;;  %v7599_v51 = vmov 0  ;;  %v5824_v25 = vsel %vm5776_vm14, 1, %v5503_v59  ;;  %v2114_v43 = vld [vmem:[#allocation4 + $0x40] sm:$0xff] }
 0x10c   : > { %v7596_v30 = vsel %vm5797_vm7, 4294967295, %v7595_v30  ;;  %v1107_v27 = vrot.slane %v1099_v3, 2  ;;  %v1257_v42 = vpack.c.bf16 %v1253_v55, %v1253_v55  ;;  %v7601_v18 = vrot.slane %v5051_v38, %v4636_v56  ;;  %2149 = vmatpush1.bf16.msra.mxu0 %v2114_v43 }
 0x10d   : > { %7597 = vst [vmem:[#allocation52_spill] sm:$0xff] %v7596_v30  ;;  %vm5817_vm3 = vcmp.eq.s32.totalorder %v7598_v5, 1  ;;  %v7602_v49 = vmov 0  ;;  %v7604_v58 = vunpack.i.h.bf16 %v5663_v14  ;;  %vm7605_vm14 = vcmask 449536  }
 0x10e   : > { %v7600_v51 = vsel %vm5817_vm3, 4294967295, %v7599_v51  ;;  %vm5829_vm12 = vcmp.eq.s32.totalorder %v7601_v18, 1  ;;  %vm7606_vm13 = vcmask 990208   ;;  %v7607_v55 = vrot.slane %v4908_v41, %v4712_v22  ;;  %1115 = vst [vmem:[#allocation4 + $0x58] sm:$0xc0] %v1107_v27 }
 0x10f   : > { %v7603_v49 = vsel %vm5829_vm12, 4294967295, %v7602_v49  ;;  %v881_v9 = vsel %vm7605_vm14, %v7604_v58, %v3978_v48  ;;  %v1318_v3 = vsel %vm7606_vm13, %v3973_v36, %v3974_v17  ;;  %v7608_v18 = vmov 0  ;;  %v3982_v58 = vpop.permute.xlu0 %3981 }
 0x110   : > { %vm5844_vm15 = vcmp.eq.s32.totalorder %v7607_v55, 1  ;;  %v7610_v5 = vrot.slane %v4913_v0, %v4712_v22  ;;  %v7611_v40 = vmov 0  ;;  %v7613_v14 = vrot.slane %v5051_v38, %v4659_v63 }
 0x111   : > { %v7609_v18 = vsel %vm5844_vm15, 4294967295, %v7608_v18  ;;  %v7614_v48 = vmov 0  ;;  %v5867_v35 = vsel %vm5736_vm5, 1, %v5503_v59  ;;  %v889_v0 = vsel %vm5704_vm1, %v881_v9, 0.0 }
 0x112   : > { %vm5851_vm0 = vcmp.eq.s32.totalorder %v7610_v5, 1  ;;  %vm5858_vm14 = vcmp.eq.s32.totalorder %v7613_v14, 1  ;;  %v3987_v5 = vpop.permute.xlu1 %3986  ;;  %v1326_v55 = vsel %vm5711_vm11, %v1318_v3, 0.0  ;;  %v1265_v14 = vrot.slane %v1257_v42, 4  ;;  %vm7616_vm11 = vmmov %vm7606_vm13 }
 0x113   : > { %v7612_v40 = vsel %vm5851_vm0, 4294967295, %v7611_v40  ;;  %v7615_v48 = vsel %vm5858_vm14, 4294967295, %v7614_v48  ;;  %v893_v31 = vpack.c.bf16 %v889_v0, %v889_v0  ;;  %v3989_v41 = vunpack.i.h.bf16 %v3987_v5  ;;  %v3992_v9 = vpop.permute.xlu0 %3991 }
 0x114   : > { %v3988_v8 = vunpack.i.l.bf16 %v3987_v5  ;;  %v3984_v28 = vunpack.i.h.bf16 %v3982_v58  ;;  %v3983_v6 = vunpack.i.l.bf16 %v3982_v58  ;;  %v1330_v27 = vpack.c.bf16 %v1326_v55, %v1326_v55  ;;  %1273 = vst [vmem:[#allocation4 + $0x68] sm:$0x30] %v1265_v14 }
 0x115   : > { %897 = vst [vmem:[#allocation4 + $0x58] sm:$0x3] %v893_v31  ;;  %v1319_v3 = vsel %vm7616_vm11, %v3974_v17, %v3989_v41  ;;  %v7617_v0 = vunpack.i.h.bf16 %v5740_v29  ;;  %vm7618_vm1 = vcmask 1039360   ;;  %v7619_v58 = vunpack.i.l.bf16 %v5740_v29 }
 0x116   : > { %v1317_v42 = vsel %vm7606_vm13, %v3988_v8, %v3973_v36  ;;  %vm7620_vm9 = vmmov %vm7618_vm1  ;;  %v5889_v14 = vpop.permute.xlu1 %3996  ;;  %v1327_v8 = vsel %vm5761_vm6, %v1319_v3, 0.0  ;;  %v1338_v36 = vrot.slane %v1330_v27, 2  ;;  %v3994_v32 = vunpack.i.h.bf16 %v3992_v9 }
 0x117   : > { %v1246_v5 = vsel %vm7618_vm1, %v7617_v0, %v3984_v28  ;;  %v1244_v55 = vsel %vm7620_vm9, %v3983_v6, %v7619_v58  ;;  %v1325_v31 = vsel %vm5754_vm4, %v1317_v42, 0.0  ;;  %v7215_v17 = vunpack.i.h.bf16 %v5889_v14  ;;  %v1242_v23 = vpop.permute.xlu0 %1241 }
 0x118   : > { %v3998_v0 = vunpack.i.l.bf16 %v5889_v14  ;;  %v3993_v43 = vunpack.i.l.bf16 %v3992_v9  ;;  %v7621_v29 = vrot.slane %v5147_v13, %v4657_v62  ;;  %v7622_v6 = vmov 0  ;;  %1346 = vst [vmem:[#allocation4 + $0x68] sm:$0xc0] %v1338_v36 }
 0x119   : > { %v7625_v42 = vrot.slane %v5147_v13, %v4636_v56  ;;  %v7626_v58 = vmov 0  ;;  %v1329_v27 = vpack.c.bf16 %v1325_v31, %v1325_v31  ;;  %v1331_v3 = vpack.c.bf16 %v1327_v8, %v1327_v8 }
 0x11a   : > { %vm5900_vm9 = vcmp.eq.s32.totalorder %v7621_v29, 1  ;;  %v1252_v9 = vsel %vm5790_vm2, %v1244_v55, 0.0  ;;  %v1254_v29 = vsel %vm5797_vm7, %v1246_v5, 0.0  ;;  %vm7629_vm13 = vcmask 7168   ;;  %v1315_v36 = vpop.permute.xlu1 %1314 }
 0x11b   : > { %v7623_v6 = vsel %vm5900_vm9, 4294967295, %v7622_v6  ;;  %vm5907_vm1 = vcmp.eq.s32.totalorder %v7625_v42, 1  ;;  %v1158_v61 = vsel %vm7629_vm13, %v3994_v32, %v7215_v17  ;;  %vm7630_vm6 = vmmov %vm7629_vm13  ;;  %v1256_v11 = vpack.c.bf16 %v1252_v9, %v1252_v9 }
 0x11c   : > { %7624 = vst [vmem:[#allocation53_spill] sm:$0xff] %v7623_v6  ;;  %v7627_v58 = vsel %vm5907_vm1, 4294967295, %v7626_v58  ;;  %v1156_v4 = vsel %vm7630_vm6, %v3998_v0, %v3993_v43  ;;  %vm7631_vm4 = vmmov %vm7630_vm6  ;;  %v7632_v31 = vrot.slane %v5051_v38, %v4712_v22  ;;  %v7633_v8 = vmov 0 }
 0x11d   : > { %7628 = vst [vmem:[#allocation54_spill] sm:$0xff] %v7627_v58  ;;  %v1157_v42 = vsel %vm7631_vm4, %v3993_v43, %v3994_v32  ;;  %v7635_v55 = vrot.slane %v5237_v21, %v4636_v56  ;;  %v7636_v5 = vmov 0  ;;  %v1337_v17 = vrot.slane %v1329_v27, 2 }
 0x11e   : > { %vm5923_vm11 = vcmp.eq.s32.totalorder %v7632_v31, 1  ;;  %v1339_v0 = vrot.slane %v1331_v3, 2  ;;  %v1258_v32 = vpack.c.bf16 %v1254_v29, %v1254_v29  ;;  %v1164_v43 = vsel %vm5817_vm3, %v1156_v4, 0.0 }
 0x11f   : > { %v7634_v8 = vsel %vm5923_vm11, 4294967295, %v7633_v8  ;;  %vm5930_vm2 = vcmp.eq.s32.totalorder %v7635_v55, 1  ;;  %vm7639_vm4 = vcmask 990208   ;;  %vm7640_vm6 = vcmask 1039360   ;;  %1345 = vst [vmem:[#allocation4 + $0x60] sm:$0xc0] %v1337_v17 }
 0x120   : > { %v7637_v5 = vsel %vm5930_vm2, 4294967295, %v7636_v5  ;;  %v1320_v38 = vsel %vm7639_vm4, %v3989_v41, %v1315_v36  ;;  %v1247_v9 = vsel %vm7640_vm6, %v3984_v28, %v1242_v23  ;;  %v1264_v31 = vrot.slane %v1256_v11, 4  ;;  %1347 = vst [vmem:[#allocation4 + $0x70] sm:$0xc0] %v1339_v0  ;;  %v2117_v41 = vld [vmem:[#allocation4 + $0x58] sm:$0xff]  ;;  %v2116_v17 = vld [vmem:[#allocation4 + $0x50] sm:$0xff] }
 0x121   : > { %7638 = vst [vmem:[#allocation55_spill] sm:$0xff] %v7637_v5  ;;  %v1165_v30 = vsel %vm5829_vm12, %v1157_v42, 0.0  ;;  %v7641_v55 = vrot.slane %v5274_v2, %v4657_v62  ;;  %v7642_v15 = vmov 0  ;;  %vm7645_vm7 = vcmp.ge.s32.totalorder %v4601_v47, 1  ;;  %2189 = vmatprep.subr.bf16.mxu1 %v2117_v41 }
 0x122   : > { %vm5951_vm3 = vmand %vm5736_vm5, %vm7645_vm7  ;;  %v1328_v28 = vsel %vm5844_vm15, %v1320_v38, 0.0  ;;  %v1255_v11 = vsel %vm5851_vm0, %v1247_v9, 0.0  ;;  %v1266_v23 = vrot.slane %v1258_v32, 4  ;;  %v1166_v27 = vsel %vm5858_vm14, %v1158_v61, 0.0  ;;  %1272 = vst [vmem:[#allocation4 + $0x60] sm:$0x30] %v1264_v31  ;;  %v5970_v61 = vpop.permute.xlu1 %4006  ;;  %v5972_v38 = vpop.permute.xlu0 %4001  ;;  %2190 = vmatpush1.bf16.msra.mxu1 %v2116_v17 }
 0x123   : > { %vm5943_vm13 = vcmp.eq.s32.totalorder %v7641_v55, 1  ;;  %v7648_v47 = vrot.slane %v5274_v2, %v4636_v56  ;;  %v7649_v16 = vmov 0  ;;  %v1332_v3 = vpack.c.bf16 %v1328_v28, %v1328_v28 }
 0x124   : > { %v7643_v15 = vsel %vm5943_vm13, 4294967295, %v7642_v15  ;;  %v1259_v29 = vpack.c.bf16 %v1255_v11, %v1255_v11  ;;  %v1168_v42 = vpack.c.bf16 %v1164_v43, %v1164_v43  ;;  %v1169_v36 = vpack.c.bf16 %v1165_v30, %v1165_v30  ;;  %1274 = vst [vmem:[#allocation4 + $0x70] sm:$0x30] %v1266_v23 }
 0x125   : > { %7644 = vst [vmem:[#allocation56_spill] sm:$0xff] %v7643_v15  ;;  %vm5964_vm5 = vcmp.eq.s32.totalorder %v7648_v47, 1  ;;  %v3884_v32 = vunpack.i.h.bf16 %v5283_v53  ;;  %v1170_v9 = vpack.c.bf16 %v1166_v27, %v1166_v27  ;;  %v5977_v31 = vsel %vm5951_vm3, 1, %v5503_v59 }
 0x126   : > { %v7650_v16 = vsel %vm5964_vm5, 4294967295, %v7649_v16  ;;  %v1340_v55 = vrot.slane %v1332_v3, 2  ;;  %v1267_v43 = vrot.slane %v1259_v29, 4  ;;  %v4009_v30 = vunpack.i.h.bf16 %v5970_v61  ;;  %1172 = vst [vmem:[#allocation4 + $0x60] sm:$0x3] %v1168_v42 }
 0x127   : > { %7651 = vst [vmem:[#allocation57_spill] sm:$0xff] %v7650_v16  ;;  %v7223_v28 = vunpack.i.l.bf16 %v5970_v61  ;;  %1173 = vst [vmem:[#allocation4 + $0x68] sm:$0x3] %v1169_v36  ;;  %v7652_v53 = vrot.slane %v5353_v37, %v4636_v56  ;;  %v7653_v11 = vmov 0  ;;  %v3854_v23 = vunpack.i.h.bf16 %v5117_v39 }
 0x128   : > { %v7226_v4 = vunpack.i.h.bf16 %v5972_v38  ;;  %v7227_v41 = vunpack.i.l.bf16 %v5972_v38  ;;  %1174 = vst [vmem:[#allocation4 + $0x70] sm:$0x3] %v1170_v9  ;;  %v7656_v27 = vrot.slane %v5237_v21, %v4657_v62  ;;  %v7657_v47 = vmov 0  ;;  %1348 = vst [vmem:[#allocation4 + $0x78] sm:$0xc0] %v1340_v55 }
 0x129   : > { %vm5984_vm4 = vcmp.eq.s32.totalorder %v7652_v53, 1  ;;  %v7660_v3 = vrot.slane %v5237_v21, %v4659_v63  ;;  %v7661_v29 = vmov 0  ;;  %1275 = vst [vmem:[#allocation4 + $0x78] sm:$0x30] %v1267_v43  ;;  %vm7664_vm7 = vcmask 596992   ;;  %v6030_v53 = vpop.permute.xlu0 %4011 }
 0x12a   : > { %v7654_v11 = vsel %vm5984_vm4, 4294967295, %v7653_v11  ;;  %vm5995_vm3 = vcmp.eq.s32.totalorder %v7656_v27, 1  ;;  %v1523_v39 = vsel %vm7664_vm7, %v4009_v30, %v3884_v32  ;;  %vm7665_vm0 = vmmov %vm7664_vm7  ;;  %v7666_v42 = vrot.slane %v5237_v21, %v4712_v22 }
 0x12b   : > { %7655 = vst [vmem:[#allocation58_spill] sm:$0xff] %v7654_v11  ;;  %v7658_v47 = vsel %vm5995_vm3, 4294967295, %v7657_v47  ;;  %vm6002_vm6 = vcmp.eq.s32.totalorder %v7660_v3, 1  ;;  %v1524_v17 = vsel %vm7665_vm0, %v3884_v32, %v7223_v28  ;;  %v7667_v36 = vmov 0  ;;  %v1154_v32 = vpop.permute.xlu1 %1153 }
 0x12c   : > { %7659 = vst [vmem:[#allocation59_spill] sm:$0xff] %v7658_v47  ;;  %v7662_v29 = vsel %vm6002_vm6, 4294967295, %v7661_v29  ;;  %vm6013_vm14 = vcmp.eq.s32.totalorder %v7666_v42, 1  ;;  %v1531_v43 = vsel %vm5900_vm9, %v1523_v39, 0.0  ;;  %v1532_v30 = vsel %vm5907_vm1, %v1524_v17, 0.0 }
 0x12d   : > { %7663 = vst [vmem:[#allocation60_spill] sm:$0xff] %v7662_v29  ;;  %v7668_v36 = vsel %vm6013_vm14, 4294967295, %v7667_v36  ;;  %vm7670_vm0 = vcmask 973824   ;;  %v1535_v3 = vpack.c.bf16 %v1531_v43, %v1531_v43  ;;  %v1536_v42 = vpack.c.bf16 %v1532_v30, %v1532_v30 }
 0x12e   : > { %7669 = vst [vmem:[#allocation61_spill] sm:$0xff] %v7668_v36  ;;  %v1451_v21 = vsel %vm7670_vm0, %v7227_v41, %v7226_v4  ;;  %v7671_v55 = vunpack.i.h.bf16 %v5889_v14  ;;  %vm7672_vm7 = vcmask 7168   ;;  %v4014_v17 = vunpack.i.h.bf16 %v6030_v53  ;;  %v2119_v14 = vld [vmem:[#allocation4 + $0x68] sm:$0xff] }
 0x12f   : > { %v7229_v0 = vunpack.i.l.bf16 %v6030_v53  ;;  %v1459_v59 = vsel %vm5930_vm2, %v1451_v21, 0.0  ;;  %v7673_v28 = vrot.slane %v5353_v37, %v4659_v63  ;;  %v7674_v43 = vmov 0  ;;  %2150 = vmatprep.subr.bf16.mxu0 %v2119_v14  ;;  %v2120_v36 = vld [vmem:[#allocation4 + $0x70] sm:$0xff] }
 0x130   : > { %v1159_v39 = vsel %vm7672_vm7, %v7671_v55, %v1154_v32  ;;  %v1543_v55 = vrot.slane %v1535_v3, 4  ;;  %v1544_v30 = vrot.slane %v1536_v42, 4  ;;  %vm7676_vm7 = vcmask 588800   ;;  %v6065_v3 = vpop.permute.xlu1 %4021  ;;  %v2118_v42 = vld [vmem:[#allocation4 + $0x60] sm:$0xff] }
 0x131   : > { %v1167_v9 = vsel %vm5923_vm11, %v1159_v39, 0.0  ;;  %vm6046_vm0 = vcmp.eq.s32.totalorder %v7673_v28, 1  ;;  %v1594_v39 = vsel %vm7676_vm7, %v4014_v17, %v3854_v23  ;;  %v7677_v27 = vrot.slane %v5353_v37, %v4657_v62  ;;  %vm7680_vm9 = vmmov %vm7676_vm7  ;;  %2151 = vmatpush1.bf16.msra.mxu0 %v2118_v42 }
 0x132   : > { %v7675_v43 = vsel %vm6046_vm0, 4294967295, %v7674_v43  ;;  %v1171_v32 = vpack.c.bf16 %v1167_v9, %v1167_v9  ;;  %v7678_v21 = vmov 0  ;;  %v1595_v28 = vsel %vm7680_vm9, %v3854_v23, %v7229_v0  ;;  %v4017_v9 = vpop.permute.xlu0 %4016  ;;  %1551 = vst [vmem:[#allocation4 + $0x80] sm:$0x30] %v1543_v55  ;;  %1552 = vst [vmem:[#allocation4 + $0x88] sm:$0x30] %v1544_v30 }
 0x133   : > { %vm6056_vm1 = vcmp.eq.s32.totalorder %v7677_v27, 1  ;;  %v1602_v4 = vsel %vm5943_vm13, %v1594_v39, 0.0  ;;  %v1463_v17 = vpack.c.bf16 %v1459_v59, %v1459_v59  ;;  %v1603_v27 = vsel %vm5964_vm5, %v1595_v28, 0.0 }
 0x134   : > { %v7679_v21 = vsel %vm6056_vm1, 4294967295, %v7678_v21  ;;  %1175 = vst [vmem:[#allocation4 + $0x78] sm:$0x3] %v1171_v32  ;;  %v1606_v58 = vpack.c.bf16 %v1602_v4, %v1602_v4  ;;  %v4024_v23 = vunpack.i.h.bf16 %v6065_v3  ;;  %v4023_v39 = vunpack.i.l.bf16 %v6065_v3 }
 0x135   : > { %v1607_v0 = vpack.c.bf16 %v1603_v27, %v1603_v27  ;;  %v4019_v6 = vunpack.i.h.bf16 %v4017_v9  ;;  %v4018_v15 = vunpack.i.l.bf16 %v4017_v9  ;;  %v1471_v59 = vrot.slane %v1463_v17, 6 }
 0x136   : > { %v7681_v41 = vrot.slane %v5274_v2, %v4659_v63  ;;  %v7682_v55 = vmov 0  ;;  %v7684_v4 = vrot.slane %v5274_v2, %v4712_v22  ;;  %v7685_v14 = vmov 0 }
 0x137   : > { %v1614_v32 = vrot.slane %v1606_v58, 2  ;;  %vm7687_vm5 = vcmask 982016   ;;  %v7688_v3 = vrot.slane %v5147_v13, %v4659_v63  ;;  %v7692_v9 = vrot.slane %v5147_v13, %v4712_v22  ;;  %v1448_v13 = vpop.permute.xlu1 %1447  ;;  %1479 = vst [vmem:[#allocation4 + $0x88] sm:$0xc] %v1471_v59 }
 0x138   : > { %vm6076_vm9 = vcmp.eq.s32.totalorder %v7681_v41, 1  ;;  %vm6083_vm7 = vcmp.eq.s32.totalorder %v7684_v4, 1  ;;  %v1390_v28 = vsel %vm7687_vm5, %v4023_v39, %v4024_v23  ;;  %v7689_v41 = vmov 0 }
 0x139   : > { %v7683_v55 = vsel %vm6076_vm9, 4294967295, %v7682_v55  ;;  %v7686_v14 = vsel %vm6083_vm7, 4294967295, %v7685_v14  ;;  %vm6092_vm13 = vcmp.eq.s32.totalorder %v7688_v3, 1  ;;  %vm6099_vm2 = vcmp.eq.s32.totalorder %v7692_v9, 1  ;;  %v6113_v9 = vpop.permute.xlu0 %4026  ;;  %1622 = vst [vmem:[#allocation4 + $0x80] sm:$0xc0] %v1614_v32 }
 0x13a   : > { %v7690_v41 = vsel %vm6092_vm13, 4294967295, %v7689_v41  ;;  %v7693_v2 = vmov 0  ;;  %v1615_v58 = vrot.slane %v1607_v0, 2  ;;  %v1398_v17 = vsel %vm5984_vm4, %v1390_v28, 0.0 }
 0x13b   : > { %7691 = vst [vmem:[#allocation62_spill] sm:$0xff] %v7690_v41  ;;  %v7694_v2 = vsel %vm6099_vm2, 4294967295, %v7693_v2  ;;  %v7696_v27 = vunpack.i.l.bf16 %v5972_v38  ;;  %vm7697_vm5 = vcmask 973824   ;;  %v7698_v3 = vunpack.i.h.bf16 %v5972_v38 }
 0x13c   : > { %7695 = vst [vmem:[#allocation63_spill] sm:$0xff] %v7694_v2  ;;  %vm7699_vm11 = vmmov %vm7697_vm5  ;;  %v1402_v16 = vpack.c.bf16 %v1398_v17, %v1398_v17  ;;  %v7241_v59 = vunpack.i.h.bf16 %v6113_v9  ;;  %v7701_v17 = vrot.slane %v5508_v19, %v4657_v62  ;;  %v7713_v11 = vrot.slane %v5566_v33, %v4636_v56 }
 0x13d   : > { %v1450_v4 = vsel %vm7697_vm5, %v4018_v15, %v7696_v27  ;;  %v1452_v30 = vsel %vm7699_vm11, %v7698_v3, %v4019_v6  ;;  %vm7700_vm15 = vmmov %vm7697_vm5  ;;  %1623 = vst [vmem:[#allocation4 + $0x88] sm:$0xc0] %v1615_v58  ;;  %vm7709_vm5 = vcmask 982016   ;;  %v7710_v3 = vrot.slane %v5566_v33, %v4657_v62 }
 0x13e   : > { %v1453_v42 = vsel %vm7700_vm15, %v4019_v6, %v1448_v13  ;;  %v1458_v0 = vsel %vm5995_vm3, %v1450_v4, 0.0  ;;  %v1460_v28 = vsel %vm6002_vm6, %v1452_v30, 0.0  ;;  %1406 = vst [vmem:[#allocation4 + $0x88] sm:$0x3] %v1402_v16  ;;  %v4028_v6 = vunpack.i.l.bf16 %v6113_v9 }
 0x13f   : > { %v1461_v15 = vsel %vm6013_vm14, %v1453_v42, 0.0  ;;  %v1462_v38 = vpack.c.bf16 %v1458_v0, %v1458_v0  ;;  %v1464_v27 = vpack.c.bf16 %v1460_v28, %v1460_v28  ;;  %vm6128_vm15 = vcmp.eq.s32.totalorder %v7701_v17, 1  ;;  %v4037_v28 = vpop.permute.xlu1 %4036  ;;  %v2121_v17 = vld [vmem:[#allocation4 + $0x78] sm:$0xff] }
 0x140   : > { %v1465_v32 = vpack.c.bf16 %v1461_v15, %v1461_v15  ;;  %v7702_v4 = vmov 0  ;;  %v7705_v30 = vrot.slane %v5508_v19, %v4636_v56  ;;  %v7706_v42 = vmov 0  ;;  %v4032_v15 = vpop.permute.xlu0 %4031  ;;  %2191 = vmatprep.subr.bf16.mxu1 %v2121_v17 }
 0x141   : > { %v7703_v4 = vsel %vm6128_vm15, 4294967295, %v7702_v4  ;;  %v1470_v58 = vrot.slane %v1462_v38, 6  ;;  %v1472_v13 = vrot.slane %v1464_v27, 6  ;;  %v1391_v0 = vsel %vm7709_vm5, %v4024_v23, %v7241_v59  ;;  %2192 = vmatpush1.bf16.msra.mxu1 %v2120_v36 }
 0x142   : > { %7704 = vst [vmem:[#allocation64_spill] sm:$0xff] %v7703_v4  ;;  %vm6135_vm11 = vcmp.eq.s32.totalorder %v7705_v30, 1  ;;  %vm6147_vm4 = vcmp.eq.s32.totalorder %v7710_v3, 1  ;;  %v7711_v30 = vmov 0  ;;  %vm6154_vm14 = vcmp.eq.s32.totalorder %v7713_v11, 1 }
 0x143   : > { %v7707_v42 = vsel %vm6135_vm11, 4294967295, %v7706_v42  ;;  %v7712_v30 = vsel %vm6147_vm4, 4294967295, %v7711_v30  ;;  %v7714_v38 = vmov 0  ;;  %v1473_v27 = vrot.slane %v1465_v32, 6  ;;  %1478 = vst [vmem:[#allocation4 + $0x80] sm:$0xc] %v1470_v58 }
 0x144   : > { %7708 = vst [vmem:[#allocation65_spill] sm:$0xff] %v7707_v42  ;;  %v7715_v38 = vsel %vm6154_vm14, 4294967295, %v7714_v38  ;;  %v1399_v16 = vsel %vm6046_vm0, %v1391_v0, 0.0  ;;  %v1389_v59 = vsel %vm7709_vm5, %v4028_v6, %v4023_v39  ;;  %v4039_v3 = vunpack.i.h.bf16 %v4037_v28  ;;  %1480 = vst [vmem:[#allocation4 + $0x90] sm:$0xc] %v1472_v13 }
 0x145   : > { %v1403_v29 = vpack.c.bf16 %v1399_v16, %v1399_v16  ;;  %v1397_v11 = vsel %vm6056_vm1, %v1389_v59, 0.0  ;;  %v4038_v47 = vunpack.i.l.bf16 %v4037_v28  ;;  %v4034_v5 = vunpack.i.h.bf16 %v4032_v15  ;;  %1481 = vst [vmem:[#allocation4 + $0x98] sm:$0xc] %v1473_v27  ;;  %v6182_v28 = vpop.permute.xlu1 %4046 }
 0x146   : > { %v7716_v32 = vrot.slane %v5353_v37, %v4712_v22  ;;  %v1401_v39 = vpack.c.bf16 %v1397_v11, %v1397_v11  ;;  %v4033_v6 = vunpack.i.l.bf16 %v4032_v15  ;;  %v3939_v59 = vunpack.i.h.bf16 %v5573_v12  ;;  %v6184_v15 = vpop.permute.xlu0 %4041 }
 0x147   : > { %1407 = vst [vmem:[#allocation4 + $0x90] sm:$0x3] %v1403_v29  ;;  %v7719_v37 = vunpack.i.l.bf16 %v6030_v53  ;;  %vm7720_vm5 = vcmask 588800   ;;  %v7722_v17 = vrot.slane %v5660_v1, %v4657_v62  ;;  %v7723_v27 = vmov 0 }
 0x148   : > { %vm6168_vm6 = vcmp.eq.s32.totalorder %v7716_v32, 1  ;;  %vm7721_vm1 = vmmov %vm7720_vm5  ;;  %1405 = vst [vmem:[#allocation4 + $0x80] sm:$0x3] %v1401_v39  ;;  %v7729_v11 = vrot.slane %v5660_v1, %v4636_v56  ;;  %v7730_v32 = vmov 0  ;;  %v7741_v36 = vmov 0 }
 0x149   : > { %v1596_v13 = vsel %vm7720_vm5, %v7719_v37, %v4038_v47  ;;  %v1597_v0 = vsel %vm7721_vm1, %v4038_v47, %v4039_v3  ;;  %vm6189_vm0 = vcmp.eq.s32.totalorder %v7722_v17, 1  ;;  %v7726_v47 = vunpack.i.l.bf16 %v5970_v61  ;;  %v2123_v61 = vld [vmem:[#allocation4 + $0x88] sm:$0xff]  ;;  %v1387_v16 = vpop.permute.xlu1 %1386 }
 0x14a   : > { %v7724_v27 = vsel %vm6189_vm0, 4294967295, %v7723_v27  ;;  %v1604_v12 = vsel %vm6076_vm9, %v1596_v13, 0.0  ;;  %v1605_v29 = vsel %vm6083_vm7, %v1597_v0, 0.0  ;;  %vm7727_vm1 = vcmask 596992   ;;  %2152 = vmatprep.subr.bf16.mxu0 %v2123_v61  ;;  %v6230_v58 = vpop.permute.xlu0 %4051 }
 0x14b   : > { %7725 = vst [vmem:[#allocation66_spill] sm:$0xff] %v7724_v27  ;;  %v1525_v53 = vsel %vm7727_vm1, %v7726_v47, %v4033_v6  ;;  %vm7728_vm5 = vmmov %vm7727_vm1  ;;  %vm6204_vm3 = vcmp.eq.s32.totalorder %v7729_v11, 1  ;;  %v1608_v39 = vpack.c.bf16 %v1604_v12, %v1604_v12  ;;  %v1609_v37 = vpack.c.bf16 %v1605_v29, %v1605_v29 }
 0x14c   : > { %v1526_v3 = vsel %vm7728_vm5, %v4033_v6, %v4034_v5  ;;  %v7731_v32 = vsel %vm6204_vm3, 4294967295, %v7730_v32  ;;  %v1533_v13 = vsel %vm6092_vm13, %v1525_v53, 0.0  ;;  %v4049_v5 = vunpack.i.h.bf16 %v6182_v28 }
 0x14d   : > { %7732 = vst [vmem:[#allocation67_spill] sm:$0xff] %v7731_v32  ;;  %v1534_v0 = vsel %vm6099_vm2, %v1526_v3, 0.0  ;;  %v1537_v17 = vpack.c.bf16 %v1533_v13, %v1533_v13  ;;  %v7733_v11 = vrot.slane %v5566_v33, %v4659_v63  ;;  %v7734_v12 = vmov 0  ;;  %v4062_v42 = vpop.permute.xlu1 %4061 }
 0x14e   : > { %v1538_v47 = vpack.c.bf16 %v1534_v0, %v1534_v0  ;;  %v7737_v29 = vrot.slane %v5566_v33, %v4712_v22  ;;  %v7738_v53 = vmov 0  ;;  %v1616_v3 = vrot.slane %v1608_v39, 2 }
 0x14f   : > { %vm6217_vm1 = vcmp.eq.s32.totalorder %v7733_v11, 1  ;;  %v1617_v13 = vrot.slane %v1609_v37, 2  ;;  %v4044_v0 = vunpack.i.h.bf16 %v6184_v15  ;;  %v4043_v61 = vunpack.i.l.bf16 %v6184_v15 }
 0x150   : > { %v7735_v12 = vsel %vm6217_vm1, 4294967295, %v7734_v12  ;;  %vm6224_vm5 = vcmp.eq.s32.totalorder %v7737_v29, 1  ;;  %v7740_v11 = vrot.slane %v5747_v50, %v4657_v62  ;;  %v1545_v33 = vrot.slane %v1537_v17, 4  ;;  %1624 = vst [vmem:[#allocation4 + $0x90] sm:$0xc0] %v1616_v3 }
 0x151   : > { %7736 = vst [vmem:[#allocation68_spill] sm:$0xff] %v7735_v12  ;;  %v7739_v53 = vsel %vm6224_vm5, 4294967295, %v7738_v53  ;;  %v1546_v29 = vrot.slane %v1538_v47, 4  ;;  %vm7744_vm2 = vcmask 523264   ;;  %v7745_v39 = vunpack.i.l.bf16 %v6182_v28  ;;  %1625 = vst [vmem:[#allocation4 + $0x98] sm:$0xc0] %v1617_v13 }
 0x152   : > { %vm6235_vm13 = vcmp.eq.s32.totalorder %v7740_v11, 1  ;;  %v1797_v6 = vsel %vm7744_vm2, %v4049_v5, %v3939_v59  ;;  %vm7746_vm9 = vmmov %vm7744_vm2  ;;  %v7747_v11 = vunpack.i.h.bf16 %v5168_v10  ;;  %vm7748_vm7 = vcmask 531456   ;;  %1553 = vst [vmem:[#allocation4 + $0x90] sm:$0x30] %v1545_v33  ;;  %v6268_v33 = vpop.permute.xlu0 %4056 }
 0x153   : > { %v7742_v36 = vsel %vm6235_vm13, 4294967295, %v7741_v36  ;;  %v1798_v37 = vsel %vm7746_vm9, %v3939_v59, %v7745_v39  ;;  %v1805_v15 = vsel %vm6128_vm15, %v1797_v6, 0.0  ;;  %vm7750_vm12 = vmmov %vm7748_vm7  ;;  %v7751_v5 = vrot.slane %v5747_v50, %v4636_v56  ;;  %1554 = vst [vmem:[#allocation4 + $0x98] sm:$0x30] %v1546_v29 }
 0x154   : > { %7743 = vst [vmem:[#allocation69_spill] sm:$0xff] %v7742_v36  ;;  %v1806_v41 = vsel %vm6135_vm11, %v1798_v37, 0.0  ;;  %v1726_v2 = vsel %vm7748_vm7, %v4044_v0, %v7747_v11  ;;  %v7749_v17 = vmov %v7747_v11  ;;  %v7752_v59 = vmov 0 }
 0x155   : > { %v1727_v47 = vsel %vm7750_vm12, %v7749_v17, %v4043_v61  ;;  %vm6256_vm2 = vcmp.eq.s32.totalorder %v7751_v5, 1  ;;  %v1809_v6 = vpack.c.bf16 %v1805_v15, %v1805_v15  ;;  %v1810_v3 = vpack.c.bf16 %v1806_v41, %v1806_v41  ;;  %v2122_v5 = vld [vmem:[#allocation4 + $0x80] sm:$0xff] }
 0x156   : > { %v7753_v59 = vsel %vm6256_vm2, 4294967295, %v7752_v59  ;;  %v1734_v13 = vsel %vm6147_vm4, %v1726_v2, 0.0  ;;  %v1735_v0 = vsel %vm6154_vm14, %v1727_v47, 0.0  ;;  %v7754_v37 = vunpack.i.h.bf16 %v6113_v9  ;;  %2153 = vmatpush1.bf16.msra.mxu0 %v2122_v5 }
 0x157   : > { %v1738_v10 = vpack.c.bf16 %v1734_v13, %v1734_v13  ;;  %v1739_v39 = vpack.c.bf16 %v1735_v0, %v1735_v0  ;;  %vm7755_vm12 = vcmask 982016   ;;  %v4054_v17 = vunpack.i.h.bf16 %v6230_v58 }
 0x158   : > { %v1392_v11 = vsel %vm7755_vm12, %v7754_v37, %v1387_v16  ;;  %v7756_v41 = vrot.slane %v5660_v1, %v4659_v63  ;;  %v7757_v2 = vmov 0  ;;  %v7760_v29 = vrot.slane %v5660_v1, %v4712_v22 }
 0x159   : > { %v7761_v9 = vmov 0  ;;  %v1817_v16 = vrot.slane %v1809_v6, 4  ;;  %v1818_v15 = vrot.slane %v1810_v3, 4  ;;  %v1400_v47 = vsel %vm6168_vm6, %v1392_v11, 0.0 }
 0x15a   : > { %vm6273_vm9 = vcmp.eq.s32.totalorder %v7756_v41, 1  ;;  %vm6280_vm7 = vcmp.eq.s32.totalorder %v7760_v29, 1  ;;  %v4053_v13 = vunpack.i.l.bf16 %v6230_v58  ;;  %v7764_v0 = vrot.slane %v5508_v19, %v4659_v63 }
 0x15b   : > { %v7758_v2 = vsel %vm6273_vm9, 4294967295, %v7757_v2  ;;  %v7762_v9 = vsel %vm6280_vm7, 4294967295, %v7761_v9  ;;  %v7765_v37 = vmov 0  ;;  %v7767_v1 = vrot.slane %v5508_v19, %v4712_v22  ;;  %1825 = vst [vmem:[#allocation4 + $0xa0] sm:$0x30] %v1817_v16 }
 0x15c   : > { %7759 = vst [vmem:[#allocation70_spill] sm:$0xff] %v7758_v2  ;;  %7763 = vst [vmem:[#allocation71_spill] sm:$0xff] %v7762_v9  ;;  %vm6290_vm12 = vcmp.eq.s32.totalorder %v7764_v0, 1  ;;  %v1746_v6 = vrot.slane %v1738_v10, 6  ;;  %v1747_v3 = vrot.slane %v1739_v39, 6  ;;  %v1404_v11 = vpack.c.bf16 %v1400_v47, %v1400_v47  ;;  %v4072_v47 = vpop.permute.xlu1 %4071 }
 0x15d   : > { %v7766_v37 = vsel %vm6290_vm12, 4294967295, %v7765_v37  ;;  %vm6297_vm11 = vcmp.eq.s32.totalorder %v7767_v1, 1  ;;  %v7770_v58 = vunpack.i.h.bf16 %v5409_v52  ;;  %vm7771_vm15 = vcmask 515072   ;;  %1826 = vst [vmem:[#allocation4 + $0xa8] sm:$0x30] %v1818_v15 }
 0x15e   : > { %vm7773_vm14 = vmmov %vm7771_vm15  ;;  %v4064_v1 = vunpack.i.h.bf16 %v4062_v42  ;;  %v4063_v4 = vunpack.i.l.bf16 %v4062_v42  ;;  %v7774_v10 = vrot.slane %v5824_v25, %v4657_v62  ;;  %v7775_v39 = vmov 0  ;;  %1754 = vst [vmem:[#allocation4 + $0xa0] sm:$0xc] %v1746_v6  ;;  %v4067_v42 = vpop.permute.xlu0 %4066 }
 0x15f   : > { %v1869_v5 = vsel %vm7771_vm15, %v4054_v17, %v7770_v58  ;;  %v7772_v29 = vmov %v7770_v58  ;;  %1755 = vst [vmem:[#allocation4 + $0xa8] sm:$0xc] %v1747_v3  ;;  %1408 = vst [vmem:[#allocation4 + $0x98] sm:$0x3] %v1404_v11  ;;  %v4059_v16 = vunpack.i.h.bf16 %v6268_v33  ;;  %v7780_v6 = vrot.slane %v5824_v25, %v4636_v56 }
 0x160   : > { %v1870_v0 = vsel %vm7773_vm14, %v7772_v29, %v4053_v13  ;;  %v1877_v19 = vsel %vm6189_vm0, %v1869_v5, 0.0  ;;  %vm6312_vm4 = vcmp.eq.s32.totalorder %v7774_v10, 1  ;;  %vm7778_vm14 = vcmask 531456  }
 0x161   : > { %v7776_v39 = vsel %vm6312_vm4, 4294967295, %v7775_v39  ;;  %v1878_v52 = vsel %vm6204_vm3, %v1870_v0, 0.0  ;;  %v1881_v17 = vpack.c.bf16 %v1877_v19, %v1877_v19  ;;  %v1728_v5 = vsel %vm7778_vm14, %v4043_v61, %v4063_v4  ;;  %vm7779_vm15 = vmmov %vm7778_vm14 }
 0x162   : > { %7777 = vst [vmem:[#allocation72_spill] sm:$0xff] %v7776_v39  ;;  %v1882_v58 = vpack.c.bf16 %v1878_v52, %v1878_v52  ;;  %v1729_v29 = vsel %vm7779_vm15, %v4063_v4, %v4064_v1  ;;  %v4074_v10 = vunpack.i.h.bf16 %v4072_v47  ;;  %vm6325_vm0 = vcmp.eq.s32.totalorder %v7780_v6, 1 }
 0x163   : > { %v7781_v3 = vmov 0  ;;  %v1889_v11 = vrot.slane %v1881_v17, 2  ;;  %v1736_v0 = vsel %vm6217_vm1, %v1728_v5, 0.0  ;;  %v1737_v19 = vsel %vm6224_vm5, %v1729_v29, 0.0 }
 0x164   : > { %v7782_v3 = vsel %vm6325_vm0, 4294967295, %v7781_v3  ;;  %v7784_v52 = vunpack.i.h.bf16 %v5115_v34  ;;  %vm7785_vm14 = vcmask 580608   ;;  %v7786_v4 = vrot.slane %v5867_v35, %v4657_v62 }
 0x165   : > { %7783 = vst [vmem:[#allocation73_spill] sm:$0xff] %v7782_v3  ;;  %v7787_v1 = vmov 0  ;;  %v1890_v6 = vrot.slane %v1882_v58, 2  ;;  %v1740_v15 = vpack.c.bf16 %v1736_v0, %v1736_v0  ;;  %v1741_v17 = vpack.c.bf16 %v1737_v19, %v1737_v19  ;;  %1897 = vst [vmem:[#allocation4 + $0xa0] sm:$0xc0] %v1889_v11  ;;  %v6359_v19 = vpop.permute.xlu0 %4076 }
 0x166   : > { %v1666_v61 = vsel %vm7785_vm14, %v4059_v16, %v7784_v52  ;;  %vm6339_vm15 = vcmp.eq.s32.totalorder %v7786_v4, 1  ;;  %v7789_v29 = vunpack.i.l.bf16 %v6268_v33  ;;  %v7790_v27 = vmov %v7784_v52  ;;  %v6350_v4 = vpop.permute.xlu1 %4081 }
 0x167   : > { %v7788_v1 = vsel %vm6339_vm15, 4294967295, %v7787_v1  ;;  %v1674_v5 = vsel %vm6235_vm13, %v1666_v61, 0.0  ;;  %v4073_v52 = vunpack.i.l.bf16 %v4072_v47  ;;  %v4069_v12 = vunpack.i.h.bf16 %v4067_v42  ;;  %1898 = vst [vmem:[#allocation4 + $0xa8] sm:$0xc0] %v1890_v6 }
 0x168   : > { %v1678_v32 = vpack.c.bf16 %v1674_v5, %v1674_v5  ;;  %v1667_v16 = vsel %vm7785_vm14, %v7790_v27, %v7789_v29  ;;  %v7791_v58 = vrot.slane %v5867_v35, %v4636_v56  ;;  %v1748_v11 = vrot.slane %v1740_v15, 6 }
 0x169   : > { %v1749_v61 = vrot.slane %v1741_v17, 6  ;;  %v1675_v34 = vsel %vm6256_vm2, %v1667_v16, 0.0  ;;  %v4068_v27 = vunpack.i.l.bf16 %v4067_v42  ;;  %v7794_v47 = vrot.slane %v5977_v31, %v4636_v56  ;;  %v2125_v16 = vld [vmem:[#allocation4 + $0x98] sm:$0xff] }
 0x16a   : > { %vm6355_vm3 = vcmp.eq.s32.totalorder %v7791_v58, 1  ;;  %v7795_v5 = vmov 0  ;;  %1682 = vst [vmem:[#allocation4 + $0xa0] sm:$0x3] %v1678_v32  ;;  %v1679_v29 = vpack.c.bf16 %v1675_v34, %v1675_v34  ;;  %vm7798_vm13 = vcmask 515072   ;;  %2193 = vmatprep.subr.bf16.mxu1 %v2125_v16 }
 0x16b   : > { %vm6366_vm14 = vcmp.eq.s32.totalorder %v7794_v47, 1  ;;  %v1871_v58 = vsel %vm7798_vm13, %v4053_v13, %v4073_v52  ;;  %vm7799_vm1 = vmmov %vm7798_vm13  ;;  %v4084_v15 = vunpack.i.h.bf16 %v6350_v4  ;;  %v7800_v6 = vrot.slane %v5747_v50, %v4659_v63  ;;  %1756 = vst [vmem:[#allocation4 + $0xb0] sm:$0xc] %v1748_v11  ;;  %v2124_v47 = vld [vmem:[#allocation4 + $0x90] sm:$0xff] }
 0x16c   : > { %v7796_v5 = vsel %vm6366_vm14, 4294967295, %v7795_v5  ;;  %v1872_v36 = vsel %vm7799_vm1, %v4073_v52, %v4074_v10  ;;  %1757 = vst [vmem:[#allocation4 + $0xb8] sm:$0xc] %v1749_v61  ;;  %v1879_v56 = vsel %vm6273_vm9, %v1871_v58, 0.0  ;;  %v7803_v13 = vunpack.i.l.bf16 %v6182_v28  ;;  %1683 = vst [vmem:[#allocation4 + $0xa8] sm:$0x3] %v1679_v29  ;;  %2194 = vmatpush1.bf16.msra.mxu1 %v2124_v47 }
 0x16d   : > { %7797 = vst [vmem:[#allocation74_spill] sm:$0xff] %v7796_v5  ;;  %vm6376_vm2 = vcmp.eq.s32.totalorder %v7800_v6, 1  ;;  %v1880_v32 = vsel %vm6280_vm7, %v1872_v36, 0.0  ;;  %vm7804_vm13 = vcmask 523264   ;;  %v7806_v52 = vrot.slane %v5747_v50, %v4712_v22 }
 0x16e   : > { %v1799_v10 = vsel %vm7804_vm13, %v7803_v13, %v4068_v27  ;;  %vm7805_vm1 = vmmov %vm7804_vm13  ;;  %v1883_v11 = vpack.c.bf16 %v1879_v56, %v1879_v56  ;;  %v1884_v61 = vpack.c.bf16 %v1880_v32, %v1880_v32  ;;  %v7277_v6 = vunpack.i.l.bf16 %v6350_v4 }
 0x16f   : > { %v1800_v17 = vsel %vm7805_vm1, %v4068_v27, %v4069_v12  ;;  %vm6391_vm5 = vcmp.eq.s32.totalorder %v7806_v52, 1  ;;  %v1807_v36 = vsel %vm6290_vm12, %v1799_v10, 0.0  ;;  %v6399_v12 = vpop.permute.xlu1 %4091  ;;  %v4087_v27 = vpop.permute.xlu0 %4086  ;;  %v7809_v13 = vunpack.i.h.bf16 %v5805_v60 }
 0x170   : > { %v1808_v28 = vsel %vm6297_vm11, %v1800_v17, 0.0  ;;  %v1811_v58 = vpack.c.bf16 %v1807_v36, %v1807_v36  ;;  %vm7810_vm13 = vcmask 449536   ;;  %v7811_v56 = vrot.slane %v5867_v35, %v4659_v63 }
 0x171   : > { %v1812_v50 = vpack.c.bf16 %v1808_v28, %v1808_v28  ;;  %v2073_v29 = vsel %vm7810_vm13, %v4084_v15, %v7809_v13  ;;  %v7814_v10 = vrot.slane %v5867_v35, %v4712_v22  ;;  %v1891_v16 = vrot.slane %v1883_v11, 2 }
 0x172   : > { %vm6408_vm1 = vcmp.eq.s32.totalorder %v7811_v56, 1  ;;  %v1892_v52 = vrot.slane %v1884_v61, 2  ;;  %v2081_v15 = vsel %vm6312_vm4, %v2073_v29, 0.0  ;;  %v4079_v36 = vunpack.i.h.bf16 %v6359_v19 }
 0x173   : > { %vm6415_vm7 = vcmp.eq.s32.totalorder %v7814_v10, 1  ;;  %v7817_v28 = vrot.slane %v5977_v31, %v4659_v63  ;;  %v7818_v47 = vmov 0  ;;  %v1819_v13 = vrot.slane %v1811_v58, 4  ;;  %1899 = vst [vmem:[#allocation4 + $0xb0] sm:$0xc0] %v1891_v16 }
 0x174   : > { %v1820_v35 = vrot.slane %v1812_v50, 4  ;;  %v7821_v56 = vunpack.i.h.bf16 %v5805_v60  ;;  %vm7822_vm9 = vcmask 449536   ;;  %v2085_v61 = vpack.c.bf16 %v2081_v15, %v2081_v15  ;;  %1900 = vst [vmem:[#allocation4 + $0xb8] sm:$0xc0] %v1892_v52 }
 0x175   : > { %vm6425_vm13 = vcmp.eq.s32.totalorder %v7817_v28, 1  ;;  %v7823_v29 = vrot.slane %v5977_v31, %v4657_v62  ;;  %v7824_v10 = vmov 0  ;;  %v7827_v28 = vrot.slane %v5977_v31, %v4712_v22  ;;  %1827 = vst [vmem:[#allocation4 + $0xb0] sm:$0x30] %v1819_v13 }
 0x176   : > { %v7819_v47 = vsel %vm6425_vm13, 4294967295, %v7818_v47  ;;  %v2074_v11 = vsel %vm7822_vm9, %v7821_v56, %v7277_v6  ;;  %v7828_v58 = vmov 0  ;;  %v4078_v50 = vunpack.i.l.bf16 %v6359_v19  ;;  %1828 = vst [vmem:[#allocation4 + $0xb8] sm:$0x30] %v1820_v35  ;;  %v4097_v6 = vpop.permute.xlu0 %4096 }
 0x177   : > { %7820 = vst [vmem:[#allocation75_spill] sm:$0xff] %v7819_v47  ;;  %vm6437_vm4 = vcmp.eq.s32.totalorder %v7823_v29, 1  ;;  %vm6444_vm12 = vcmp.eq.s32.totalorder %v7827_v28, 1  ;;  %v2082_v60 = vsel %vm6325_vm0, %v2074_v11, 0.0  ;;  %v7831_v62 = vunpack.i.h.bf16 %v5442_v20  ;;  %v4102_v29 = vpop.permute.xlu1 %4101 }
 0x178   : > { %v7825_v10 = vsel %vm6437_vm4, 4294967295, %v7824_v10  ;;  %v7829_v58 = vsel %vm6444_vm12, 4294967295, %v7828_v58  ;;  %vm7832_vm9 = vcmask 457728   ;;  %v4094_v56 = vunpack.i.h.bf16 %v6399_v12 }
 0x179   : > { %7826 = vst [vmem:[#allocation76_spill] sm:$0xff] %v7825_v10  ;;  %7830 = vst [vmem:[#allocation77_spill] sm:$0xff] %v7829_v58  ;;  %v2001_v15 = vsel %vm7832_vm9, %v4079_v36, %v7831_v62  ;;  %v2086_v31 = vpack.c.bf16 %v2082_v60, %v2082_v60  ;;  %v2093_v28 = vrot.slane %v2085_v61, 4  ;;  %v4093_v52 = vunpack.i.l.bf16 %v6399_v12  ;;  %v2127_v61 = vld [vmem:[#allocation4 + $0xa8] sm:$0xff] }
 0x17a   : > { %v2009_v16 = vsel %vm6339_vm15, %v2001_v15, 0.0  ;;  %v7833_v11 = vmov %v7831_v62  ;;  %vm7834_vm0 = vmmov %vm7832_vm9  ;;  %v4089_v39 = vunpack.i.h.bf16 %v4087_v27  ;;  %v4088_v36 = vunpack.i.l.bf16 %v4087_v27  ;;  %v2126_v62 = vld [vmem:[#allocation4 + $0xa0] sm:$0xff]  ;;  %2154 = vmatprep.subr.bf16.mxu0 %v2127_v61 }
 0x17b   : > { %v2002_v19 = vsel %vm7834_vm0, %v7833_v11, %v4078_v50  ;;  %v2013_v3 = vpack.c.bf16 %v2009_v16, %v2009_v16  ;;  %v2094_v9 = vrot.slane %v2086_v31, 4  ;;  %2101 = vst [vmem:[#allocation4 + $0xc0] sm:$0x30] %v2093_v28  ;;  %vm7835_vm9 = vcmask 465920   ;;  %2155 = vmatpush1.bf16.msra.mxu0 %v2126_v62  ;;  %v1941_v2 = vpop.permute.xlu1 %1940 }
 0x17c   : > { %v2010_v13 = vsel %vm6355_vm3, %v2002_v19, 0.0  ;;  %v1943_v35 = vsel %vm7835_vm9, %v4093_v52, %v4094_v56  ;;  %v4104_v60 = vunpack.i.h.bf16 %v4102_v29  ;;  %v7836_v11 = vunpack.i.l.bf16 %v6268_v33 }
 0x17d   : > { %v2014_v15 = vpack.c.bf16 %v2010_v13, %v2010_v13  ;;  %v2021_v12 = vrot.slane %v2013_v3, 6  ;;  %v1951_v20 = vsel %vm6366_vm14, %v1943_v35, 0.0  ;;  %vm7837_vm0 = vcmask 580608   ;;  %2102 = vst [vmem:[#allocation4 + $0xc8] sm:$0x30] %v2094_v9 }
 0x17e   : > { %v1668_v16 = vsel %vm7837_vm0, %v7836_v11, %v4088_v36  ;;  %v1955_v27 = vpack.c.bf16 %v1951_v20, %v1951_v20  ;;  %vm7838_vm15 = vmmov %vm7837_vm0  ;;  %v4103_v19 = vunpack.i.l.bf16 %v4102_v29  ;;  %v4099_v33 = vunpack.i.h.bf16 %v4097_v6 }
 0x17f   : > { %v1669_v31 = vsel %vm7838_vm15, %v4088_v36, %v4089_v39  ;;  %v1676_v28 = vsel %vm6376_vm2, %v1668_v16, 0.0  ;;  %v2022_v13 = vrot.slane %v2014_v15, 6  ;;  %2029 = vst [vmem:[#allocation4 + $0xc0] sm:$0xc] %v2021_v12  ;;  %vm7839_vm9 = vcmask 457728   ;;  %v4107_v36 = vpop.permute.xlu0 %4106 }
 0x180   : > { %v1677_v3 = vsel %vm6391_vm5, %v1669_v31, 0.0  ;;  %v1680_v35 = vpack.c.bf16 %v1676_v28, %v1676_v28  ;;  %1959 = vst [vmem:[#allocation4 + $0xc8] sm:$0x3] %v1955_v27  ;;  %v2003_v9 = vsel %vm7839_vm9, %v4078_v50, %v4103_v19  ;;  %vm7840_vm0 = vmmov %vm7839_vm9  ;;  %v4098_v39 = vunpack.i.l.bf16 %v4097_v6 }
 0x181   : > { %v1681_v11 = vpack.c.bf16 %v1677_v3, %v1677_v3  ;;  %v2004_v61 = vsel %vm7840_vm0, %v4103_v19, %v4104_v60  ;;  %2030 = vst [vmem:[#allocation4 + $0xc8] sm:$0xc] %v2022_v13  ;;  %v2011_v29 = vsel %vm6408_vm1, %v2003_v9, 0.0  ;;  %vm7841_vm15 = vcmask 465920  }
 0x182   : > { %1684 = vst [vmem:[#allocation4 + $0xb0] sm:$0x3] %v1680_v35  ;;  %v2012_v62 = vsel %vm6415_vm7, %v2004_v61, 0.0  ;;  %v1944_v15 = vsel %vm7841_vm15, %v4094_v56, %v4099_v33  ;;  %vm7842_vm14 = vmmov %vm7841_vm15  ;;  %v2015_v20 = vpack.c.bf16 %v2011_v29, %v2011_v29  ;;  %v4109_v28 = vunpack.i.h.bf16 %v4107_v36 }
 0x183   : > { %v1945_v12 = vsel %vm7842_vm14, %v4099_v33, %v1941_v2  ;;  %1685 = vst [vmem:[#allocation4 + $0xb8] sm:$0x3] %v1681_v11  ;;  %v2016_v16 = vpack.c.bf16 %v2012_v62, %v2012_v62  ;;  %v1952_v50 = vsel %vm6425_vm13, %v1944_v15, 0.0  ;;  %vm7843_vm9 = vmmov %vm7842_vm14  ;;  %v7844_v3 = vrot.slane %v5824_v25, %v4659_v63 }
 0x184   : > { %v1942_v6 = vsel %vm7843_vm9, %v4098_v39, %v4093_v52  ;;  %v1956_v60 = vpack.c.bf16 %v1952_v50, %v1952_v50  ;;  %v1953_v31 = vsel %vm6444_vm12, %v1945_v12, 0.0  ;;  %v2023_v19 = vrot.slane %v2015_v20, 6  ;;  %v2105_v50 = vld [vmem:[%s7087_s2] sm:$0xf] }
 0x185   : > { %v1950_v27 = vsel %vm6437_vm4, %v1942_v6, 0.0  ;;  %v2024_v56 = vrot.slane %v2016_v16, 6  ;;  %v1957_v2 = vpack.c.bf16 %v1953_v31, %v1953_v31  ;;  %vm6492_vm14 = vcmp.eq.s32.totalorder %v7844_v3, 1  ;;  %v4408_v16 = vld [vmem:[#allocation4 + $0xe0] sm:$0xff]  ;;  %v2142_v31 = vpop.permute.xlu0 %2141 }
 0x186   : > { %v1954_v13 = vpack.c.bf16 %v1950_v27, %v1950_v27  ;;  %1960 = vst [vmem:[#allocation4 + $0xd0] sm:$0x3] %v1956_v60  ;;  %v7845_v35 = vmov 0  ;;  %v7848_v52 = vrot.slane %v5824_v25, %v4712_v22  ;;  %v7849_v33 = vmov 0  ;;  %2031 = vst [vmem:[#allocation4 + $0xd0] sm:$0xc] %v2023_v19 }
 0x187   : > { %v7846_v35 = vsel %vm6492_vm14, 4294967295, %v7845_v35  ;;  %v4108_v11 = vunpack.i.l.bf16 %v4107_v36  ;;  %2032 = vst [vmem:[#allocation4 + $0xd8] sm:$0xc] %v2024_v56  ;;  %1961 = vst [vmem:[#allocation4 + $0xd8] sm:$0x3] %v1957_v2  ;;  %v7852_v9 = vunpack.i.l.bf16 %v6350_v4  ;;  %vm7853_vm15 = vcmask 449536  }
 0x188   : > { %7847 = vst [vmem:[#allocation78_spill] sm:$0xff] %v7846_v35  ;;  %vm6499_vm0 = vcmp.eq.s32.totalorder %v7848_v52, 1  ;;  %1958 = vst [vmem:[#allocation4 + $0xc0] sm:$0x3] %v1954_v13  ;;  %v2131_v25 = vld [vmem:[#allocation4 + $0xc8] sm:$0xff]  ;;  %vm7859_vm13 = vnez %v7311_v57 }
 0x189   : > { %v7850_v33 = vsel %vm6499_vm0, 4294967295, %v7849_v33  ;;  %v2075_v63 = vsel %vm7853_vm15, %v7852_v9, %v4108_v11  ;;  %vm7854_vm9 = vmmov %vm7853_vm15  ;;  %v2128_v29 = vld [vmem:[#allocation4 + $0xb0] sm:$0xff]  ;;  %2156 = vmatprep.subr.bf16.mxu0 %v2131_v25 }
 0x18a   : > { %7851 = vst [vmem:[#allocation79_spill] sm:$0xff] %v7850_v33  ;;  %v2076_v61 = vsel %vm7854_vm9, %v4108_v11, %v4109_v28  ;;  %v2083_v39 = vsel %vm6492_vm14, %v2075_v63, 0.0  ;;  %v2129_v15 = vld [vmem:[#allocation4 + $0xb8] sm:$0xff] }
 0x18b   : > { %v2084_v22 = vsel %vm6499_vm0, %v2076_v61, 0.0  ;;  %v2087_v62 = vpack.c.bf16 %v2083_v39, %v2083_v39  ;;  %2195 = vmatprep.subr.bf16.mxu1 %v2129_v15 }
 0x18c   : > { %v2088_v36 = vpack.c.bf16 %v2084_v22, %v2084_v22  ;;  %2196 = vmatpush1.bf16.msra.mxu1 %v2128_v29 }
 0x18d   : > { %v2095_v12 = vrot.slane %v2087_v62, 4 }
 0x18e   : > { %v2096_v20 = vrot.slane %v2088_v36, 4 }
 0x18f   : > { %2103 = vst [vmem:[#allocation4 + $0xd0] sm:$0x30] %v2095_v12  ;;  %v2130_v4 = vld [vmem:[#allocation4 + $0xc0] sm:$0xff] }
 0x190   : > { %2104 = vst [vmem:[#allocation4 + $0xd8] sm:$0x30] %v2096_v20  ;;  %2157 = vmatpush1.bf16.msra.mxu0 %v2130_v4 }
 0x191   : > { %2158 = vmatprep.subr.bf16.mxu0 %v4408_v16 }
 0x194   : > { %2159 = vmatpush1.bf16.msra.mxu0 %v4408_v16 }
 0x196   : > { %v2132_v60 = vld [vmem:[#allocation4 + $0xd0] sm:$0xff] }
 0x197   : > { %v2133_v6 = vld [vmem:[#allocation4 + $0xd8] sm:$0xff]  ;;  %2177 = vmatmul.mubr.bf16.vlgmr.msra.gmra.mrb[0].mxu0 %v2105_v50 }
 0x198   : > { %2197 = vmatprep.subr.bf16.mxu1 %v2133_v6 }
 0x199   : > { %2198 = vmatpush1.bf16.msra.mxu1 %v2132_v60 }
 0x19a   : > { %2199 = vmatprep.subr.bf16.mxu1 %v4408_v16 }
 0x19d   : > { %2200 = vmatpush1.bf16.msra.mxu1 %v4408_v16 }
 0x1a0   : > { %2218 = vmatmul.mubr.bf16.vlgmr.msra.gmra.mrb[0].mxu1 %v2105_v50 }
 0x26a   : > { %v2178_v27 = vpop.f32.mrb[0].mxu0 }
 0x26b   : > { %v2180_v28 = vpop.f32.mrb[1].mxu0  ;;  %v2179_v56 = vadd.f32 %v2178_v27, %v2142_v31 }
 0x26c   : > { %v2182_v19 = vpop.f32.mrb[2].mxu0  ;;  %v2181_v13 = vadd.f32 %v2180_v28, %v2142_v31  ;;  %v6524_v28 = vpop.permute.xlu0 %3285 }
 0x26d   : > { %v2183_v2 = vpop.f32.mrb[3].mxu0 }
 0x26e   : > { %v2226_v3 = vadd.f32 %v2181_v13, %v2179_v56 }
 0x270   : > { %v6526_v19 = vpop.permute.xlu0 %3417 }
 0x273   : > { %v2219_v52 = vpop.f32.mrb[0].mxu1 }
 0x274   : > { %v2220_v11 = vadd.f32 %v2219_v52, %v2142_v31  ;;  %v2221_v9 = vpop.f32.mrb[1].mxu1 }
 0x275   : > { %v2222_v63 = vadd.f32 %v2221_v9, %v2142_v31  ;;  %v2223_v61 = vpop.f32.mrb[2].mxu1 }
 0x276   : > { %v2227_v39 = vadd.f32 %v2226_v3, %v2220_v11  ;;  %v2224_v22 = vpop.f32.mrb[3].mxu1 }
 0x278   : > { %v2228_v25 = vadd.f32 %v2227_v39, %v2222_v63 }
 0x27a   : > { %2229 = vadd.xlane.f32.xlu1 %v2228_v25 }
 0x28b   : > { %2957 = vrot.lane.b32.xlu1 %v7485_v45, %s4434_s16 }
 0x28f   : > { %2917 = vrot.lane.b32.xlu1 %v7485_v45, %s4433_s15 }
 0x293   : > { %3049 = vrot.lane.b32.xlu1 %v7485_v45, %s4436_s23 }
 0x297   : > { %3009 = vrot.lane.b32.xlu1 %v7485_v45, %s4437_s18 }
 0x29b   : > { %3377 = vrot.lane.b32.xlu1 %v7485_v45, %s4427_s9 }
 0x307   : > { %v2230_v29 = vpop.xlane.xlu1 %2229 }
 0x308   : > { %v2232_v62 = vmul.f32 0.001953125, %v2230_v29 }
 0x30a   : > { %v2233_v36 = vsub.f32 %v2179_v56, %v2232_v62  ;;  %v2234_v15 = vsub.f32 %v2181_v13, %v2232_v62  ;;  %v2235_v12 = vsub.f32 %v2220_v11, %v2232_v62  ;;  %v2236_v20 = vsub.f32 %v2222_v63, %v2232_v62 }
 0x30c   : > { %v2237_v4 = vmul.f32 %v2233_v36, %v2233_v36  ;;  %v2238_v16 = vmul.f32 %v2234_v15, %v2234_v15  ;;  %v2239_v50 = vmul.f32 %v2235_v12, %v2235_v12  ;;  %v2240_v60 = vmul.f32 %v2236_v20, %v2236_v20 }
 0x30e   : > { %v2241_v6 = vadd.f32 %v2238_v16, %v2237_v4 }
 0x310   : > { %v2242_v27 = vadd.f32 %v2241_v6, %v2239_v50 }
 0x312   : > { %v2243_v31 = vadd.f32 %v2242_v27, %v2240_v60 }
 0x314   : > { %2244 = vadd.xlane.f32.xlu0 %v2243_v31 }
 0x3a1   : > { %v2245_v2 = vpop.xlane.xlu0 %2244 }
 0x3a2   : > { %v2246_v3 = vmul.f32 0.001953125, %v2245_v2 }
 0x3a4   : > { %v2247_v52 = vadd.f32 1e-05, %v2246_v3 }
 0x3a6   : > { %4403 = vrsqrt.f32 %v2247_v52 }
 0x3b0   : > { %v4404_v56 = vpop.eup %4403 }
 0x3b1   : > { %v2249_v13 = vmul.f32 %v4404_v56, %v2233_v36  ;;  %v2250_v11 = vmul.f32 %v4404_v56, %v2234_v15  ;;  %v2251_v9 = vmul.f32 %v4404_v56, %v2235_v12  ;;  %v2252_v63 = vmul.f32 %v4404_v56, %v2236_v20 }
 0x3b3   : > { %vm2253_vm15 = vcmp.gt.f32.partialorder %v2249_v13, 0.0  ;;  %vm2254_vm9 = vcmp.gt.f32.partialorder %v2250_v11, 0.0  ;;  %vm2255_vm14 = vcmp.gt.f32.partialorder %v2251_v9, 0.0  ;;  %vm2256_vm0 = vcmp.gt.f32.partialorder %v2252_v63, 0.0 }
 0x3b4   : > { %v2257_v61 = vmul.f32 0.01, %v2249_v13  ;;  %v2258_v39 = vmul.f32 0.01, %v2250_v11  ;;  %v2259_v22 = vmul.f32 0.01, %v2251_v9 }
 0x3b5   : > { %v2260_v25 = vmul.f32 0.01, %v2252_v63 }
 0x3b6   : > { %v2261_v29 = vsel %vm2253_vm15, %v2249_v13, %v2257_v61  ;;  %v2262_v62 = vsel %vm2254_vm9, %v2250_v11, %v2258_v39  ;;  %v2263_v4 = vsel %vm2255_vm14, %v2251_v9, %v2259_v22  ;;  %v6598_v11 = vpop.permute.xlu1 %2957  ;;  %vm7855_vm14 = vcmask 588800  }
 0x3b7   : > { %v6528_v16 = vsel %vm2256_vm0, %v2252_v63, %v2260_v25  ;;  %v4116_v50 = vpack.i.bf16 %v2263_v4, %v7485_v45  ;;  %v4111_v6 = vpack.i.bf16 %v2262_v62, %v2261_v29  ;;  %v6531_v36 = vpack.i.bf16 %v2263_v4, %v2262_v62  ;;  %vm7856_vm0 = vmmov %vm7855_vm14 }
 0x3b8   : > { %v6533_v15 = vpack.i.bf16 %v2261_v29, %v2263_v4  ;;  %v2880_v12 = vpack.c.bf16 %v2262_v62, %v2262_v62  ;;  %v2879_v20 = vpack.c.bf16 %v2261_v29, %v2261_v29  ;;  %v2882_v60 = vpack.c.bf16 %v6528_v16, %v6528_v16  ;;  %vm7857_vm15 = vmmov %vm7856_vm0 }
 0x3b9   : > { %4117 = vrot.lane.b32.xlu0 %v4116_v50, %s4422_s28  ;;  %4112 = vrot.lane.b32.xlu1 %v4111_v6, %s4422_s28  ;;  %v2881_v27 = vpack.c.bf16 %v2263_v4, %v2263_v4  ;;  %v4131_v31 = vpack.i.bf16 %v2262_v62, %v6528_v16  ;;  %v6585_v13 = vpack.i.bf16 %v6528_v16, %v2261_v29 }
 0x3ba   : > { %v2888_v2 = vrot.slane %v2880_v12, 4  ;;  %v2887_v3 = vrot.slane %v2879_v20, 4  ;;  %v2890_v52 = vrot.slane %v2882_v60, 4  ;;  %v4316_v9 = vpack.i.bf16 %v7485_v45, %v6528_v16  ;;  %v6606_v63 = vpop.permute.xlu1 %2917 }
 0x3bb   : > { %v2889_v56 = vrot.slane %v2881_v27, 4  ;;  %vm7858_vm9 = vnez %v7313_v54 }
 0x3bc   : > { %2896 = vst [vmem:[#allocation5 + $0xc8] sm:$0xf0] %v2888_v2  ;;  %2895 = vst [vmem:[#allocation5 + $0xc0] sm:$0xf0] %v2887_v3 }
 0x3bd   : > { %4132 = vrot.lane.b32.xlu0 %v4131_v31, %s4422_s28  ;;  %4122 = vrot.lane.b32.xlu1 %v4111_v6, %s4424_s30  ;;  %2898 = vst [vmem:[#allocation5 + $0xd8] sm:$0xf0] %v2890_v52  ;;  %2897 = vst [vmem:[#allocation5 + $0xd0] sm:$0xf0] %v2889_v56 }
 0x3be   : > { %v6614_v61 = vpop.permute.xlu1 %3049 }
 0x3c1   : > { %4142 = vrot.lane.b32.xlu0 %v4131_v31, %s4424_s30  ;;  %4127 = vrot.lane.b32.xlu1 %v4116_v50, %s4424_s30 }
 0x3c2   : > { %v6619_v39 = vpop.permute.xlu1 %3009 }
 0x3c5   : > { %4152 = vrot.lane.b32.xlu0 %v4111_v6, %s4423_s29  ;;  %4137 = vrot.lane.b32.xlu1 %v4111_v6, %s4421_s27 }
 0x3c6   : > { %v6628_v22 = vpop.permute.xlu1 %3377 }
 0x3c9   : > { %4162 = vrot.lane.b32.xlu0 %v4131_v31, %s4421_s27  ;;  %4147 = vrot.lane.b32.xlu1 %v4116_v50, %s4421_s27 }
 0x3cd   : > { %4172 = vrot.lane.b32.xlu0 %v4131_v31, %s4423_s29  ;;  %4157 = vrot.lane.b32.xlu1 %v4116_v50, %s4423_s29 }
 0x3d1   : > { %4182 = vrot.lane.b32.xlu0 %v4111_v6, %s4428_s10  ;;  %4167 = vrot.lane.b32.xlu1 %v4111_v6, %s4425_s7 }
 0x3d5   : > { %4192 = vrot.lane.b32.xlu0 %v4131_v31, %s4425_s7  ;;  %4177 = vrot.lane.b32.xlu1 %v4116_v50, %s4425_s7 }
 0x3d9   : > { %2485 = vrot.lane.b32.xlu0 %v6528_v16, %s4428_s10  ;;  %4187 = vrot.lane.b32.xlu1 %v4116_v50, %s4428_s10 }
 0x3dd   : > { %4207 = vrot.lane.b32.xlu0 %v4111_v6, %s4427_s9  ;;  %4197 = vrot.lane.b32.xlu1 %v4111_v6, %s4426_s8 }
 0x3e1   : > { %2617 = vrot.lane.b32.xlu0 %v6528_v16, %s4426_s8  ;;  %4202 = vrot.lane.b32.xlu1 %v4116_v50, %s4426_s8 }
 0x3e5   : > { %2577 = vrot.lane.b32.xlu0 %v6528_v16, %s4427_s9  ;;  %4212 = vrot.lane.b32.xlu1 %v4116_v50, %s4427_s9 }
 0x3e9   : > { %4227 = vrot.lane.b32.xlu0 %v4111_v6, %s4432_s14  ;;  %4217 = vrot.lane.b32.xlu1 %v4111_v6, %s4429_s11 }
 0x3ed   : > { %2709 = vrot.lane.b32.xlu0 %v6528_v16, %s4429_s11  ;;  %4222 = vrot.lane.b32.xlu1 %v4116_v50, %s4429_s11 }
 0x3f1   : > { %2669 = vrot.lane.b32.xlu0 %v6528_v16, %s4432_s14  ;;  %4232 = vrot.lane.b32.xlu1 %v4116_v50, %s4432_s14 }
 0x3f5   : > { %4247 = vrot.lane.b32.xlu0 %v4111_v6, %s4431_s13  ;;  %4237 = vrot.lane.b32.xlu1 %v4111_v6, %s4430_s12 }
 0x3f9   : > { %2801 = vrot.lane.b32.xlu0 %v6528_v16, %s4430_s12  ;;  %4242 = vrot.lane.b32.xlu1 %v4116_v50, %s4430_s12 }
 0x3fd   : > { %4257 = vrot.lane.b32.xlu0 %v4111_v6, %s4435_s17  ;;  %4252 = vrot.lane.b32.xlu1 %v4116_v50, %s4431_s13 }
 0x401   : > { %4267 = vrot.lane.b32.xlu0 %v6531_v36, %s4434_s16  ;;  %2761 = vrot.lane.b32.xlu1 %v6528_v16, %s4431_s13 }
 0x405   : > { %4272 = vrot.lane.b32.xlu0 %v6585_v13, %s4434_s16  ;;  %4262 = vrot.lane.b32.xlu1 %v4116_v50, %s4435_s17 }
 0x409   : > { %4282 = vrot.lane.b32.xlu0 %v6585_v13, %s4433_s15  ;;  %2853 = vrot.lane.b32.xlu1 %v6528_v16, %s4435_s17 }
 0x40d   : > { %4287 = vrot.lane.b32.xlu0 %v6531_v36, %s4436_s23  ;;  %4277 = vrot.lane.b32.xlu1 %v6531_v36, %s4433_s15 }
 0x411   : > { %4292 = vrot.lane.b32.xlu0 %v6585_v13, %s4436_s23  ;;  %4297 = vrot.lane.b32.xlu1 %v6531_v36, %s4437_s18 }
 0x415   : > { %4302 = vrot.lane.b32.xlu0 %v6585_v13, %s4437_s18  ;;  %4317 = vrot.lane.b32.xlu1 %v4316_v9, %s4422_s28 }
 0x419   : > { %4307 = vrot.lane.b32.xlu0 %v6533_v15, %s4422_s28  ;;  %4327 = vrot.lane.b32.xlu1 %v4316_v9, %s4424_s30 }
 0x41d   : > { %4312 = vrot.lane.b32.xlu0 %v6533_v15, %s4424_s30  ;;  %4337 = vrot.lane.b32.xlu1 %v4316_v9, %s4421_s27 }
 0x421   : > { %4322 = vrot.lane.b32.xlu0 %v6533_v15, %s4421_s27  ;;  %4347 = vrot.lane.b32.xlu1 %v4316_v9, %s4423_s29 }
 0x425   : > { %4332 = vrot.lane.b32.xlu0 %v6533_v15, %s4423_s29  ;;  %4357 = vrot.lane.b32.xlu1 %v6585_v13, %s4428_s10 }
 0x429   : > { %4342 = vrot.lane.b32.xlu0 %v6533_v15, %s4425_s7  ;;  %4367 = vrot.lane.b32.xlu1 %v6531_v36, %s4426_s8 }
 0x42b   : > { %v4118_v25 = vpop.permute.xlu0 %4117  ;;  %v4113_v29 = vpop.permute.xlu1 %4112 }
 0x42c   : > { %v4120_v62 = vunpack.i.h.bf16 %v4118_v25  ;;  %v4119_v4 = vunpack.i.l.bf16 %v4118_v25  ;;  %v4115_v16 = vunpack.i.h.bf16 %v4113_v29  ;;  %v4114_v50 = vunpack.i.l.bf16 %v4113_v29 }
 0x42d   : > { %4352 = vrot.lane.b32.xlu0 %v6531_v36, %s4428_s10  ;;  %4372 = vrot.lane.b32.xlu1 %v6585_v13, %s4426_s8  ;;  %s8125_s8 = sshll.u32 %s8127_s22, 4 }
 0x42e   : > { %v2345_v6 = vsel %vm7855_vm14, %v4115_v16, %v4120_v62  ;;  %v2343_v12 = vsel %vm7856_vm0, %v4119_v4, %v4114_v50  ;;  %v2344_v15 = vsel %vm7857_vm15, %v4114_v50, %v4115_v16  ;;  %s251_s11 = scalar_lea.vmem %s7091_s6, %s8125_s8 }
 0x42f   : > { %v2353_v20 = vsel %vm4864_vm8, %v2345_v6, 0.0  ;;  %v2351_v60 = vsel %vm7858_vm9, %v2343_v12, 0.0  ;;  %v2352_v27 = vsel %vm7859_vm13, %v2344_v15, 0.0  ;;  %v6647_v31 = vpop.permute.xlu0 %4132  ;;  %v4123_v2 = vpop.permute.xlu1 %4122  ;;  %vm7860_vm8 = vmmov %vm7856_vm0  ;;  %vm7861_vm13 = vcmask 596992   ;;  %v7862_v15 = vld [vmem:[#allocation16_spill] sm:$0xff] }
 0x430   : > { %v2357_v3 = vpack.c.bf16 %v2353_v20, %v2353_v20  ;;  %v2355_v52 = vpack.c.bf16 %v2351_v60, %v2351_v60  ;;  %v2356_v56 = vpack.c.bf16 %v2352_v27, %v2352_v27  ;;  %v4134_v25 = vunpack.i.l.bf16 %v6647_v31  ;;  %vm7866_vm15 = vmmov %vm7861_vm13 }
 0x431   : > { %v4125_v29 = vunpack.i.h.bf16 %v4123_v2  ;;  %v4124_v4 = vunpack.i.l.bf16 %v4123_v2  ;;  %4362 = vrot.lane.b32.xlu0 %v4316_v9, %s4425_s7  ;;  %4382 = vrot.lane.b32.xlu1 %v6585_v13, %s4427_s9  ;;  %vm7863_vm14 = vnez %v7862_v15  ;;  %v7864_v9 = vld [vmem:[#allocation14_spill] sm:$0xff]  ;;  %vm7867_vm9 = vmmov %vm7861_vm13 }
 0x432   : > { %v2365_v54 = vrot.slane %v2357_v3, 4  ;;  %v2363_v46 = vrot.slane %v2355_v52, 4  ;;  %v2364_v16 = vrot.slane %v2356_v56, 4  ;;  %v2346_v57 = vsel %vm7860_vm8, %v4120_v62, %v4134_v25  ;;  %vm7868_vm8 = vmmov %vm7867_vm9 }
 0x433   : > { %v2304_v50 = vsel %vm7861_vm13, %v4124_v4, %v4125_v29  ;;  %v6655_v6 = vpop.permute.xlu0 %4142  ;;  %v4128_v12 = vpop.permute.xlu1 %4127  ;;  %v2354_v20 = vsel %vm7863_vm14, %v2346_v57, 0.0  ;;  %vm7865_vm0 = vnez %v7864_v9  ;;  %v7873_v9 = vld [vmem:[#allocation12_spill] sm:$0xff] }
 0x434   : > { %2373 = vst [vmem:[#allocation5 + $0x10] sm:$0xf0] %v2365_v54  ;;  %2371 = vst [vmem:[#allocation5] sm:$0xf0] %v2363_v46  ;;  %v2312_v60 = vsel %vm7865_vm0, %v2304_v50, 0.0  ;;  %v4144_v27 = vunpack.i.l.bf16 %v6655_v6  ;;  %v2358_v2 = vpack.c.bf16 %v2354_v20, %v2354_v20  ;;  %v4130_v52 = vunpack.i.h.bf16 %v4128_v12  ;;  %v7869_v50 = vld [vmem:[#allocation23_spill] sm:$0xff] }
 0x435   : > { %2372 = vst [vmem:[#allocation5 + $0x8] sm:$0xf0] %v2364_v16  ;;  %v2316_v3 = vpack.c.bf16 %v2312_v60, %v2312_v60  ;;  %v4129_v62 = vunpack.i.l.bf16 %v4128_v12  ;;  %4377 = vrot.lane.b32.xlu0 %v6531_v36, %s4427_s9  ;;  %4392 = vrot.lane.b32.xlu1 %v6585_v13, %s4432_s14  ;;  %vm7870_vm13 = vnez %v7869_v50  ;;  %v7871_v12 = vld [vmem:[#allocation13_spill] sm:$0xff]  ;;  %vm7874_vm0 = vnez %v7873_v9 }
 0x436   : > { %v2366_v56 = vrot.slane %v2358_v2, 4  ;;  %v2306_v25 = vsel %vm7866_vm15, %v4130_v52, %v4144_v27  ;;  %v2305_v46 = vsel %vm7868_vm8, %v4125_v29, %v4130_v52  ;;  %vm7872_vm14 = vnez %v7871_v12 }
 0x437   : > { %2320 = vst [vmem:[#allocation5 + $0x8] sm:$0xf] %v2316_v3  ;;  %v2303_v54 = vsel %vm7867_vm9, %v4129_v62, %v4124_v4  ;;  %v4153_v16 = vpop.permute.xlu0 %4152  ;;  %v4138_v57 = vpop.permute.xlu1 %4137  ;;  %v2314_v15 = vsel %vm7870_vm13, %v2306_v25, 0.0  ;;  %v2313_v60 = vsel %vm7874_vm0, %v2305_v46, 0.0  ;;  %vm7875_vm15 = vcmask 580608  }
 0x438   : > { %v2311_v20 = vsel %vm7872_vm14, %v2303_v54, 0.0  ;;  %v4155_v13 = vunpack.i.h.bf16 %v4153_v16  ;;  %2374 = vst [vmem:[#allocation5 + $0x18] sm:$0xf0] %v2366_v56  ;;  %v2318_v2 = vpack.c.bf16 %v2314_v15, %v2314_v15  ;;  %v2317_v27 = vpack.c.bf16 %v2313_v60, %v2313_v60  ;;  %v7876_v54 = vld [vmem:[#allocation7_spill] sm:$0xff]  ;;  %v7879_v15 = vld [vmem:[#allocation6_spill] sm:$0xff] }
 0x439   : > { %v2315_v3 = vpack.c.bf16 %v2311_v20, %v2311_v20  ;;  %v4154_v35 = vunpack.i.l.bf16 %v4153_v16  ;;  %4387 = vrot.lane.b32.xlu0 %v6531_v36, %s4432_s14  ;;  %v4140_v29 = vunpack.i.h.bf16 %v4138_v57  ;;  %v4139_v4 = vunpack.i.l.bf16 %v4138_v57 }
 0x43a   : > { %2322 = vst [vmem:[#allocation5 + $0x18] sm:$0xf] %v2318_v2  ;;  %2321 = vst [vmem:[#allocation5 + $0x10] sm:$0xf] %v2317_v27  ;;  %vm7877_vm9 = vnez %v7876_v54  ;;  %vm7878_vm8 = vcmask 531456   ;;  %vm7880_vm13 = vnez %v7879_v15  ;;  %v7888_v15 = vld [vmem:[#allocation8_spill] sm:$0xff] }
 0x43b   : > { %2319 = vst [vmem:[#allocation5] sm:$0xf] %v2315_v3  ;;  %v2396_v52 = vsel %vm7875_vm15, %v4154_v35, %v4155_v13  ;;  %v6678_v62 = vpop.permute.xlu0 %4162  ;;  %v4148_v25 = vpop.permute.xlu1 %4147  ;;  %v2436_v46 = vsel %vm7878_vm8, %v4139_v4, %v4140_v29  ;;  %vm7881_vm14 = vmmov %vm7878_vm8 }
 0x43c   : > { %v2404_v56 = vsel %vm7877_vm9, %v2396_v52, 0.0  ;;  %v4164_v16 = vunpack.i.l.bf16 %v6678_v62  ;;  %v2444_v36 = vsel %vm7880_vm13, %v2436_v46, 0.0  ;;  %v4150_v57 = vunpack.i.h.bf16 %v4148_v25  ;;  %vm7882_vm0 = vmmov %vm7878_vm8  ;;  %v7886_v46 = vld [vmem:[#allocation9_spill] sm:$0xff] }
 0x43d   : > { %v2408_v50 = vpack.c.bf16 %v2404_v56, %v2404_v56  ;;  %v4149_v12 = vunpack.i.l.bf16 %v4148_v25  ;;  %3469 = vrot.lane.b32.xlu0 %v7485_v45, %s4432_s14  ;;  %v2448_v20 = vpack.c.bf16 %v2444_v36, %v2444_v36  ;;  %vm7883_vm15 = vmmov %vm7882_vm0  ;;  %v7884_v56 = vld [vmem:[#allocation18_spill] sm:$0xff]  ;;  %vm7887_vm8 = vnez %v7886_v46 }
 0x43e   : > { %v3493_v9 = vld [vmem:[#allocation5 + $0x8] sm:$0xff]  ;;  %v2438_v60 = vsel %vm7881_vm14, %v4150_v57, %v4164_v16  ;;  %v2437_v3 = vsel %vm7883_vm15, %v4140_v29, %v4150_v57  ;;  %vm7885_vm9 = vnez %v7884_v56  ;;  %vm7889_vm13 = vnez %v7888_v15 }
 0x43f   : > { %2412 = vst [vmem:[#allocation5 + $0x28] sm:$0xf] %v2408_v50  ;;  %v2435_v2 = vsel %vm7882_vm0, %v4149_v12, %v4139_v4  ;;  %3573 = vmatprep.subr.bf16.mxu0 %v3493_v9  ;;  %v6691_v27 = vpop.permute.xlu0 %4172  ;;  %v4158_v52 = vpop.permute.xlu1 %4157  ;;  %v2456_v54 = vrot.slane %v2448_v20, 4  ;;  %v2446_v25 = vsel %vm7885_vm9, %v2438_v60, 0.0  ;;  %v2445_v50 = vsel %vm7889_vm13, %v2437_v3, 0.0  ;;  %v7895_v15 = vld [vmem:[#allocation15_spill] sm:$0xff] }
 0x440   : > { %v2443_v45 = vsel %vm7887_vm8, %v2435_v2, 0.0  ;;  %v2450_v36 = vpack.c.bf16 %v2446_v25, %v2446_v25  ;;  %v2449_v33 = vpack.c.bf16 %v2445_v50, %v2445_v50  ;;  %v4174_v29 = vunpack.i.l.bf16 %v6691_v27 }
 0x441   : > { %v2447_v16 = vpack.c.bf16 %v2443_v45, %v2443_v45  ;;  %2464 = vst [vmem:[#allocation5 + $0x28] sm:$0xf0] %v2456_v54  ;;  %v4160_v4 = vunpack.i.h.bf16 %v4158_v52  ;;  %v4159_v57 = vunpack.i.l.bf16 %v4158_v52  ;;  %v3495_v9 = vld [vmem:[#allocation5 + $0x18] sm:$0xff]  ;;  %v3494_v20 = vld [vmem:[#allocation5 + $0x10] sm:$0xff]  ;;  %vm7890_vm14 = vcmask 580608   ;;  %v7893_v52 = vld [vmem:[#allocation11_spill] sm:$0xff] }
 0x442   : > { %v3492_v12 = vld [vmem:[#allocation5] sm:$0xff]  ;;  %v2458_v5 = vrot.slane %v2450_v36, 4  ;;  %v2457_v60 = vrot.slane %v2449_v33, 4  ;;  %3614 = vmatprep.subr.bf16.mxu1 %v3495_v9  ;;  %vm7891_vm0 = vmmov %vm7890_vm14  ;;  %vm7894_vm9 = vnez %v7893_v52  ;;  %vm7896_vm8 = vnez %v7895_v15  ;;  %v7903_v15 = vld [vmem:[#allocation17_spill] sm:$0xff] }
 0x443   : > { %v2455_v56 = vrot.slane %v2447_v16, 4  ;;  %3574 = vmatpush1.bf16.msra.mxu0 %v3492_v12  ;;  %v6700_v2 = vpop.permute.xlu0 %4182  ;;  %v4168_v46 = vpop.permute.xlu1 %4167  ;;  %v2397_v3 = vsel %vm7890_vm14, %v4155_v13, %v4160_v4  ;;  %v2398_v25 = vsel %vm7891_vm0, %v4160_v4, %v4174_v29  ;;  %vm7892_vm15 = vmmov %vm7891_vm0  ;;  %3615 = vmatpush1.bf16.msra.mxu1 %v3494_v20  ;;  %v7897_v36 = vld [vmem:[#allocation10_spill] sm:$0xff]  ;;  %vm7899_vm14 = vcmask 523264  }
 0x444   : > { %v2395_v54 = vsel %vm7892_vm15, %v4159_v57, %v4154_v35  ;;  %v4185_v45 = vunpack.i.h.bf16 %v6700_v2  ;;  %2466 = vst [vmem:[#allocation5 + $0x38] sm:$0xf0] %v2458_v5  ;;  %2465 = vst [vmem:[#allocation5 + $0x30] sm:$0xf0] %v2457_v60  ;;  %v2405_v33 = vsel %vm7894_vm9, %v2397_v3, 0.0  ;;  %v2406_v50 = vsel %vm7896_vm8, %v2398_v25, 0.0 }
 0x445   : > { %2463 = vst [vmem:[#allocation5 + $0x20] sm:$0xf0] %v2455_v56  ;;  %vm7898_vm13 = vnez %v7897_v36  ;;  %v4184_v13 = vunpack.i.l.bf16 %v6700_v2  ;;  %v2409_v29 = vpack.c.bf16 %v2405_v33, %v2405_v33  ;;  %v2410_v4 = vpack.c.bf16 %v2406_v50, %v2406_v50  ;;  %v7900_v56 = vld [vmem:[#allocation29_spill] sm:$0xff] }
 0x446   : > { %v2403_v16 = vsel %vm7898_vm13, %v2395_v54, 0.0  ;;  %v4170_v57 = vunpack.i.h.bf16 %v4168_v46  ;;  %v4169_v5 = vunpack.i.l.bf16 %v4168_v46  ;;  %vm7901_vm0 = vnez %v7900_v56 }
 0x447   : > { %v2407_v35 = vpack.c.bf16 %v2403_v16, %v2403_v16  ;;  %v2488_v12 = vsel %vm7899_vm14, %v4184_v13, %v4185_v45  ;;  %v6714_v9 = vpop.permute.xlu0 %4192  ;;  %v4178_v20 = vpop.permute.xlu1 %4177  ;;  %2413 = vst [vmem:[#allocation5 + $0x30] sm:$0xf] %v2409_v29  ;;  %2414 = vst [vmem:[#allocation5 + $0x38] sm:$0xf] %v2410_v4  ;;  %vm7902_vm15 = vcmask 515072   ;;  %vm7904_vm9 = vnez %v7903_v15  ;;  %v7907_v4 = vld [vmem:[#allocation32_spill] sm:$0xff] }
 0x448   : > { %v2496_v60 = vsel %vm7901_vm0, %v2488_v12, 0.0  ;;  %v4194_v3 = vunpack.i.l.bf16 %v6714_v9  ;;  %v4180_v25 = vunpack.i.h.bf16 %v4178_v20  ;;  %v2528_v54 = vsel %vm7902_vm15, %v4169_v5, %v4170_v57  ;;  %v3497_v33 = vld [vmem:[#allocation5 + $0x28] sm:$0xff]  ;;  %vm7905_vm8 = vmmov %vm7902_vm15  ;;  %v7912_v15 = vld [vmem:[#allocation21_spill] sm:$0xff] }
 0x449   : > { %2411 = vst [vmem:[#allocation5 + $0x20] sm:$0xf] %v2407_v35  ;;  %v2500_v2 = vpack.c.bf16 %v2496_v60, %v2496_v60  ;;  %v4179_v52 = vunpack.i.l.bf16 %v4178_v20  ;;  %v2536_v46 = vsel %vm7904_vm9, %v2528_v54, 0.0  ;;  %vm7906_vm13 = vmmov %vm7905_vm8  ;;  %3575 = vmatprep.subr.bf16.mxu0 %v3497_v33  ;;  %vm7908_vm14 = vnez %v7907_v4  ;;  %v7910_v20 = vld [vmem:[#allocation22_spill] sm:$0xff] }
 0x44a   : > { %v2530_v50 = vsel %vm7905_vm8, %v4180_v25, %v4194_v3  ;;  %v2529_v36 = vsel %vm7906_vm13, %v4170_v57, %v4180_v25  ;;  %v3778_v16 = vld.sshfl [vmem:[%s7089_s4] sm:$0x33 pattern:$0x76325410]  ;;  %v2540_v29 = vpack.c.bf16 %v2536_v46, %v2536_v46  ;;  %vm7909_vm0 = vmmov %vm7905_vm8  ;;  %vm7911_vm15 = vnez %v7910_v20  ;;  %v7918_v20 = vld [vmem:[#allocation37_spill] sm:$0xff] }
 0x44b   : > { %2504 = vst [vmem:[#allocation5 + $0x48] sm:$0xf] %v2500_v2  ;;  %v2538_v35 = vsel %vm7908_vm14, %v2530_v50, 0.0  ;;  %v2527_v12 = vsel %vm7909_vm0, %v4179_v52, %v4169_v5  ;;  %v2537_v56 = vsel %vm7911_vm15, %v2529_v36, 0.0  ;;  %v2486_v60 = vpop.permute.xlu0 %2485  ;;  %v4188_v54 = vpop.permute.xlu1 %4187  ;;  %vm7913_vm9 = vnez %v7912_v15  ;;  %v3556_v52 = vld [vmem:[%s7090_s5] sm:$0xf] }
 0x44c   : > { %v2542_v3 = vpack.c.bf16 %v2538_v35, %v2538_v35  ;;  %v2535_v57 = vsel %vm7913_vm9, %v2527_v12, 0.0  ;;  %v2541_v25 = vpack.c.bf16 %v2537_v56, %v2537_v56  ;;  %v4190_v33 = vunpack.i.h.bf16 %v4188_v54  ;;  %v7916_v35 = vld [vmem:[#allocation30_spill] sm:$0xff]  ;;  %v7921_v15 = vld [vmem:[#allocation28_spill] sm:$0xff]  ;;  %3559 = vperm.xlu1 %4396, %v3556_v52  }
 0x44d   : > { %v2548_v47 = vrot.slane %v2540_v29, 4  ;;  %v2539_v10 = vpack.c.bf16 %v2535_v57, %v2535_v57  ;;  %v4189_v2 = vunpack.i.l.bf16 %v4188_v54  ;;  %v3570_v46 = vcombine.high %v3778_v16, %v3778_v16 }
 0x44e   : > { %v2550_v58 = vrot.slane %v2542_v3, 4  ;;  %v2549_v4 = vrot.slane %v2541_v25, 4  ;;  %vm7914_vm8 = vcmask 523264   ;;  %vm7917_vm14 = vnez %v7916_v35  ;;  %v3499_v54 = vld [vmem:[#allocation5 + $0x38] sm:$0xff]  ;;  %v7925_v35 = vld [vmem:[#allocation20_spill] sm:$0xff] }
 0x44f   : > { %v2489_v50 = vsel %vm7914_vm8, %v4185_v45, %v4190_v33  ;;  %vm7915_vm13 = vmmov %vm7914_vm8  ;;  %2556 = vst [vmem:[#allocation5 + $0x48] sm:$0xf0] %v2548_v47  ;;  %v2547_v36 = vrot.slane %v2539_v10, 4  ;;  %vm7919_vm0 = vnez %v7918_v20  ;;  %v6744_v3 = vpop.permute.xlu0 %4207  ;;  %v4198_v45 = vpop.permute.xlu1 %4197  ;;  %3605 = vmatprep.mubr.bf16.mxu0 %v3570_v46  ;;  %3646 = vmatprep.mubr.bf16.mxu1 %v3570_v46  ;;  %vm7922_vm9 = vnez %v7921_v15 }
 0x450   : > { %v2490_v5 = vsel %vm7915_vm13, %v4190_v33, %v2486_v60  ;;  %v2497_v12 = vsel %vm7917_vm14, %v2489_v50, 0.0  ;;  %vm7920_vm15 = vmmov %vm7914_vm8  ;;  %v3496_v56 = vld [vmem:[#allocation5 + $0x20] sm:$0xff]  ;;  %v3498_v60 = vld [vmem:[#allocation5 + $0x30] sm:$0xff]  ;;  %2558 = vst [vmem:[#allocation5 + $0x58] sm:$0xf0] %v2550_v58  ;;  %3616 = vmatprep.subr.bf16.mxu1 %v3499_v54  ;;  %v4210_v25 = vunpack.i.h.bf16 %v6744_v3  ;;  %v4209_v33 = vunpack.i.l.bf16 %v6744_v3 }
 0x451   : > { %v2498_v29 = vsel %vm7919_vm0, %v2490_v5, 0.0  ;;  %v2487_v16 = vsel %vm7920_vm15, %v4189_v2, %v4184_v13  ;;  %2557 = vst [vmem:[#allocation5 + $0x50] sm:$0xf0] %v2549_v4  ;;  %v2501_v47 = vpack.c.bf16 %v2497_v12, %v2497_v12  ;;  %3576 = vmatpush1.bf16.msra.mxu0 %v3496_v56  ;;  %2555 = vst [vmem:[#allocation5 + $0x40] sm:$0xf0] %v2547_v36  ;;  %v4200_v2 = vunpack.i.h.bf16 %v4198_v45  ;;  %v7927_v36 = vld [vmem:[#allocation19_spill] sm:$0xff] }
 0x452   : > { %v2502_v10 = vpack.c.bf16 %v2498_v29, %v2498_v29  ;;  %v2495_v57 = vsel %vm7922_vm9, %v2487_v16, 0.0  ;;  %v4199_v50 = vunpack.i.l.bf16 %v4198_v45  ;;  %3617 = vmatpush1.bf16.msra.mxu1 %v3498_v60  ;;  %vm7923_vm8 = vcmask 465920  }
 0x453   : > { %v2499_v13 = vpack.c.bf16 %v2495_v57, %v2495_v57  ;;  %2505 = vst [vmem:[#allocation5 + $0x50] sm:$0xf] %v2501_v47  ;;  %v2580_v58 = vsel %vm7923_vm8, %v4209_v33, %v4210_v25  ;;  %vm7924_vm13 = vcmask 457728   ;;  %v2618_v4 = vpop.permute.xlu0 %2617  ;;  %v4203_v5 = vpop.permute.xlu1 %4202  ;;  %vm7926_vm14 = vnez %v7925_v35  ;;  %v7934_v57 = vld [vmem:[#allocation25_spill] sm:$0xff] }
 0x454   : > { %2506 = vst [vmem:[#allocation5 + $0x58] sm:$0xf] %v2502_v10  ;;  %v2620_v46 = vsel %vm7924_vm13, %v4199_v50, %v4200_v2  ;;  %v2588_v12 = vsel %vm7926_vm14, %v2580_v58, 0.0  ;;  %vm7928_vm0 = vnez %v7927_v36  ;;  %v4205_v29 = vunpack.i.h.bf16 %v4203_v5  ;;  %vm7929_vm15 = vmmov %vm7924_vm13  ;;  %v7932_v10 = vld [vmem:[#allocation34_spill] sm:$0xff]  ;;  %v7936_v58 = vld [vmem:[#allocation24_spill] sm:$0xff] }
 0x455   : > { %2503 = vst [vmem:[#allocation5 + $0x40] sm:$0xf] %v2499_v13  ;;  %v2628_v20 = vsel %vm7928_vm0, %v2620_v46, 0.0  ;;  %v4204_v16 = vunpack.i.l.bf16 %v4203_v5  ;;  %v2592_v56 = vpack.c.bf16 %v2588_v12, %v2588_v12  ;;  %vm7930_vm9 = vmmov %vm7924_vm13  ;;  %vm7933_vm8 = vnez %v7932_v10 }
 0x456   : > { %v2632_v54 = vpack.c.bf16 %v2628_v20, %v2628_v20  ;;  %v2622_v52 = vsel %vm7929_vm15, %v4205_v29, %v2618_v4  ;;  %vm7931_vm4 = vmmov %vm7930_vm9  ;;  %v3501_v60 = vld [vmem:[#allocation5 + $0x48] sm:$0xff]  ;;  %vm7935_vm13 = vnez %v7934_v57  ;;  %vm7937_vm14 = vnez %v7936_v58 }
 0x457   : > { %v2619_v3 = vsel %vm7930_vm9, %v4204_v16, %v4199_v50  ;;  %v2621_v45 = vsel %vm7931_vm4, %v4200_v2, %v4205_v29  ;;  %2596 = vst [vmem:[#allocation5 + $0x68] sm:$0xf] %v2592_v56  ;;  %v2630_v15 = vsel %vm7933_vm8, %v2622_v52, 0.0  ;;  %3577 = vmatprep.subr.bf16.mxu0 %v3501_v60  ;;  %v2578_v5 = vpop.permute.xlu0 %2577  ;;  %v4213_v35 = vpop.permute.xlu1 %4212  ;;  %vm7938_vm4 = vcmask 465920   ;;  %v7940_v60 = vld [vmem:[#allocation27_spill] sm:$0xff] }
 0x458   : > { %v2640_v47 = vrot.slane %v2632_v54, 4  ;;  %v2627_v13 = vsel %vm7935_vm13, %v2619_v3, 0.0  ;;  %v2629_v46 = vsel %vm7937_vm14, %v2621_v45, 0.0  ;;  %v2634_v4 = vpack.c.bf16 %v2630_v15, %v2630_v15  ;;  %vm7939_vm0 = vmmov %vm7938_vm4 }
 0x459   : > { %v2631_v12 = vpack.c.bf16 %v2627_v13, %v2627_v13  ;;  %v2633_v50 = vpack.c.bf16 %v2629_v46, %v2629_v46  ;;  %v4215_v36 = vunpack.i.h.bf16 %v4213_v35  ;;  %v4214_v2 = vunpack.i.l.bf16 %v4213_v35  ;;  %vm7942_vm9 = vmmov %vm7939_vm0  ;;  %v7943_v13 = vld [vmem:[#allocation31_spill] sm:$0xff]  ;;  %v7945_v46 = vld [vmem:[#allocation26_spill] sm:$0xff] }
 0x45a   : > { %2648 = vst [vmem:[#allocation5 + $0x68] sm:$0xf0] %v2640_v47  ;;  %v3502_v29 = vld [vmem:[#allocation5 + $0x50] sm:$0xff]  ;;  %v2642_v16 = vrot.slane %v2634_v4, 4  ;;  %vm7941_vm15 = vnez %v7940_v60  ;;  %vm7944_vm8 = vnez %v7943_v13  ;;  %vm7946_vm13 = vnez %v7945_v46  ;;  %v7949_v60 = vld [vmem:[#allocation33_spill] sm:$0xff]  ;;  %v7957_v46 = vld [vmem:[#allocation39_spill] sm:$0xff] }
 0x45b   : > { %v3503_v20 = vld [vmem:[#allocation5 + $0x58] sm:$0xff]  ;;  %v2639_v56 = vrot.slane %v2631_v12, 4  ;;  %v2641_v54 = vrot.slane %v2633_v50, 4  ;;  %v2581_v52 = vsel %vm7938_vm4, %v4210_v25, %v4215_v36  ;;  %v2582_v45 = vsel %vm7939_vm0, %v4215_v36, %v2578_v5  ;;  %v4228_v57 = vpop.permute.xlu0 %4227  ;;  %v4218_v47 = vpop.permute.xlu1 %4217 }
 0x45c   : > { %v3500_v3 = vld [vmem:[#allocation5 + $0x40] sm:$0xff]  ;;  %3618 = vmatprep.subr.bf16.mxu1 %v3503_v20  ;;  %v2589_v10 = vsel %vm7941_vm15, %v2581_v52, 0.0  ;;  %v2579_v15 = vsel %vm7942_vm9, %v4214_v2, %v4209_v33  ;;  %2650 = vst [vmem:[#allocation5 + $0x78] sm:$0xf0] %v2642_v16  ;;  %v2590_v58 = vsel %vm7944_vm8, %v2582_v45, 0.0  ;;  %v4230_v5 = vunpack.i.h.bf16 %v4228_v57 }
 0x45d   : > { %3578 = vmatpush1.bf16.msra.mxu0 %v3500_v3  ;;  %3619 = vmatpush1.bf16.msra.mxu1 %v3502_v29  ;;  %2647 = vst [vmem:[#allocation5 + $0x60] sm:$0xf0] %v2639_v56  ;;  %2649 = vst [vmem:[#allocation5 + $0x70] sm:$0xf0] %v2641_v54  ;;  %v2593_v25 = vpack.c.bf16 %v2589_v10, %v2589_v10  ;;  %v2587_v35 = vsel %vm7946_vm13, %v2579_v15, 0.0  ;;  %v2594_v4 = vpack.c.bf16 %v2590_v58, %v2590_v58  ;;  %vm7947_vm14 = vcmask 449536  }
 0x45e   : > { %v2591_v12 = vpack.c.bf16 %v2587_v35, %v2587_v35  ;;  %v4229_v50 = vunpack.i.l.bf16 %v4228_v57  ;;  %v4220_v36 = vunpack.i.h.bf16 %v4218_v47  ;;  %v4219_v33 = vunpack.i.l.bf16 %v4218_v47  ;;  %v7955_v58 = vld [vmem:[#allocation38_spill] sm:$0xff] }
 0x45f   : > { %2597 = vst [vmem:[#allocation5 + $0x70] sm:$0xf] %v2593_v25  ;;  %2598 = vst [vmem:[#allocation5 + $0x78] sm:$0xf] %v2594_v4  ;;  %v2710_v20 = vpop.permute.xlu0 %2709  ;;  %v4223_v29 = vpop.permute.xlu1 %4222  ;;  %vm7948_vm4 = vcmask 72704   ;;  %vm7950_vm0 = vnez %v7949_v60  ;;  %vm7956_vm13 = vnez %v7955_v58  ;;  %v7964_v58 = vld [vmem:[#allocation44_spill] sm:$0xff] }
 0x460   : > { %2595 = vst [vmem:[#allocation5 + $0x60] sm:$0xf] %v2591_v12  ;;  %v2672_v2 = vsel %vm7947_vm14, %v4229_v50, %v4230_v5  ;;  %v2712_v56 = vsel %vm7948_vm4, %v4219_v33, %v4220_v36  ;;  %v4225_v54 = vunpack.i.h.bf16 %v4223_v29  ;;  %v4224_v52 = vunpack.i.l.bf16 %v4223_v29  ;;  %vm7951_vm15 = vmmov %vm7948_vm4 }
 0x461   : > { %v2680_v16 = vsel %vm5590_vm10, %v2672_v2, 0.0  ;;  %v3505_v3 = vld [vmem:[#allocation5 + $0x68] sm:$0xff]  ;;  %v2720_v10 = vsel %vm7950_vm0, %v2712_v56, 0.0  ;;  %vm7952_vm9 = vmmov %vm7948_vm4  ;;  %vm7954_vm10 = vnez %v7538_v26  ;;  %vm7958_vm14 = vnez %v7957_v46 }
 0x462   : > { %v2684_v45 = vpack.c.bf16 %v2680_v16, %v2680_v16  ;;  %3579 = vmatprep.subr.bf16.mxu0 %v3505_v3  ;;  %v2724_v15 = vpack.c.bf16 %v2720_v10, %v2720_v10  ;;  %v2714_v57 = vsel %vm7951_vm15, %v4225_v54, %v2710_v20  ;;  %v2711_v47 = vsel %vm7952_vm9, %v4224_v52, %v4219_v33  ;;  %vm7953_vm8 = vmmov %vm7948_vm4 }
 0x463   : > { %v2713_v13 = vsel %vm7953_vm8, %v4220_v36, %v4225_v54  ;;  %v2722_v24 = vsel %vm7954_vm10, %v2714_v57, 0.0  ;;  %v2719_v25 = vsel %vm7956_vm13, %v2711_v47, 0.0  ;;  %v2670_v4 = vpop.permute.xlu0 %2669  ;;  %v4233_v12 = vpop.permute.xlu1 %4232  ;;  %vm7959_vm4 = vcmask 449536  }
 0x464   : > { %2688 = vst [vmem:[#allocation5 + $0x88] sm:$0xf] %v2684_v45  ;;  %v2721_v35 = vsel %vm7958_vm14, %v2713_v13, 0.0  ;;  %v2732_v2 = vrot.slane %v2724_v15, 4  ;;  %v2726_v29 = vpack.c.bf16 %v2722_v24, %v2722_v24  ;;  %v2723_v16 = vpack.c.bf16 %v2719_v25, %v2719_v25  ;;  %vm7960_vm0 = vmmov %vm7959_vm4 }
 0x465   : > { %v2725_v20 = vpack.c.bf16 %v2721_v35, %v2721_v35  ;;  %v4235_v56 = vunpack.i.h.bf16 %v4233_v12  ;;  %v4234_v33 = vunpack.i.l.bf16 %v4233_v12  ;;  %vm7961_vm15 = vmmov %vm7960_vm0  ;;  %vm7962_vm9 = vnez %v7524_v7 }
 0x466   : > { %v3506_v52 = vld [vmem:[#allocation5 + $0x70] sm:$0xff]  ;;  %2740 = vst [vmem:[#allocation5 + $0x88] sm:$0xf0] %v2732_v2  ;;  %v2734_v36 = vrot.slane %v2726_v29, 4  ;;  %v2731_v54 = vrot.slane %v2723_v16, 4  ;;  %v3507_v45 = vld [vmem:[#allocation5 + $0x78] sm:$0xff]  ;;  %vm7963_vm8 = vnez %v7562_v44  ;;  %vm7965_vm10 = vnez %v7964_v58 }
 0x467   : > { %v2733_v26 = vrot.slane %v2725_v20, 4  ;;  %v3504_v3 = vld [vmem:[#allocation5 + $0x60] sm:$0xff]  ;;  %v2673_v60 = vsel %vm7959_vm4, %v4230_v5, %v4235_v56  ;;  %v2674_v10 = vsel %vm7960_vm0, %v4235_v56, %v2670_v4  ;;  %v2671_v57 = vsel %vm7961_vm15, %v4234_v33, %v4229_v50  ;;  %3620 = vmatprep.subr.bf16.mxu1 %v3507_v45  ;;  %v4248_v15 = vpop.permute.xlu0 %4247  ;;  %v4238_v47 = vpop.permute.xlu1 %4237  ;;  %v7967_v44 = vld [vmem:[#allocation36_spill] sm:$0xff]  ;;  %v7979_v58 = vld [vmem:[#allocation43_spill] sm:$0xff] }
 0x468   : > { %3580 = vmatpush1.bf16.msra.mxu0 %v3504_v3  ;;  %2742 = vst [vmem:[#allocation5 + $0x98] sm:$0xf0] %v2734_v36  ;;  %2739 = vst [vmem:[#allocation5 + $0x80] sm:$0xf0] %v2731_v54  ;;  %v2681_v13 = vsel %vm7962_vm9, %v2673_v60, 0.0  ;;  %v2682_v24 = vsel %vm7963_vm8, %v2674_v10, 0.0  ;;  %v4250_v25 = vunpack.i.h.bf16 %v4248_v15  ;;  %3621 = vmatpush1.bf16.msra.mxu1 %v3506_v52  ;;  %v4249_v4 = vunpack.i.l.bf16 %v4248_v15 }
 0x469   : > { %2741 = vst [vmem:[#allocation5 + $0x90] sm:$0xf0] %v2733_v26  ;;  %v2679_v5 = vsel %vm7965_vm10, %v2671_v57, 0.0  ;;  %v2685_v46 = vpack.c.bf16 %v2681_v13, %v2681_v13  ;;  %v2686_v50 = vpack.c.bf16 %v2682_v24, %v2682_v24  ;;  %v4240_v12 = vunpack.i.h.bf16 %v4238_v47  ;;  %v7970_v54 = vld [vmem:[#allocation35_spill] sm:$0xff]  ;;  %v7975_v15 = vld [vmem:[#allocation46_spill] sm:$0xff] }
 0x46a   : > { %v2683_v35 = vpack.c.bf16 %v2679_v5, %v2679_v5  ;;  %v4239_v2 = vunpack.i.l.bf16 %v4238_v47  ;;  %vm7966_vm13 = vcmask 64512   ;;  %vm7968_vm14 = vnez %v7967_v44  ;;  %v7977_v13 = vld [vmem:[#allocation42_spill] sm:$0xff] }
 0x46b   : > { %2689 = vst [vmem:[#allocation5 + $0x90] sm:$0xf] %v2685_v46  ;;  %2690 = vst [vmem:[#allocation5 + $0x98] sm:$0xf] %v2686_v50  ;;  %v2764_v7 = vsel %vm7966_vm13, %v4249_v4, %v4250_v25  ;;  %v2802_v29 = vpop.permute.xlu0 %2801  ;;  %v4243_v16 = vpop.permute.xlu1 %4242  ;;  %vm7969_vm4 = vcmask 56320   ;;  %vm7971_vm0 = vnez %v7970_v54  ;;  %vm7976_vm10 = vnez %v7975_v15 }
 0x46c   : > { %2687 = vst [vmem:[#allocation5 + $0x80] sm:$0xf] %v2683_v35  ;;  %v2772_v20 = vsel %vm7968_vm14, %v2764_v7, 0.0  ;;  %v2804_v56 = vsel %vm7969_vm4, %v4239_v2, %v4240_v12  ;;  %v4245_v33 = vunpack.i.h.bf16 %v4243_v16  ;;  %v4244_v52 = vunpack.i.l.bf16 %v4243_v16  ;;  %vm7972_vm15 = vmmov %vm7969_vm4 }
 0x46d   : > { %v2776_v36 = vpack.c.bf16 %v2772_v20, %v2772_v20  ;;  %v2812_v26 = vsel %vm7971_vm0, %v2804_v56, 0.0  ;;  %v3509_v3 = vld [vmem:[#allocation5 + $0x88] sm:$0xff]  ;;  %vm7973_vm9 = vmmov %vm7969_vm4  ;;  %vm7978_vm13 = vnez %v7977_v13  ;;  %vm7980_vm14 = vnez %v7979_v58 }
 0x46e   : > { %v2816_v45 = vpack.c.bf16 %v2812_v26, %v2812_v26  ;;  %v2806_v60 = vsel %vm7972_vm15, %v4245_v33, %v2802_v29  ;;  %v2803_v10 = vsel %vm7973_vm9, %v4244_v52, %v4239_v2  ;;  %vm7974_vm8 = vmmov %vm7969_vm4  ;;  %3581 = vmatprep.subr.bf16.mxu0 %v3509_v3  ;;  %vm7981_vm4 = vcmask 7168  }
 0x46f   : > { %v2805_v57 = vsel %vm7974_vm8, %v4240_v12, %v4245_v33  ;;  %2780 = vst [vmem:[#allocation5 + $0xa8] sm:$0xf] %v2776_v36  ;;  %v2814_v47 = vsel %vm7976_vm10, %v2806_v60, 0.0  ;;  %v2811_v24 = vsel %vm7978_vm13, %v2803_v10, 0.0  ;;  %v6813_v46 = vpop.permute.xlu0 %4257  ;;  %v4253_v50 = vpop.permute.xlu1 %4252  ;;  %vm7982_vm0 = vcmask 64512  }
 0x470   : > { %v2813_v5 = vsel %vm7980_vm14, %v2805_v57, 0.0  ;;  %v2824_v35 = vrot.slane %v2816_v45, 4  ;;  %v2818_v7 = vpack.c.bf16 %v2814_v47, %v2814_v47  ;;  %v2815_v29 = vpack.c.bf16 %v2811_v24, %v2811_v24  ;;  %vm7983_vm15 = vmmov %vm7982_vm0  ;;  %v7985_v47 = vld [vmem:[#allocation40_spill] sm:$0xff]  ;;  %v7987_v24 = vld [vmem:[#allocation41_spill] sm:$0xff] }
 0x471   : > { %v2817_v2 = vpack.c.bf16 %v2813_v5, %v2813_v5  ;;  %v4260_v12 = vunpack.i.h.bf16 %v6813_v46  ;;  %v4259_v16 = vunpack.i.l.bf16 %v6813_v46  ;;  %v4255_v44 = vunpack.i.h.bf16 %v4253_v50  ;;  %vm7989_vm13 = vmmov %vm7982_vm0 }
 0x472   : > { %v4254_v20 = vunpack.i.l.bf16 %v4253_v50  ;;  %2832 = vst [vmem:[#allocation5 + $0xa8] sm:$0xf0] %v2824_v35  ;;  %v2826_v56 = vrot.slane %v2818_v7, 4  ;;  %v2823_v33 = vrot.slane %v2815_v29, 4  ;;  %v3511_v54 = vld [vmem:[#allocation5 + $0x98] sm:$0xff]  ;;  %v3510_v26 = vld [vmem:[#allocation5 + $0x90] sm:$0xff]  ;;  %vm7984_vm9 = vnez %v7603_v49 }
 0x473   : > { %v2825_v52 = vrot.slane %v2817_v2, 4  ;;  %v3508_v36 = vld [vmem:[#allocation5 + $0x80] sm:$0xff]  ;;  %v2856_v3 = vsel %vm7981_vm4, %v4259_v16, %v4260_v12  ;;  %v2765_v45 = vsel %vm7982_vm0, %v4250_v25, %v4255_v44  ;;  %3622 = vmatprep.subr.bf16.mxu1 %v3511_v54  ;;  %v4268_v10 = vpop.permute.xlu0 %4267  ;;  %v2762_v57 = vpop.permute.xlu1 %2761  ;;  %vm7986_vm8 = vnez %v7985_v47  ;;  %v7991_v29 = vld [vmem:[#allocation45_spill] sm:$0xff] }
 0x474   : > { %v2763_v60 = vsel %vm7983_vm15, %v4254_v20, %v4249_v4  ;;  %3582 = vmatpush1.bf16.msra.mxu0 %v3508_v36  ;;  %2834 = vst [vmem:[#allocation5 + $0xb8] sm:$0xf0] %v2826_v56  ;;  %2831 = vst [vmem:[#allocation5 + $0xa0] sm:$0xf0] %v2823_v33  ;;  %v2864_v15 = vsel %vm7984_vm9, %v2856_v3, 0.0  ;;  %v2773_v13 = vsel %vm7986_vm8, %v2765_v45, 0.0  ;;  %vm7988_vm10 = vnez %v7987_v24  ;;  %3623 = vmatpush1.bf16.msra.mxu1 %v3510_v26 }
 0x475   : > { %2833 = vst [vmem:[#allocation5 + $0xb0] sm:$0xf0] %v2825_v52  ;;  %v2771_v58 = vsel %vm7988_vm10, %v2763_v60, 0.0  ;;  %v4270_v5 = vunpack.i.h.bf16 %v4268_v10  ;;  %v2868_v25 = vpack.c.bf16 %v2864_v15, %v2864_v15  ;;  %v2777_v4 = vpack.c.bf16 %v2773_v13, %v2773_v13  ;;  %v7993_v33 = vld [vmem:[#allocation48_spill] sm:$0xff]  ;;  %v7998_v13 = vld [vmem:[#allocation49_spill] sm:$0xff] }
 0x476   : > { %v2775_v50 = vpack.c.bf16 %v2771_v58, %v2771_v58  ;;  %v4269_v35 = vunpack.i.l.bf16 %v4268_v10  ;;  %v2766_v7 = vsel %vm7989_vm13, %v4255_v44, %v2762_v57  ;;  %vm7990_vm14 = vcmask 990208   ;;  %v8000_v58 = vld [vmem:[#allocation50_spill] sm:$0xff] }
 0x477   : > { %2872 = vst [vmem:[#allocation5 + $0xc8] sm:$0xf] %v2868_v25  ;;  %2781 = vst [vmem:[#allocation5 + $0xb0] sm:$0xf] %v2777_v4  ;;  %vm7992_vm4 = vnez %v7991_v29  ;;  %v4273_v20 = vpop.permute.xlu0 %4272  ;;  %v4263_v56 = vpop.permute.xlu1 %4262  ;;  %vm7994_vm0 = vnez %v7993_v33  ;;  %vm7999_vm10 = vnez %v7998_v13  ;;  %vm8001_vm13 = vnez %v8000_v58 }
 0x478   : > { %2779 = vst [vmem:[#allocation5 + $0xa0] sm:$0xf] %v2775_v50  ;;  %v2960_v49 = vsel %vm7990_vm14, %v4269_v35, %v4270_v5  ;;  %v2774_v2 = vsel %vm7992_vm4, %v2766_v7, 0.0  ;;  %v4275_v54 = vunpack.i.h.bf16 %v4273_v20  ;;  %v4274_v26 = vunpack.i.l.bf16 %v4273_v20  ;;  %vm7995_vm15 = vmmov %vm7990_vm14 }
 0x479   : > { %v2968_v52 = vsel %vm7994_vm0, %v2960_v49, 0.0  ;;  %v2778_v36 = vpack.c.bf16 %v2774_v2, %v2774_v2  ;;  %v4265_v45 = vunpack.i.h.bf16 %v4263_v56  ;;  %v4264_v60 = vunpack.i.l.bf16 %v4263_v56  ;;  %v3513_v44 = vld [vmem:[#allocation5 + $0xa8] sm:$0xff]  ;;  %vm7996_vm9 = vmmov %vm7990_vm14 }
 0x47a   : > { %v2972_v3 = vpack.c.bf16 %v2968_v52, %v2968_v52  ;;  %v2959_v10 = vsel %vm7995_vm15, %v4274_v26, %v4269_v35  ;;  %v2961_v57 = vsel %vm7996_vm9, %v4270_v5, %v4275_v54  ;;  %vm7997_vm8 = vmmov %vm7996_vm9  ;;  %3583 = vmatprep.subr.bf16.mxu0 %v3513_v44  ;;  %vm8002_vm14 = vnez %v7609_v18 }
 0x47b   : > { %2782 = vst [vmem:[#allocation5 + $0xb8] sm:$0xf] %v2778_v36  ;;  %v2962_v15 = vsel %vm7997_vm8, %v4275_v54, %v6598_v11  ;;  %v2967_v24 = vsel %vm7999_vm10, %v2959_v10, 0.0  ;;  %v2969_v25 = vsel %vm8001_vm13, %v2961_v57, 0.0  ;;  %v4283_v50 = vpop.permute.xlu0 %4282  ;;  %v2854_v7 = vpop.permute.xlu1 %2853  ;;  %vm8003_vm4 = vcmask 7168  }
 0x47c   : > { %v2980_v47 = vrot.slane %v2972_v3, 4  ;;  %v2970_v4 = vsel %vm8002_vm14, %v2962_v15, 0.0  ;;  %v2971_v49 = vpack.c.bf16 %v2967_v24, %v2967_v24  ;;  %v2973_v35 = vpack.c.bf16 %v2969_v25, %v2969_v25  ;;  %vm8005_vm15 = vmmov %vm8003_vm4 }
 0x47d   : > { %v2974_v29 = vpack.c.bf16 %v2970_v4, %v2970_v4  ;;  %v2857_v5 = vsel %vm8003_vm4, %v4260_v12, %v4265_v45  ;;  %vm8004_vm0 = vnez %v7615_v48  ;;  %v2855_v2 = vsel %vm8005_vm15, %v4264_v60, %v4259_v16  ;;  %vm8008_vm10 = vmmov %vm8003_vm4 }
 0x47e   : > { %2988 = vst [vmem:[#allocation5 + $0xe8] sm:$0xf0] %v2980_v47  ;;  %v2865_v11 = vsel %vm8004_vm0, %v2857_v5, 0.0  ;;  %v4285_v20 = vunpack.i.h.bf16 %v4283_v50  ;;  %v2979_v56 = vrot.slane %v2971_v49, 4  ;;  %v2981_v33 = vrot.slane %v2973_v35, 4  ;;  %v3517_v54 = vld [vmem:[#allocation5 + $0xc8] sm:$0xff] }
 0x47f   : > { %v2982_v18 = vrot.slane %v2974_v29, 4  ;;  %v2869_v52 = vpack.c.bf16 %v2865_v11, %v2865_v11  ;;  %v3512_v36 = vld [vmem:[#allocation5 + $0xa0] sm:$0xff]  ;;  %vm8006_vm9 = vnez %v7600_v51  ;;  %vm8007_vm8 = vcmask 1039360   ;;  %v4288_v3 = vpop.permute.xlu0 %4287  ;;  %v4278_v46 = vpop.permute.xlu1 %4277  ;;  %v8013_v29 = vld [vmem:[#allocation55_spill] sm:$0xff] }
 0x480   : > { %v2863_v26 = vsel %vm8006_vm9, %v2855_v2, 0.0  ;;  %v2922_v12 = vsel %vm8007_vm8, %v4285_v20, %v6606_v63  ;;  %v2858_v48 = vsel %vm8008_vm10, %v4265_v45, %v2854_v7  ;;  %3584 = vmatpush1.bf16.msra.mxu0 %v3512_v36  ;;  %2987 = vst [vmem:[#allocation5 + $0xe0] sm:$0xf0] %v2979_v56  ;;  %2989 = vst [vmem:[#allocation5 + $0xf0] sm:$0xf0] %v2981_v33  ;;  %vm8009_vm13 = vnez %v7612_v40  ;;  %v3514_v40 = vld [vmem:[#allocation5 + $0xb0] sm:$0xff] }
 0x481   : > { %2990 = vst [vmem:[#allocation5 + $0xf8] sm:$0xf0] %v2982_v18  ;;  %2873 = vst [vmem:[#allocation5 + $0xd0] sm:$0xf] %v2869_v52  ;;  %v2867_v16 = vpack.c.bf16 %v2863_v26, %v2863_v26  ;;  %v2930_v60 = vsel %vm8009_vm13, %v2922_v12, 0.0  ;;  %vm8010_vm14 = vnez %v7634_v8  ;;  %v4290_v44 = vunpack.i.h.bf16 %v4288_v3  ;;  %3585 = vmatprep.subr.bf16.mxu0 %v3517_v54  ;;  %v8019_v52 = vld [vmem:[#allocation51_spill] sm:$0xff] }
 0x482   : > { %v2866_v51 = vsel %vm8010_vm14, %v2858_v48, 0.0  ;;  %v2934_v10 = vpack.c.bf16 %v2930_v60, %v2930_v60  ;;  %v4289_v57 = vunpack.i.l.bf16 %v4288_v3  ;;  %v4280_v45 = vunpack.i.h.bf16 %v4278_v46  ;;  %v3515_v15 = vld [vmem:[#allocation5 + $0xb8] sm:$0xff]  ;;  %vm8012_vm0 = vmmov %vm8007_vm8  ;;  %v8021_v54 = vld [vmem:[#allocation47_spill] sm:$0xff] }
 0x483   : > { %v2870_v63 = vpack.c.bf16 %v2866_v51, %v2866_v51  ;;  %v4135_v47 = vunpack.i.h.bf16 %v6647_v31  ;;  %v4145_v13 = vunpack.i.h.bf16 %v6655_v6  ;;  %2871 = vst [vmem:[#allocation5 + $0xc0] sm:$0xf] %v2867_v16  ;;  %v4284_v24 = vunpack.i.l.bf16 %v4283_v50  ;;  %3624 = vmatprep.subr.bf16.mxu1 %v3515_v15  ;;  %v4293_v49 = vpop.permute.xlu0 %4292  ;;  %v4298_v35 = vpop.permute.xlu1 %4297  ;;  %v8015_v50 = vld [vmem:[#allocation52_spill] sm:$0xff]  ;;  %vm8017_vm8 = vmmov %vm8012_vm0 }
 0x484   : > { %v4279_v58 = vunpack.i.l.bf16 %v4278_v46  ;;  %v4165_v25 = vunpack.i.h.bf16 %v6678_v62  ;;  %v4175_v8 = vunpack.i.h.bf16 %v6691_v27  ;;  %2938 = vst [vmem:[#allocation5 + $0xf8] sm:$0xf] %v2934_v10  ;;  %vm8011_vm4 = vcmask 973824   ;;  %3625 = vmatpush1.bf16.msra.mxu1 %v3514_v40  ;;  %vm8018_vm10 = vmmov %vm8012_vm0  ;;  %v8025_v40 = vld [vmem:[#allocation59_spill] sm:$0xff] }
 0x485   : > { %2874 = vst [vmem:[#allocation5 + $0xd8] sm:$0xf] %v2870_v63  ;;  %v3052_v4 = vsel %vm8011_vm4, %v4289_v57, %v4290_v44  ;;  %v2921_v7 = vsel %vm8012_vm0, %v4280_v45, %v4285_v20  ;;  %vm8014_vm15 = vnez %v8013_v29  ;;  %vm8016_vm9 = vnez %v8015_v50  ;;  %vm8023_vm0 = vmmov %vm8011_vm4 }
 0x486   : > { %v3060_v5 = vsel %vm8014_vm15, %v3052_v4, 0.0  ;;  %v2929_v11 = vsel %vm8016_vm9, %v2921_v7, 0.0  ;;  %v2919_v2 = vsel %vm8017_vm8, %v4284_v24, %v4279_v58  ;;  %v2920_v56 = vsel %vm8018_vm10, %v4279_v58, %v4280_v45  ;;  %vm8024_vm15 = vmmov %vm8023_vm0  ;;  %v8027_v7 = vld [vmem:[#allocation60_spill] sm:$0xff] }
 0x487   : > { %v3064_v33 = vpack.c.bf16 %v3060_v5, %v3060_v5  ;;  %v2933_v18 = vpack.c.bf16 %v2929_v11, %v2929_v11  ;;  %vm8020_vm13 = vnez %v8019_v52  ;;  %vm8022_vm14 = vnez %v8021_v54  ;;  %v4303_v10 = vpop.permute.xlu0 %4302  ;;  %v6876_v63 = vpop.permute.xlu1 %4317 }
 0x488   : > { %v2927_v36 = vsel %vm8020_vm13, %v2919_v2, 0.0  ;;  %v2928_v20 = vsel %vm8022_vm14, %v2920_v56, 0.0  ;;  %v4295_v48 = vunpack.i.h.bf16 %v4293_v49  ;;  %v4294_v3 = vunpack.i.l.bf16 %v4293_v49  ;;  %v8032_v2 = vld [vmem:[#allocation58_spill] sm:$0xff] }
 0x489   : > { %v2931_v26 = vpack.c.bf16 %v2927_v36, %v2927_v36  ;;  %v2932_v12 = vpack.c.bf16 %v2928_v20, %v2928_v20  ;;  %v4195_v46 = vunpack.i.h.bf16 %v6714_v9  ;;  %v3072_v16 = vrot.slane %v3064_v33, 4  ;;  %2937 = vst [vmem:[#allocation5 + $0xf0] sm:$0xf] %v2933_v18  ;;  %v3518_v20 = vld [vmem:[#allocation5 + $0xd0] sm:$0xff] }
 0x48a   : > { %v4300_v60 = vunpack.i.h.bf16 %v4298_v35  ;;  %v4299_v51 = vunpack.i.l.bf16 %v4298_v35  ;;  %v3051_v45 = vsel %vm8011_vm4, %v4294_v3, %v4289_v57  ;;  %v3053_v15 = vsel %vm8023_vm0, %v4290_v44, %v4295_v48  ;;  %v8029_v35 = vld [vmem:[#allocation61_spill] sm:$0xff]  ;;  %v3516_v50 = vld [vmem:[#allocation5 + $0xc0] sm:$0xff] }
 0x48b   : > { %2935 = vst [vmem:[#allocation5 + $0xe0] sm:$0xf] %v2931_v26  ;;  %2936 = vst [vmem:[#allocation5 + $0xe8] sm:$0xf] %v2932_v12  ;;  %v3054_v24 = vsel %vm8024_vm15, %v4295_v48, %v6614_v61  ;;  %v4305_v58 = vunpack.i.h.bf16 %v4303_v10  ;;  %vm8026_vm9 = vnez %v8025_v40  ;;  %vm8028_vm8 = vnez %v8027_v7  ;;  %3586 = vmatpush1.bf16.msra.mxu0 %v3516_v50  ;;  %v3523_v33 = vld [vmem:[#allocation5 + $0xf8] sm:$0xff]  ;;  %v4308_v26 = vpop.permute.xlu0 %4307  ;;  %v6894_v12 = vpop.permute.xlu1 %4327 }
 0x48c   : > { %3080 = vst [vmem:[#allocation5 + $0x108] sm:$0xf0] %v3072_v16  ;;  %v3059_v4 = vsel %vm8026_vm9, %v3051_v45, 0.0  ;;  %v3061_v49 = vsel %vm8028_vm8, %v3053_v15, 0.0  ;;  %vm8030_vm10 = vnez %v8029_v35  ;;  %vm8031_vm13 = vcmask 982016   ;;  %v3519_v56 = vld [vmem:[#allocation5 + $0xd8] sm:$0xff] }
 0x48d   : > { %v3062_v29 = vsel %vm8030_vm10, %v3054_v24, 0.0  ;;  %v3012_v5 = vsel %vm8031_vm13, %v4299_v51, %v4300_v60  ;;  %v3063_v57 = vpack.c.bf16 %v3059_v4, %v3059_v4  ;;  %v3065_v11 = vpack.c.bf16 %v3061_v49, %v3061_v49  ;;  %vm8034_vm4 = vmmov %vm8031_vm13  ;;  %3626 = vmatprep.subr.bf16.mxu1 %v3519_v56 }
 0x48e   : > { %v3066_v44 = vpack.c.bf16 %v3062_v29, %v3062_v29  ;;  %vm8033_vm14 = vnez %v8032_v2  ;;  %v4304_v52 = vunpack.i.l.bf16 %v4303_v10  ;;  %v3013_v36 = vsel %vm8034_vm4, %v4300_v60, %v4305_v58  ;;  %vm8035_vm0 = vmmov %vm8034_vm4  ;;  %3627 = vmatpush1.bf16.msra.mxu1 %v3518_v20  ;;  %v8042_v2 = vld [vmem:[#allocation56_spill] sm:$0xff] }
 0x48f   : > { %v3020_v61 = vsel %vm8033_vm14, %v3012_v5, 0.0  ;;  %v3014_v54 = vsel %vm8035_vm0, %v4305_v58, %v6619_v39  ;;  %v3071_v48 = vrot.slane %v3063_v57, 4  ;;  %v3073_v3 = vrot.slane %v3065_v11, 4  ;;  %vm8037_vm9 = vmmov %vm8035_vm0  ;;  %3628 = vmatprep.subr.bf16.mxu1 %v3523_v33  ;;  %v4313_v29 = vpop.permute.xlu0 %4312  ;;  %v6907_v5 = vpop.permute.xlu1 %4337 }
 0x490   : > { %v3024_v18 = vpack.c.bf16 %v3020_v61, %v3020_v61  ;;  %v3074_v16 = vrot.slane %v3066_v44, 4  ;;  %vm8036_vm15 = vnez %v7675_v43  ;;  %v3011_v10 = vsel %vm8037_vm9, %v4304_v52, %v4299_v51  ;;  %v3522_v4 = vld [vmem:[#allocation5 + $0xf0] sm:$0xff] }
 0x491   : > { %v3021_v45 = vsel %vm8036_vm15, %v3013_v36, 0.0  ;;  %v3022_v60 = vsel %vm6168_vm6, %v3014_v54, 0.0  ;;  %v4320_v39 = vunpack.i.h.bf16 %v6876_v63  ;;  %3079 = vst [vmem:[#allocation5 + $0x100] sm:$0xf0] %v3071_v48  ;;  %3081 = vst [vmem:[#allocation5 + $0x110] sm:$0xf0] %v3073_v3  ;;  %vm8038_vm8 = vnez %v7679_v21 }
 0x492   : > { %3028 = vst [vmem:[#allocation5 + $0x108] sm:$0xf] %v3024_v18  ;;  %v3025_v15 = vpack.c.bf16 %v3021_v45, %v3021_v45  ;;  %3082 = vst [vmem:[#allocation5 + $0x118] sm:$0xf0] %v3074_v16  ;;  %v3019_v24 = vsel %vm8038_vm8, %v3011_v10, 0.0  ;;  %v3026_v58 = vpack.c.bf16 %v3022_v60, %v3022_v60  ;;  %v4319_v43 = vunpack.i.l.bf16 %v6876_v63  ;;  %v3521_v35 = vld [vmem:[#allocation5 + $0xe8] sm:$0xff]  ;;  %3629 = vmatpush1.bf16.msra.mxu1 %v3522_v4 }
 0x493   : > { %v4310_v40 = vunpack.i.h.bf16 %v4308_v26  ;;  %v3023_v7 = vpack.c.bf16 %v3019_v24, %v3019_v24  ;;  %v4309_v51 = vunpack.i.l.bf16 %v4308_v26  ;;  %v4330_v23 = vunpack.i.h.bf16 %v6894_v12  ;;  %v3520_v50 = vld [vmem:[#allocation5 + $0xe0] sm:$0xff]  ;;  %3587 = vmatprep.subr.bf16.mxu0 %v3521_v35  ;;  %v8046_v36 = vld [vmem:[#allocation57_spill] sm:$0xff]  ;;  %v6929_v48 = vpop.permute.xlu1 %4347  ;;  %v8051_v45 = vld [vmem:[#allocation63_spill] sm:$0xff] }
 0x494   : > { %3029 = vst [vmem:[#allocation5 + $0x110] sm:$0xf] %v3025_v15  ;;  %v4329_v49 = vunpack.i.l.bf16 %v6894_v12  ;;  %3030 = vst [vmem:[#allocation5 + $0x118] sm:$0xf] %v3026_v58  ;;  %vm8039_vm6 = vcmask 588800   ;;  %v4315_v57 = vunpack.i.h.bf16 %v4313_v29  ;;  %v4314_v11 = vunpack.i.l.bf16 %v4313_v29  ;;  %3588 = vmatpush1.bf16.msra.mxu0 %v3520_v50  ;;  %v8053_v60 = vld [vmem:[#allocation53_spill] sm:$0xff] }
 0x495   : > { %v3146_v21 = vsel %vm8039_vm6, %v4319_v43, %v4320_v39  ;;  %vm8040_vm10 = vmmov %vm8039_vm6  ;;  %3027 = vst [vmem:[#allocation5 + $0x100] sm:$0xf] %v3023_v7  ;;  %vm8041_vm13 = vnez %v7686_v14  ;;  %vm8043_vm14 = vnez %v8042_v2  ;;  %vm8047_vm15 = vnez %v8046_v36  ;;  %v8057_v35 = vld [vmem:[#allocation54_spill] sm:$0xff] }
 0x496   : > { %v3143_v63 = vsel %vm8040_vm10, %v4310_v40, %v4135_v47  ;;  %v3154_v44 = vsel %vm8041_vm13, %v3146_v21, 0.0  ;;  %vm8044_vm4 = vmmov %vm8039_vm6  ;;  %vm8048_vm9 = vnez %v7683_v55  ;;  %vm8049_vm8 = vcmask 596992   ;;  %v8059_v50 = vld [vmem:[#allocation62_spill] sm:$0xff] }
 0x497   : > { %v3151_v61 = vsel %vm8043_vm14, %v3143_v63, 0.0  ;;  %v3144_v56 = vsel %vm8044_vm4, %v4135_v47, %v4309_v51  ;;  %vm8045_vm0 = vmmov %vm8044_vm4  ;;  %v3158_v18 = vpack.c.bf16 %v3154_v44, %v3154_v44  ;;  %v3106_v12 = vsel %vm8049_vm8, %v4329_v49, %v4330_v23  ;;  %v4323_v47 = vpop.permute.xlu0 %4322 }
 0x498   : > { %v3145_v33 = vsel %vm8045_vm0, %v4309_v51, %v4319_v43  ;;  %v3155_v52 = vpack.c.bf16 %v3151_v61, %v3151_v61  ;;  %v3152_v54 = vsel %vm8047_vm15, %v3144_v56, 0.0  ;;  %vm8050_vm6 = vmmov %vm8049_vm8  ;;  %vm8052_vm10 = vnez %v8051_v45 }
 0x499   : > { %v3153_v20 = vsel %vm8048_vm9, %v3145_v33, 0.0  ;;  %v3156_v14 = vpack.c.bf16 %v3152_v54, %v3152_v54  ;;  %v3103_v31 = vsel %vm8050_vm6, %v4315_v57, %v4145_v13  ;;  %v3166_v3 = vrot.slane %v3158_v18, 4  ;;  %v3525_v15 = vld [vmem:[#allocation5 + $0x108] sm:$0xff]  ;;  %vm8055_vm14 = vmmov %vm8050_vm6 }
 0x49a   : > { %v3157_v26 = vpack.c.bf16 %v3153_v20, %v3153_v20  ;;  %v3163_v16 = vrot.slane %v3155_v52, 4  ;;  %v3114_v10 = vsel %vm8052_vm10, %v3106_v12, 0.0  ;;  %vm8054_vm13 = vnez %v8053_v60  ;;  %3589 = vmatprep.subr.bf16.mxu0 %v3525_v15  ;;  %vm8056_vm4 = vmmov %vm8050_vm6  ;;  %v8068_v20 = vld [vmem:[#allocation68_spill] sm:$0xff] }
 0x49b   : > { %v3111_v55 = vsel %vm8054_vm13, %v3103_v31, 0.0  ;;  %v3164_v39 = vrot.slane %v3156_v14, 4  ;;  %v3118_v58 = vpack.c.bf16 %v3114_v10, %v3114_v10  ;;  %3174 = vst [vmem:[#allocation5 + $0x138] sm:$0xf0] %v3166_v3  ;;  %v3104_v40 = vsel %vm8055_vm14, %v4145_v13, %v4314_v11  ;;  %v3526_v23 = vld [vmem:[#allocation5 + $0x110] sm:$0xff]  ;;  %v3527_v13 = vld [vmem:[#allocation5 + $0x118] sm:$0xff]  ;;  %v4333_v57 = vpop.permute.xlu0 %4332 }
 0x49c   : > { %v3165_v24 = vrot.slane %v3157_v26, 4  ;;  %v3115_v43 = vpack.c.bf16 %v3111_v55, %v3111_v55  ;;  %3171 = vst [vmem:[#allocation5 + $0x120] sm:$0xf0] %v3163_v16  ;;  %v3105_v4 = vsel %vm8056_vm4, %v4314_v11, %v4329_v49  ;;  %v4340_v7 = vunpack.i.h.bf16 %v6907_v5  ;;  %v6945_v49 = vpop.permute.xlu1 %4357  ;;  %v3524_v61 = vld [vmem:[#allocation5 + $0x100] sm:$0xff]  ;;  %3630 = vmatprep.subr.bf16.mxu1 %v3527_v13 }
 0x49d   : > { %v4339_v51 = vunpack.i.l.bf16 %v6907_v5  ;;  %3172 = vst [vmem:[#allocation5 + $0x128] sm:$0xf0] %v3164_v39  ;;  %3122 = vst [vmem:[#allocation5 + $0x138] sm:$0xf] %v3118_v58  ;;  %vm8058_vm0 = vnez %v8057_v35  ;;  %vm8060_vm15 = vnez %v8059_v50  ;;  %v4325_v6 = vunpack.i.h.bf16 %v4323_v47  ;;  %3590 = vmatpush1.bf16.msra.mxu0 %v3524_v61  ;;  %3631 = vmatpush1.bf16.msra.mxu1 %v3526_v23 }
 0x49e   : > { %3173 = vst [vmem:[#allocation5 + $0x130] sm:$0xf0] %v3165_v24  ;;  %3119 = vst [vmem:[#allocation5 + $0x120] sm:$0xf] %v3115_v43  ;;  %v3112_v29 = vsel %vm8058_vm0, %v3104_v40, 0.0  ;;  %v3113_v21 = vsel %vm8060_vm15, %v3105_v4, 0.0  ;;  %v4324_v63 = vunpack.i.l.bf16 %v4323_v47  ;;  %v4350_v2 = vunpack.i.h.bf16 %v6929_v48 }
 0x49f   : > { %v3116_v11 = vpack.c.bf16 %v3112_v29, %v3112_v29  ;;  %v3117_v44 = vpack.c.bf16 %v3113_v21, %v3113_v21  ;;  %vm8061_vm9 = vcmask 531456   ;;  %vm8062_vm8 = vnez %v7739_v53  ;;  %v6965_v31 = vpop.permute.xlu0 %4342  ;;  %v8074_v40 = vld [vmem:[#allocation69_spill] sm:$0xff] }
 0x4a0   : > { %v3238_v5 = vsel %vm8061_vm9, %v4339_v51, %v4340_v7  ;;  %vm8063_vm6 = vmmov %vm8061_vm9  ;;  %vm8066_vm14 = vnez %v7712_v30  ;;  %vm8067_vm4 = vnez %v7715_v38  ;;  %vm8069_vm0 = vnez %v8068_v20  ;;  %v6967_v47 = vpop.permute.xlu1 %4367 }
 0x4a1   : > { %v3246_v56 = vsel %vm8062_vm8, %v3238_v5, 0.0  ;;  %v3235_v33 = vsel %vm8063_vm6, %v4325_v6, %v4165_v25  ;;  %vm8064_vm10 = vmmov %vm8063_vm6  ;;  %3120 = vst [vmem:[#allocation5 + $0x128] sm:$0xf] %v3116_v11  ;;  %v4335_v16 = vunpack.i.h.bf16 %v4333_v57  ;;  %v4334_v45 = vunpack.i.l.bf16 %v4333_v57 }
 0x4a2   : > { %v3236_v18 = vsel %vm8064_vm10, %v4165_v25, %v4324_v63  ;;  %vm8065_vm13 = vmmov %vm8063_vm6  ;;  %3121 = vst [vmem:[#allocation5 + $0x130] sm:$0xf] %v3117_v44  ;;  %v3250_v36 = vpack.c.bf16 %v3246_v56, %v3246_v56  ;;  %v3243_v54 = vsel %vm8066_vm14, %v3235_v33, 0.0  ;;  %v4349_v25 = vunpack.i.l.bf16 %v6929_v48  ;;  %v8080_v56 = vld [vmem:[#allocation66_spill] sm:$0xff] }
 0x4a3   : > { %v3237_v52 = vsel %vm8065_vm13, %v4324_v63, %v4339_v51  ;;  %v3244_v53 = vsel %vm8067_vm4, %v3236_v18, 0.0  ;;  %v3247_v26 = vpack.c.bf16 %v3243_v54, %v3243_v54  ;;  %v4360_v30 = vunpack.i.h.bf16 %v6945_v49  ;;  %v4353_v27 = vpop.permute.xlu0 %4352  ;;  %v8082_v18 = vld [vmem:[#allocation67_spill] sm:$0xff] }
 0x4a4   : > { %v3245_v14 = vsel %vm8069_vm0, %v3237_v52, 0.0  ;;  %v3248_v62 = vpack.c.bf16 %v3244_v53, %v3244_v53  ;;  %v3258_v3 = vrot.slane %v3250_v36, 4  ;;  %vm8070_vm15 = vcmask 580608   ;;  %v3531_v58 = vld [vmem:[#allocation5 + $0x138] sm:$0xff]  ;;  %v6988_v29 = vpop.permute.xlu1 %4372 }
 0x4a5   : > { %v3249_v12 = vpack.c.bf16 %v3245_v14, %v3245_v14  ;;  %v3255_v10 = vrot.slane %v3247_v26, 4  ;;  %v3198_v55 = vsel %vm8070_vm15, %v4349_v25, %v4350_v2  ;;  %vm8071_vm9 = vmmov %vm8070_vm15  ;;  %vm8075_vm10 = vnez %v8074_v40  ;;  %3632 = vmatprep.subr.bf16.mxu1 %v3531_v58  ;;  %v3528_v50 = vld [vmem:[#allocation5 + $0x120] sm:$0xff] }
 0x4a6   : > { %v3256_v38 = vrot.slane %v3248_v62, 4  ;;  %3266 = vst [vmem:[#allocation5 + $0x158] sm:$0xf0] %v3258_v3  ;;  %v3206_v15 = vsel %vm6391_vm5, %v3198_v55, 0.0  ;;  %v3195_v48 = vsel %vm8071_vm9, %v4335_v16, %v4175_v8  ;;  %vm8072_vm8 = vmmov %vm8071_vm9  ;;  %vm8076_vm5 = vnez %v7753_v59  ;;  %v8088_v62 = vld [vmem:[#allocation64_spill] sm:$0xff]  ;;  %v8091_v16 = vld [vmem:[#allocation65_spill] sm:$0xff] }
 0x4a7   : > { %v3257_v60 = vrot.slane %v3249_v12, 4  ;;  %v3196_v39 = vsel %vm8072_vm8, %v4175_v8, %v4334_v45  ;;  %vm8073_vm6 = vmmov %vm8072_vm8  ;;  %3263 = vst [vmem:[#allocation5 + $0x140] sm:$0xf0] %v3255_v10  ;;  %v3210_v43 = vpack.c.bf16 %v3206_v15, %v3206_v15  ;;  %v3203_v4 = vsel %vm8075_vm10, %v3195_v48, 0.0  ;;  %v4363_v61 = vpop.permute.xlu0 %4362 }
 0x4a8   : > { %v3197_v24 = vsel %vm8073_vm6, %v4334_v45, %v4349_v25  ;;  %3264 = vst [vmem:[#allocation5 + $0x148] sm:$0xf0] %v3256_v38  ;;  %v3204_v34 = vsel %vm8076_vm5, %v3196_v39, 0.0  ;;  %v3207_v51 = vpack.c.bf16 %v3203_v4, %v3203_v4  ;;  %vm8077_vm13 = vcmask 523264   ;;  %v3529_v63 = vld [vmem:[#allocation5 + $0x128] sm:$0xff]  ;;  %v4383_v10 = vpop.permute.xlu1 %4382 }
 0x4a9   : > { %3265 = vst [vmem:[#allocation5 + $0x150] sm:$0xf0] %v3257_v60  ;;  %v3205_v7 = vsel %vm6376_vm2, %v3197_v24, 0.0  ;;  %v3208_v8 = vpack.c.bf16 %v3204_v34, %v3204_v34  ;;  %v3290_v35 = vsel %vm8077_vm13, %v4360_v30, %v6524_v28  ;;  %3214 = vst [vmem:[#allocation5 + $0x158] sm:$0xf] %v3210_v43  ;;  %v4359_v59 = vunpack.i.l.bf16 %v6945_v49  ;;  %v3530_v13 = vld [vmem:[#allocation5 + $0x130] sm:$0xff]  ;;  %3591 = vmatprep.subr.bf16.mxu0 %v3529_v63 }
 0x4aa   : > { %v3209_v23 = vpack.c.bf16 %v3205_v7, %v3205_v7  ;;  %v3298_v21 = vsel %vm6297_vm11, %v3290_v35, 0.0  ;;  %v4345_v42 = vunpack.i.h.bf16 %v6965_v31  ;;  %v4344_v6 = vunpack.i.l.bf16 %v6965_v31  ;;  %3211 = vst [vmem:[#allocation5 + $0x140] sm:$0xf] %v3207_v51  ;;  %3633 = vmatpush1.bf16.msra.mxu1 %v3530_v13  ;;  %3592 = vmatpush1.bf16.msra.mxu0 %v3528_v50  ;;  %vm8085_vm15 = vmmov %vm8077_vm13  ;;  %v8098_v63 = vld [vmem:[#allocation70_spill] sm:$0xff] }
 0x4ab   : > { %3212 = vst [vmem:[#allocation5 + $0x148] sm:$0xf] %v3208_v8  ;;  %v3302_v57 = vpack.c.bf16 %v3298_v21, %v3298_v21  ;;  %v4370_v28 = vunpack.i.h.bf16 %v6967_v47  ;;  %v4369_v11 = vunpack.i.l.bf16 %v6967_v47  ;;  %v4355_v41 = vunpack.i.h.bf16 %v4353_v27  ;;  %vm8086_vm9 = vmmov %vm8077_vm13  ;;  %v4378_v0 = vpop.permute.xlu0 %4377 }
 0x4ac   : > { %3213 = vst [vmem:[#allocation5 + $0x150] sm:$0xf] %v3209_v23  ;;  %vm8078_vm11 = vcmask 515072   ;;  %v4354_v5 = vunpack.i.l.bf16 %v4353_v27  ;;  %v4375_v2 = vunpack.i.h.bf16 %v6988_v29  ;;  %vm8081_vm14 = vnez %v8080_v56  ;;  %vm8087_vm8 = vmmov %vm8086_vm9  ;;  %v4393_v31 = vpop.permute.xlu1 %4392 }
 0x4ad   : > { %v3327_v49 = vsel %vm8078_vm11, %v4345_v42, %v4195_v46  ;;  %vm8079_vm2 = vmmov %vm8078_vm11  ;;  %3306 = vst [vmem:[#allocation5 + $0x178] sm:$0xf] %v3302_v57  ;;  %vm8083_vm4 = vnez %v8082_v18  ;;  %vm8084_vm0 = vcmask 457728   ;;  %v3289_v54 = vsel %vm8085_vm15, %v4355_v41, %v4360_v30  ;;  %v8100_v57 = vld [vmem:[#allocation71_spill] sm:$0xff] }
 0x4ae   : > { %v3328_v44 = vsel %vm8079_vm2, %v4195_v46, %v4344_v6  ;;  %v3335_v33 = vsel %vm8081_vm14, %v3327_v49, 0.0  ;;  %v3420_v36 = vsel %vm8084_vm0, %v4369_v11, %v4370_v28  ;;  %v3287_v20 = vsel %vm8086_vm9, %v4359_v59, %v4354_v5  ;;  %vm8094_vm13 = vmmov %vm8084_vm0 }
 0x4af   : > { %v3336_v52 = vsel %vm8083_vm4, %v3328_v44, 0.0  ;;  %v3339_v53 = vpack.c.bf16 %v3335_v33, %v3335_v33  ;;  %v3428_v46 = vsel %vm6355_vm3, %v3420_v36, 0.0  ;;  %v3288_v26 = vsel %vm8087_vm8, %v4354_v5, %v4355_v41  ;;  %vm8093_vm3 = vmmov %vm8084_vm0  ;;  %v4388_v35 = vpop.permute.xlu0 %4387 }
 0x4b0   : > { %v3340_v9 = vpack.c.bf16 %v3336_v52, %v3336_v52  ;;  %v3432_v14 = vpack.c.bf16 %v3428_v46, %v3428_v46  ;;  %vm8089_vm6 = vnez %v8088_v62  ;;  %vm8090_vm10 = vnez %v7766_v37  ;;  %v3535_v48 = vld [vmem:[#allocation5 + $0x158] sm:$0xff] }
 0x4b1   : > { %v3295_v12 = vsel %vm8089_vm6, %v3287_v20, 0.0  ;;  %v3297_v25 = vsel %vm8090_vm10, %v3289_v54, 0.0  ;;  %v3347_v47 = vrot.slane %v3339_v53, 4  ;;  %vm8092_vm5 = vnez %v8091_v16  ;;  %3634 = vmatprep.subr.bf16.mxu1 %v3535_v48  ;;  %v3532_v4 = vld [vmem:[#allocation5 + $0x140] sm:$0xff] }
 0x4b2   : > { %v3348_v3 = vrot.slane %v3340_v9, 4  ;;  %v3296_v45 = vsel %vm8092_vm5, %v3288_v26, 0.0  ;;  %v3299_v30 = vpack.c.bf16 %v3295_v12, %v3295_v12  ;;  %v3440_v38 = vrot.slane %v3432_v14, 4  ;;  %v3533_v43 = vld [vmem:[#allocation5 + $0x148] sm:$0xff]  ;;  %v8111_v26 = vld [vmem:[#allocation74_spill] sm:$0xff] }
 0x4b3   : > { %v3300_v60 = vpack.c.bf16 %v3296_v45, %v3296_v45  ;;  %v3301_v55 = vpack.c.bf16 %v3297_v25, %v3297_v25  ;;  %v3422_v15 = vsel %vm8093_vm3, %v4375_v2, %v6526_v19  ;;  %3355 = vst [vmem:[#allocation5 + $0x160] sm:$0xf0] %v3347_v47  ;;  %v4374_v39 = vunpack.i.l.bf16 %v6988_v29  ;;  %v3534_v40 = vld [vmem:[#allocation5 + $0x150] sm:$0xff]  ;;  %3593 = vmatprep.subr.bf16.mxu0 %v3533_v43  ;;  %v3470_v52 = vpop.permute.xlu0 %3469  ;;  %v8109_v9 = vld [vmem:[#allocation75_spill] sm:$0xff] }
 0x4b4   : > { %3356 = vst [vmem:[#allocation5 + $0x168] sm:$0xf0] %v3348_v3  ;;  %3303 = vst [vmem:[#allocation5 + $0x160] sm:$0xf] %v3299_v30  ;;  %v3430_v37 = vsel %vm6415_vm7, %v3422_v15, 0.0  ;;  %v3421_v24 = vsel %vm8094_vm13, %v4370_v28, %v4375_v2  ;;  %v4365_v58 = vunpack.i.h.bf16 %v4363_v61  ;;  %v4364_v7 = vunpack.i.l.bf16 %v4363_v61  ;;  %3635 = vmatpush1.bf16.msra.mxu1 %v3534_v40  ;;  %3594 = vmatpush1.bf16.msra.mxu0 %v3532_v4  ;;  %v8119_v15 = vld [vmem:[#allocation78_spill] sm:$0xff] }
 0x4b5   : > { %3448 = vst [vmem:[#allocation5 + $0x188] sm:$0xf0] %v3440_v38  ;;  %3304 = vst [vmem:[#allocation5 + $0x168] sm:$0xf] %v3300_v60  ;;  %v3434_v19 = vpack.c.bf16 %v3430_v37, %v3430_v37  ;;  %v3429_v34 = vsel %vm6408_vm1, %v3421_v24, 0.0  ;;  %v4385_v27 = vunpack.i.h.bf16 %v4383_v10  ;;  %v4384_v8 = vunpack.i.l.bf16 %v4383_v10 }
 0x4b6   : > { %3305 = vst [vmem:[#allocation5 + $0x170] sm:$0xf] %v3301_v55  ;;  %vm8095_vm7 = vmmov %vm8084_vm0  ;;  %v3433_v51 = vpack.c.bf16 %v3429_v34, %v3429_v34  ;;  %v4380_v23 = vunpack.i.h.bf16 %v4378_v0  ;;  %vm8096_vm11 = vnez %v7788_v1  ;;  %v3329_v32 = vsel %vm8079_vm2, %v4344_v6, %v4364_v7 }
 0x4b7   : > { %v3419_v17 = vsel %vm8095_vm7, %v4374_v39, %v4369_v11  ;;  %v3442_v29 = vrot.slane %v3434_v19, 4  ;;  %vm8097_vm1 = vmmov %vm8079_vm2  ;;  %vm8099_vm14 = vnez %v8098_v63  ;;  %vm8101_vm4 = vnez %v8100_v57  ;;  %v8121_v39 = vld [vmem:[#allocation72_spill] sm:$0xff] }
 0x4b8   : > { %v3427_v50 = vsel %vm8096_vm11, %v3419_v17, 0.0  ;;  %v3330_v21 = vsel %vm8097_vm1, %v4364_v7, %v4365_v58  ;;  %v3441_v42 = vrot.slane %v3433_v51, 4  ;;  %v3337_v13 = vsel %vm8099_vm14, %v3329_v32, 0.0  ;;  %v8123_v58 = vld [vmem:[#allocation73_spill] sm:$0xff]  ;;  %v4409_v32 = vld [vmem:[#allocation4 + $0xe0] sm:$0xff] }
 0x4b9   : > { %v3431_v59 = vpack.c.bf16 %v3427_v50, %v3427_v50  ;;  %v3338_v28 = vsel %vm8101_vm4, %v3330_v21, 0.0  ;;  %3450 = vst [vmem:[#allocation5 + $0x198] sm:$0xf0] %v3442_v29  ;;  %v3341_v11 = vpack.c.bf16 %v3337_v13, %v3337_v13  ;;  %vm8102_vm0 = vcmask 465920  }
 0x4ba   : > { %v3342_v41 = vpack.c.bf16 %v3338_v28, %v3338_v28  ;;  %v3382_v1 = vsel %vm8102_vm0, %v4385_v27, %v6628_v22  ;;  %v4379_v49 = vunpack.i.l.bf16 %v4378_v0  ;;  %3449 = vst [vmem:[#allocation5 + $0x190] sm:$0xf0] %v3441_v42  ;;  %vm8104_vm15 = vmmov %vm8102_vm0  ;;  %v8107_v22 = vld [vmem:[#allocation76_spill] sm:$0xff]  ;;  %vm8110_vm10 = vnez %v8109_v9  ;;  %v8115_v0 = vld [vmem:[#allocation79_spill] sm:$0xff] }
 0x4bb   : > { %v3439_v44 = vrot.slane %v3431_v59, 4  ;;  %v3390_v5 = vsel %vm6444_vm12, %v3382_v1, 0.0  ;;  %v3381_v2 = vsel %vm8104_vm15, %v4380_v23, %v4385_v27  ;;  %v3349_v61 = vrot.slane %v3341_v11, 4  ;;  %vm8105_vm9 = vmmov %vm8102_vm0  ;;  %v3536_v36 = vld [vmem:[#allocation5 + $0x160] sm:$0xff] }
 0x4bc   : > { %v3350_v56 = vrot.slane %v3342_v41, 4  ;;  %v3394_v33 = vpack.c.bf16 %v3390_v5, %v3390_v5  ;;  %v3379_v18 = vsel %vm8105_vm9, %v4384_v8, %v4379_v49  ;;  %vm8106_vm8 = vmmov %vm8102_vm0  ;;  %vm8108_vm6 = vnez %v8107_v22  ;;  %v3537_v14 = vld [vmem:[#allocation5 + $0x168] sm:$0xff] }
 0x4bd   : > { %3447 = vst [vmem:[#allocation5 + $0x180] sm:$0xf0] %v3439_v44  ;;  %v3380_v54 = vsel %vm8106_vm8, %v4379_v49, %v4380_v23  ;;  %v3387_v53 = vsel %vm8108_vm6, %v3379_v18, 0.0  ;;  %v3389_v46 = vsel %vm8110_vm10, %v3381_v2, 0.0  ;;  %v4395_v20 = vunpack.i.h.bf16 %v4393_v31  ;;  %3357 = vst [vmem:[#allocation5 + $0x170] sm:$0xf0] %v3349_v61  ;;  %3595 = vmatprep.subr.bf16.mxu0 %v3537_v14 }
 0x4be   : > { %3358 = vst [vmem:[#allocation5 + $0x178] sm:$0xf0] %v3350_v56  ;;  %3398 = vst [vmem:[#allocation5 + $0x198] sm:$0xf] %v3394_v33  ;;  %vm8112_vm12 = vnez %v8111_v26  ;;  %v3391_v12 = vpack.c.bf16 %v3387_v53, %v3387_v53  ;;  %v3393_v25 = vpack.c.bf16 %v3389_v46, %v3389_v46  ;;  %v4390_v47 = vunpack.i.h.bf16 %v4388_v35  ;;  %3596 = vmatpush1.bf16.msra.mxu0 %v3536_v36 }
 0x4bf   : > { %v3388_v62 = vsel %vm8112_vm12, %v3380_v54, 0.0  ;;  %v4394_v16 = vunpack.i.l.bf16 %v4393_v31  ;;  %v4389_v45 = vunpack.i.l.bf16 %v4388_v35  ;;  %vm8113_vm5 = vcmask 449536   ;;  %v4410_v21 = vld.sshfl [vmem:[%s7089_s4] sm:$0x33 pattern:$0x76325410] }
 0x4c0   : > { %v3392_v3 = vpack.c.bf16 %v3388_v62, %v3388_v62  ;;  %v3474_v30 = vsel %vm8113_vm5, %v4395_v20, %v3470_v52  ;;  %3395 = vst [vmem:[#allocation5 + $0x180] sm:$0xf] %v3391_v12  ;;  %3397 = vst [vmem:[#allocation5 + $0x190] sm:$0xf] %v3393_v25  ;;  %vm8116_vm13 = vnez %v8115_v0  ;;  %vm8120_vm2 = vnez %v8119_v15 }
 0x4c1   : > { %vm8114_vm3 = vmmov %vm8113_vm5  ;;  %v3482_v38 = vsel %vm8116_vm13, %v3474_v30, 0.0  ;;  %vm8122_vm1 = vnez %v8121_v39  ;;  %vm8124_vm14 = vnez %v8123_v58  ;;  %vm3655_vm4 = vcmask 1043456  }
 0x4c2   : > { %v3473_v10 = vsel %vm8114_vm3, %v4390_v47, %v4395_v20  ;;  %3396 = vst [vmem:[#allocation5 + $0x188] sm:$0xf] %v3392_v3  ;;  %vm8117_vm7 = vmmov %vm8114_vm3  ;;  %v3486_v37 = vpack.c.bf16 %v3482_v38, %v3482_v38 }
 0x4c3   : > { %v3471_v60 = vsel %vm8117_vm7, %v4394_v16, %v4389_v45  ;;  %vm8118_vm11 = vmmov %vm8114_vm3  ;;  %v3481_v48 = vsel %vm8120_vm2, %v3473_v10, 0.0 }
 0x4c4   : > { %v3472_v55 = vsel %vm8118_vm11, %v4389_v45, %v4390_v47  ;;  %v3479_v24 = vsel %vm8122_vm1, %v3471_v60, 0.0  ;;  %v3485_v40 = vpack.c.bf16 %v3481_v48, %v3481_v48  ;;  %3490 = vst [vmem:[#allocation5 + $0x1b8] sm:$0xf] %v3486_v37  ;;  %v3538_v7 = vld [vmem:[#allocation5 + $0x170] sm:$0xff] }
 0x4c5   : > { %v3480_v43 = vsel %vm8124_vm14, %v3472_v55, 0.0  ;;  %v3483_v4 = vpack.c.bf16 %v3479_v24, %v3479_v24  ;;  %v3539_v34 = vld [vmem:[#allocation5 + $0x178] sm:$0xff] }
 0x4c6   : > { %v3484_v19 = vpack.c.bf16 %v3480_v43, %v3480_v43  ;;  %3489 = vst [vmem:[#allocation5 + $0x1b0] sm:$0xf] %v3485_v40  ;;  %3636 = vmatprep.subr.bf16.mxu1 %v3539_v34  ;;  %v3543_v27 = vld [vmem:[#allocation5 + $0x198] sm:$0xff] }
 0x4c7   : > { %3487 = vst [vmem:[#allocation5 + $0x1a0] sm:$0xf] %v3483_v4  ;;  %3637 = vmatpush1.bf16.msra.mxu1 %v3538_v7  ;;  %v3540_v17 = vld [vmem:[#allocation5 + $0x180] sm:$0xff]  ;;  %v3542_v8 = vld [vmem:[#allocation5 + $0x190] sm:$0xff] }
 0x4c8   : > { %3488 = vst [vmem:[#allocation5 + $0x1a8] sm:$0xf] %v3484_v19  ;;  %3638 = vmatprep.subr.bf16.mxu1 %v3543_v27 }
 0x4c9   : > { %v3541_v51 = vld [vmem:[#allocation5 + $0x188] sm:$0xff] }
 0x4ca   : > { %3597 = vmatprep.subr.bf16.mxu0 %v3541_v51 }
 0x4cb   : > { %3598 = vmatpush1.bf16.msra.mxu0 %v3540_v17  ;;  %v3547_v23 = vld [vmem:[#allocation5 + $0x1b8] sm:$0xff]  ;;  %3639 = vmatpush1.bf16.msra.mxu1 %v3542_v8  ;;  %v3560_v59 = vpop.permute.xlu1 %3559 }
 0x4cc   : > { %3640 = vmatprep.subr.bf16.mxu1 %v3547_v23 }
 0x4cd   : > { %v3546_v50 = vld [vmem:[#allocation5 + $0x1b0] sm:$0xff] }
 0x4ce   : > { %v3544_v29 = vld [vmem:[#allocation5 + $0x1a0] sm:$0xff] }
 0x4cf   : > { %v3545_v35 = vld [vmem:[#allocation5 + $0x1a8] sm:$0xff]  ;;  %3641 = vmatpush1.bf16.msra.mxu1 %v3546_v50 }
 0x4d0   : > { %3599 = vmatprep.subr.bf16.mxu0 %v3545_v35  ;;  %3642 = vmatprep.subr.bf16.mxu1 %v4409_v32 }
 0x4d1   : > { %3600 = vmatpush1.bf16.msra.mxu0 %v3544_v29 }
 0x4d2   : > { %3601 = vmatprep.subr.bf16.mxu0 %v4409_v32 }
 0x4d3   : > { %3643 = vmatpush1.bf16.msra.mxu1 %v4409_v32 }
 0x4d4   : > { %3644 = vmatprep.subr.bf16.mxu1 %v4409_v32 }
 0x4d5   : > { %3602 = vmatpush1.bf16.msra.mxu0 %v4409_v32 }
 0x4d6   : > { %3603 = vmatprep.subr.bf16.mxu0 %v4409_v32 }
 0x4d7   : > { %3645 = vmatpush1.bf16.msra.mxu1 %v4409_v32 }
 0x4d9   : > { %3604 = vmatpush1.bf16.msra.mxu0 %v4409_v32 }
 0x4da   : > { %3647 = vmatmul.mubr.bf16.vlgmr.msra.gmra.mrb[4].mxu1 %v4410_v21 }
 0x4dc   : > { %3606 = vmatmul.mubr.bf16.vlgmr.msra.gmra.mrb[4].mxu0 %v4410_v21 }
 0x5ad   : > { %v3648_v57 = vpop.f32.mrb[4].mxu1 }
 0x5ae   : > { %v3649_v41 = vadd.f32 %v3648_v57, %v3560_v59  ;;  %v3650_v1 = vpop.f32.mrb[5].mxu1 }
 0x5af   : > { %v3607_v42 = vpop.f32.mrb[4].mxu0  ;;  %v3652_v44 = vpop.f32.mrb[6].mxu1  ;;  %v3651_v2 = vadd.f32 %v3650_v1, %v3560_v59 }
 0x5b0   : > { %v3608_v63 = vadd.f32 %v3607_v42, %v3560_v59  ;;  %v3609_v13 = vpop.f32.mrb[5].mxu0  ;;  %v3659_v5 = vsel %vm3655_vm4, %v3649_v41, 0.0  ;;  %v3653_v61 = vpop.f32.mrb[7].mxu1 }
 0x5b1   : > { %v3610_v28 = vadd.f32 %v3609_v13, %v3560_v59  ;;  %v3611_v11 = vpop.f32.mrb[6].mxu0  ;;  %v3661_v18 = vsel %vm3655_vm4, %v3651_v2, 0.0 }
 0x5b2   : > { %v3656_v49 = vsel %vm3655_vm4, %v3608_v63, 0.0  ;;  %v3612_v31 = vpop.f32.mrb[7].mxu0 }
 0x5b3   : > { %v3657_v6 = vsel %vm3655_vm4, %v3610_v28, 0.0 }
 0x5b4   : > { %v3658_v56 = vadd.f32 %v3657_v6, %v3656_v49 }
 0x5b6   : > { %v3660_v33 = vadd.f32 %v3659_v5, %v3658_v56 }
 0x5b8   : > { %v3662_v52 = vadd.f32 %v3661_v18, %v3660_v33 }
 0x5ba   : > { %3663 = vadd.xlane.f32.xlu0 %v3662_v52 }
 0x647   : > { %v3664_v36 = vpop.xlane.xlu0 %3663 }
 0x648   : > { %v3665_v54 = vmul.f32 0.001953125, %v3664_v36 }
 0x64a   : > { %v3666_v22 = vsub.f32 %v3608_v63, %v3665_v54  ;;  %v3667_v53 = vsub.f32 %v3610_v28, %v3665_v54  ;;  %v3668_v9 = vsub.f32 %v3649_v41, %v3665_v54  ;;  %v3669_v46 = vsub.f32 %v3651_v2, %v3665_v54 }
 0x64c   : > { %v3670_v20 = vmul.f32 %v3666_v22, %v3666_v22  ;;  %v3671_v14 = vmul.f32 %v3667_v53, %v3667_v53  ;;  %v3672_v26 = vmul.f32 %v3668_v9, %v3668_v9  ;;  %v3673_v62 = vmul.f32 %v3669_v46, %v3669_v46 }
 0x64e   : > { %v3674_v12 = vsel %vm3655_vm4, %v3670_v20, 0.0  ;;  %v3675_v25 = vsel %vm3655_vm4, %v3671_v14, 0.0  ;;  %v3677_v3 = vsel %vm3655_vm4, %v3672_v26, 0.0  ;;  %v3679_v45 = vsel %vm3655_vm4, %v3673_v62, 0.0 }
 0x64f   : > { %v3676_v47 = vadd.f32 %v3675_v25, %v3674_v12 }
 0x651   : > { %v3678_v16 = vadd.f32 %v3677_v3, %v3676_v47 }
 0x653   : > { %v3680_v30 = vadd.f32 %v3679_v45, %v3678_v16 }
 0x655   : > { %3681 = vadd.xlane.f32.xlu1 %v3680_v30 }
 0x6e2   : > { %v3682_v10 = vpop.xlane.xlu1 %3681 }
 0x6e3   : > { %v3683_v0 = vmul.f32 0.001953125, %v3682_v10 }
 0x6e5   : > { %v3684_v38 = vadd.f32 1e-05, %v3683_v0 }
 0x6e7   : > { %4405 = vrsqrt.f32 %v3684_v38 }
 0x6f1   : > { %v4406_v60 = vpop.eup %4405 }
 0x6f2   : > { %v3686_v55 = vmul.f32 %v4406_v60, %v3666_v22  ;;  %v3687_v15 = vmul.f32 %v4406_v60, %v3667_v53  ;;  %v3688_v48 = vmul.f32 %v4406_v60, %v3668_v9  ;;  %v3689_v37 = vmul.f32 %v4406_v60, %v3669_v46 }
 0x6f4   : > { %vm3690_vm0 = vcmp.gt.f32.partialorder %v3686_v55, 0.0  ;;  %vm3691_vm15 = vcmp.gt.f32.partialorder %v3687_v15, 0.0  ;;  %vm3692_vm9 = vcmp.gt.f32.partialorder %v3688_v48, 0.0  ;;  %vm3693_vm8 = vcmp.gt.f32.partialorder %v3689_v37, 0.0 }
 0x6f5   : > { %v3694_v39 = vmul.f32 0.01, %v3686_v55  ;;  %v3695_v24 = vmul.f32 0.01, %v3687_v15  ;;  %v3696_v58 = vmul.f32 0.01, %v3688_v48 }
 0x6f6   : > { %v3697_v43 = vmul.f32 0.01, %v3689_v37 }
 0x6f7   : > { %v3698_v40 = vsel %vm3690_vm0, %v3686_v55, %v3694_v39  ;;  %v3699_v4 = vsel %vm3691_vm15, %v3687_v15, %v3695_v24  ;;  %v3700_v19 = vsel %vm3692_vm9, %v3688_v48, %v3696_v58 }
 0x6f8   : > { %v3701_v34 = vsel %vm3693_vm8, %v3689_v37, %v3697_v43  ;;  %v3706_v7 = vcombine.low %v3698_v40, %v3699_v4 }
 0x6f9   : > { %v3707_v27 = vcombine.low %v3700_v19, %v3701_v34 }
 0x6fa   : > { %3710 = vst [vmem:[%s251_s11] sm:$0xff] %v3706_v7 }
 0x6fb   : > { %3711 = vst [vmem:[%s251_s11 + $0x8] sm:$0xff] %v3707_v27 }
 0x6fc PF: > { %s16_s21 = sadd.s32 1, %s4417_s21  }
 0x6fd   : > { %p13_p4 = scmp.ge.s32.totalorder %s16_s21, 4  }
 0x6ff   :  { %15 = sbr.rel (!%p13_p4) target bundleno = 1 (0x1), region = 76 }

</bundles_post_ra>
